<compile_context>
chip_gen: v5e
topology: v5e:2x2
jax: 0.10.0
libtpu: 0.0.40
codegen_flags: <defaults>
</compile_context>

<pallas_src>
import functools
import math

import jax
import jax.numpy as jnp
from jax.experimental import pallas as pl
from jax.experimental.pallas import tpu as pltpu


def _normalize(x, eps):
    """LayerNorm core (no affine): PyTorch uses biased variance + eps inside sqrt."""
    mean = jnp.mean(x, axis=-1, keepdims=True)
    c = x - mean
    var = jnp.mean(c * c, axis=-1, keepdims=True)
    return c * jax.lax.rsqrt(var + eps)


def _layernorm(x, gamma, beta, eps=1e-12):
    return _normalize(x, eps) * gamma + beta


def mhca_kernel(tq_ref, memk_ref, mem_ref,
                wk_fc_ref, bk_fc_ref, wv_fc_ref, bv_fc_ref,
                wqh_ref, bqh_ref, wkh_ref, bkh_ref, wvh_ref, bvh_ref,
                woh_ref, bo_ref,
                out_ref,
                kt_s, vp_s,
                *, nhead, ln_eps):
    # grid = (B, HW // TQ); program_id(0) = batch, program_id(1) = query tile.
    #   tq_ref   (1, D, TQ)  bf16  : (tgt + query_pos), NCHW layout (channels first)
    #   memk_ref (1, L, Kd)  bf16  : memory + pos   (key path)
    #   mem_ref  (1, L, Kd)  bf16  : memory         (value path)
    #   out_ref  (1, TQ, D)  f32
    #   kt_s     (nhead, hd, L) bf16 scratch : per-head K, pre-transposed
    #   vp_s     (nhead, L, hd) bf16 scratch : per-head V
    qi = pl.program_id(1)

    # ---- K/V path: once per batch element, resident across all query tiles ----
    @pl.when(qi == 0)
    def _():
        memk = memk_ref[0]                                            # (L, Kd)
        mem = mem_ref[0]                                              # (L, Kd)
        k_pre = jnp.dot(memk, wk_fc_ref[...],
                        preferred_element_type=jnp.float32) + bk_fc_ref[...]
        v_pre = jnp.dot(mem, wv_fc_ref[...],
                        preferred_element_type=jnp.float32) + bv_fc_ref[...]
        # LayerNorm core only; gamma/beta are folded into wkh/bkh and wvh/bvh.
        k_nrm = _normalize(k_pre, ln_eps).astype(jnp.bfloat16)
        v_nrm = _normalize(v_pre, ln_eps).astype(jnp.bfloat16)
        for h in range(nhead):                       # static unroll, nhead small
            kp_h = jnp.dot(k_nrm, wkh_ref[h],
                           preferred_element_type=jnp.float32) + bkh_ref[h]
            vp_h = jnp.dot(v_nrm, wvh_ref[h],
                           preferred_element_type=jnp.float32) + bvh_ref[h]
            kt_s[h] = jnp.transpose(kp_h).astype(kt_s.dtype)          # (hd, L)
            vp_s[h] = vp_h.astype(vp_s.dtype)                         # (L, hd)

    # ---- query tile: NCHW -> (TQ, D) transpose done on-chip (XLU), not in HBM ----
    q_t = jnp.transpose(tq_ref[0].astype(jnp.float32)).astype(jnp.bfloat16)

    # bo folded into the accumulator init (saves one full (TQ, D) VPU add).
    acc = jnp.broadcast_to(bo_ref[...], out_ref.shape[1:]).astype(jnp.float32)
    for h in range(nhead):                           # per-head weights: no slicing
        # 1/sqrt(hd) is folded into wqh/bqh host-side.
        qh = jnp.dot(q_t, wqh_ref[h],
                     preferred_element_type=jnp.float32) + bqh_ref[h]  # (TQ, hd)
        s = jnp.dot(qh.astype(jnp.bfloat16), kt_s[h],
                    preferred_element_type=jnp.float32)                # (TQ, L)
        s = s - jnp.max(s, axis=-1, keepdims=True)
        p = jnp.exp(s)
        p = p * pl.reciprocal(jnp.sum(p, axis=-1, keepdims=True), approx=True)
        oh = jnp.dot(p.astype(jnp.bfloat16), vp_s[h],
                     preferred_element_type=jnp.float32)               # (TQ, hd)
        # concat-free output projection: accumulate head contributions.
        acc = acc + jnp.dot(oh.astype(jnp.bfloat16), woh_ref[h],
                            preferred_element_type=jnp.float32)
    out_ref[0] = acc.astype(out_ref.dtype)


def init_params(key, key_dim, d_model):
    ks = jax.random.split(key, 16)

    def w(k, shape, scale=0.05):
        return (scale * jax.random.normal(k, shape)).astype(jnp.float32)

    return {
        # FeatureResizer (key path): Linear + LayerNorm(eps=1e-12)
        "wk_fc": w(ks[0], (key_dim, d_model)),
        "bk_fc": w(ks[1], (1, d_model)),
        "gk": (1.0 + 0.1 * jax.random.normal(ks[12], (1, d_model))).astype(jnp.float32),
        "bek": w(ks[13], (1, d_model)),
        # FeatureResizer (value path)
        "wv_fc": w(ks[2], (key_dim, d_model)),
        "bv_fc": w(ks[3], (1, d_model)),
        "gv": (1.0 + 0.1 * jax.random.normal(ks[14], (1, d_model))).astype(jnp.float32),
        "bev": w(ks[15], (1, d_model)),
        # MHA in-projections (split of in_proj_weight/bias)
        "wq": w(ks[4], (d_model, d_model)),
        "bq": w(ks[5], (1, d_model)),
        "wk": w(ks[6], (d_model, d_model)),
        "bk": w(ks[7], (1, d_model)),
        "wv": w(ks[8], (d_model, d_model)),
        "bv": w(ks[9], (1, d_model)),
        # MHA out projection
        "wo": w(ks[10], (d_model, d_model)),
        "bo": w(ks[11], (1, d_model)),
    }


def fold_params(params, nhead):
    """Fold softmax scale and LayerNorm affines into pre-split per-head weights."""
    p = params
    D = p["wq"].shape[0]
    hd = D // nhead
    scale = 1.0 / math.sqrt(hd)

    def split_out(wmat, bvec):
        # (D_in, D) -> (nhead, D_in, hd); (1, D) -> (nhead, 1, hd)
        wn = wmat.reshape(wmat.shape[0], nhead, hd).transpose(1, 0, 2)
        bn = bvec.reshape(1, nhead, hd).transpose(1, 0, 2)
        return wn, bn

    # fold 1/sqrt(hd) into the query projection
    wqh, bqh = split_out(p["wq"] * scale, p["bq"] * scale)
    # LN(x) @ W + b == norm(x) @ (gamma[:,None] * W) + (beta @ W + b)
    wkh, bkh = split_out(p["gk"].reshape(D, 1) * p["wk"], p["bek"] @ p["wk"] + p["bk"])
    wvh, bvh = split_out(p["gv"].reshape(D, 1) * p["wv"], p["bev"] @ p["wv"] + p["bv"])
    # output projection split along its (head) input axis
    woh = p["wo"].reshape(nhead, hd, D)

    bf = lambda x: x.astype(jnp.bfloat16)
    return dict(
        wk_fc=bf(p["wk_fc"]), bk_fc=p["bk_fc"],
        wv_fc=bf(p["wv_fc"]), bv_fc=p["bv_fc"],
        wqh=bf(wqh), bqh=bqh,
        wkh=bf(wkh), bkh=bkh,
        wvh=bf(wvh), bvh=bvh,
        woh=bf(woh), bo=p["bo"],
    )


def mhca_forward(tgt, memory, params, nhead, pos=None, query_pos=None, tile_q=None):
    # TODO(synk): memory_key_padding_mask is not implemented (default path passes None).
    B, C, H, W = tgt.shape
    _, L, Kd = memory.shape
    D = C
    HW = H * W
    assert D % nhead == 0, "d_model must be divisible by nhead"
    hd = D // nhead

    # Query tile size: multiple of 128 dividing HW (production sweep ~512-1024);
    # fall back to a single full tile for odd spatial sizes.
    if tile_q is None:
        tile_q = HW if (HW % 128 != 0) else min(512, HW)
    if HW % tile_q != 0:
        tile_q = HW
    TQ = tile_q
    n_qt = HW // TQ

    fp = fold_params(params, nhead)

    # Keep q in NCHW layout (free reshape); the transpose happens on-chip.
    q_nchw = tgt if query_pos is None else tgt + query_pos
    tq = q_nchw.reshape(B, D, HW).astype(jnp.bfloat16)
    memk = (memory if pos is None else memory + pos).astype(jnp.bfloat16)
    mem = memory.astype(jnp.bfloat16)

    def cmap(shape):
        n = len(shape)
        return pl.BlockSpec(shape, lambda b, qi: (0,) * n)

    in_specs = [
        pl.BlockSpec((1, D, TQ), lambda b, qi: (b, 0, qi)),   # q tile (NCHW)
        pl.BlockSpec((1, L, Kd), lambda b, qi: (b, 0, 0)),    # memory + pos
        pl.BlockSpec((1, L, Kd), lambda b, qi: (b, 0, 0)),    # memory
        cmap((Kd, D)), cmap((1, D)),                          # key FeatureResizer
        cmap((Kd, D)), cmap((1, D)),                          # value FeatureResizer
        cmap((nhead, D, hd)), cmap((nhead, 1, hd)),           # Wq (pre-scaled)
        cmap((nhead, D, hd)), cmap((nhead, 1, hd)),           # Wk (LN folded)
        cmap((nhead, D, hd)), cmap((nhead, 1, hd)),           # Wv (LN folded)
        cmap((nhead, hd, D)), cmap((1, D)),                   # Wo per head, bo
    ]

    out = pl.pallas_call(
        functools.partial(mhca_kernel, nhead=nhead, ln_eps=1e-12),
        out_shape=jax.ShapeDtypeStruct((B, HW, D), jnp.float32),
        grid=(B, n_qt),
        in_specs=in_specs,
        out_specs=pl.BlockSpec((1, TQ, D), lambda b, qi: (b, qi, 0)),
        scratch_shapes=[
            pltpu.VMEM((nhead, hd, L), jnp.bfloat16),   # K^T per head (resident)
            pltpu.VMEM((nhead, L, hd), jnp.bfloat16),   # V   per head (resident)
        ],
        compiler_params=pltpu.CompilerParams(
            dimension_semantics=("parallel", "arbitrary"),
            # Stays well under v7x's 64 MiB physical VMEM (with headroom); shrink
            # tile_q for very large HW / D / L instead of raising this.
            vmem_limit_bytes=48 * 1024 * 1024,
        ),
    )(tq, memk, mem,
      fp["wk_fc"], fp["bk_fc"], fp["wv_fc"], fp["bv_fc"],
      fp["wqh"], fp["bqh"], fp["wkh"], fp["bkh"], fp["wvh"], fp["bvh"],
      fp["woh"], fp["bo"])

    # PyTorch: MHA output is (HW, B, D), then raw .reshape(B, C, H, W)
    out_sbd = jnp.transpose(out, (1, 0, 2))              # (HW, B, D)
    return out_sbd.reshape(B, C, H, W)


def mhca_reference(tgt, memory, params, nhead, pos=None, query_pos=None):
    """Pure-JAX f32 reference mirroring the PyTorch forward semantics."""
    p = params
    B, C, H, W = tgt.shape
    D = C
    HW = H * W
    L = memory.shape[1]
    hd = D // nhead

    q = tgt if query_pos is None else tgt + query_pos
    q = q.reshape(B, C, HW).transpose(0, 2, 1)
    memk = memory if pos is None else memory + pos

    k_feat = _layernorm(memk @ p["wk_fc"] + p["bk_fc"], p["gk"], p["bek"])
    v_feat = _layernorm(memory @ p["wv_fc"] + p["bv_fc"], p["gv"], p["bev"])

    qp = q @ p["wq"] + p["bq"]
    kp = k_feat @ p["wk"] + p["bk"]
    vp = v_feat @ p["wv"] + p["bv"]

    qh = qp.reshape(B, HW, nhead, hd).transpose(0, 2, 1, 3) / math.sqrt(hd)
    kh = kp.reshape(B, L, nhead, hd).transpose(0, 2, 1, 3)
    vh = vp.reshape(B, L, nhead, hd).transpose(0, 2, 1, 3)
    s = jnp.einsum("bhqd,bhkd->bhqk", qh, kh)
    a = jax.nn.softmax(s, axis=-1)
    o = jnp.einsum("bhqk,bhkd->bhqd", a, vh)
    o = o.transpose(0, 2, 1, 3).reshape(B, HW, D)
    out = o @ p["wo"] + p["bo"]
    return jnp.transpose(out, (1, 0, 2)).reshape(B, C, H, W)


if __name__ == "__main__":
    key = jax.random.PRNGKey(0)
    B, d_model, nhead, key_dim = 2, 128, 4, 64
    H = W = 16
    L = 16
    C = d_model  # query channels must equal d_model

    k1, k2, k3, k4, kp = jax.random.split(key, 5)
    tgt = jax.random.normal(k1, (B, C, H, W), jnp.float32)
    memory = jax.random.normal(k2, (B, L, key_dim), jnp.float32)
    pos = 0.1 * jax.random.normal(k3, (B, L, key_dim), jnp.float32)
    query_pos = 0.1 * jax.random.normal(k4, (B, C, H, W), jnp.float32)

    params = init_params(kp, key_dim, d_model)

    # tile_q=128 -> grid=(B, 2): exercises the per-batch K/V hoist across tiles.
    out = mhca_forward(tgt, memory, params, nhead, pos=pos, query_pos=query_pos,
                       tile_q=128)
    out = jax.block_until_ready(out)

    ref = mhca_reference(tgt, memory, params, nhead, pos=pos, query_pos=query_pos)
    assert out.shape == (B, C, H, W), out.shape
    # bf16 matmul operands + approx reciprocal vs f32 reference -> loose tolerance.
    if not jnp.allclose(out, ref, atol=3e-2, rtol=3e-2):
        err = float(jnp.max(jnp.abs(out - ref)))
        raise AssertionError(f"Pallas kernel does not match JAX reference (max err {err})")
    print("KERNEL_OK")
</pallas_src>

<mosaic_0001>
module attributes {stable_mosaic.version = 11 : i64} {
  func.func @mhca_kernel(%arg0: i32, %arg1: i32, %arg2: memref<1x128x128xbf16, #tpu.memory_space<vmem>>, %arg3: memref<1x16x64xbf16, #tpu.memory_space<vmem>>, %arg4: memref<1x16x64xbf16, #tpu.memory_space<vmem>>, %arg5: memref<64x128xbf16, #tpu.memory_space<vmem>>, %arg6: memref<1x128xf32, #tpu.memory_space<vmem>>, %arg7: memref<64x128xbf16, #tpu.memory_space<vmem>>, %arg8: memref<1x128xf32, #tpu.memory_space<vmem>>, %arg9: memref<4x128x32xbf16, #tpu.memory_space<vmem>>, %arg10: memref<4x1x32xf32, #tpu.memory_space<vmem>>, %arg11: memref<4x128x32xbf16, #tpu.memory_space<vmem>>, %arg12: memref<4x1x32xf32, #tpu.memory_space<vmem>>, %arg13: memref<4x128x32xbf16, #tpu.memory_space<vmem>>, %arg14: memref<4x1x32xf32, #tpu.memory_space<vmem>>, %arg15: memref<4x32x128xbf16, #tpu.memory_space<vmem>>, %arg16: memref<1x128xf32, #tpu.memory_space<vmem>>, %arg17: memref<1x128x128xf32, #tpu.memory_space<vmem>>, %arg18: memref<4x32x16xbf16, #tpu.memory_space<vmem>>, %arg19: memref<4x16x32xbf16, #tpu.memory_space<vmem>>) attributes {dimension_semantics = [#tpu.dimension_semantics<parallel>, #tpu.dimension_semantics<arbitrary>], iteration_bounds = array<i64: 2, 2>, scalar_prefetch = 0 : i64, scratch_operands = 2 : i64, tpu.core_type = #tpu.core_type<tc>, window_params = [{transform_indices = @transform_0, window_bounds = array<i64: 1, 128, 128>}, {transform_indices = @transform_1, window_bounds = array<i64: 1, 16, 64>}, {transform_indices = @transform_2, window_bounds = array<i64: 1, 16, 64>}, {pipeline_mode = #tpu.pipeline_mode<synchronous>, transform_indices = @transform_3, window_bounds = array<i64: 64, 128>}, {pipeline_mode = #tpu.pipeline_mode<synchronous>, transform_indices = @transform_4, window_bounds = array<i64: 1, 128>}, {pipeline_mode = #tpu.pipeline_mode<synchronous>, transform_indices = @transform_5, window_bounds = array<i64: 64, 128>}, {pipeline_mode = #tpu.pipeline_mode<synchronous>, transform_indices = @transform_6, window_bounds = array<i64: 1, 128>}, {pipeline_mode = #tpu.pipeline_mode<synchronous>, transform_indices = @transform_7, window_bounds = array<i64: 4, 128, 32>}, {pipeline_mode = #tpu.pipeline_mode<synchronous>, transform_indices = @transform_8, window_bounds = array<i64: 4, 1, 32>}, {pipeline_mode = #tpu.pipeline_mode<synchronous>, transform_indices = @transform_9, window_bounds = array<i64: 4, 128, 32>}, {pipeline_mode = #tpu.pipeline_mode<synchronous>, transform_indices = @transform_10, window_bounds = array<i64: 4, 1, 32>}, {pipeline_mode = #tpu.pipeline_mode<synchronous>, transform_indices = @transform_11, window_bounds = array<i64: 4, 128, 32>}, {pipeline_mode = #tpu.pipeline_mode<synchronous>, transform_indices = @transform_12, window_bounds = array<i64: 4, 1, 32>}, {pipeline_mode = #tpu.pipeline_mode<synchronous>, transform_indices = @transform_13, window_bounds = array<i64: 4, 32, 128>}, {pipeline_mode = #tpu.pipeline_mode<synchronous>, transform_indices = @transform_14, window_bounds = array<i64: 1, 128>}, {transform_indices = @transform_15, window_bounds = array<i64: 1, 128, 128>}]} {
    %c0_i32 = arith.constant 0 : i32
    %0 = arith.cmpi eq, %arg1, %c0_i32 : i32
    %1 = arith.extui %0 : i1 to i32
    %c0_i32_0 = arith.constant 0 : i32
    %2 = arith.cmpi ne, %1, %c0_i32_0 : i32
    scf.if %2 {
      %c0_88 = arith.constant 0 : index
      %c0_89 = arith.constant 0 : index
      %c0_90 = arith.constant 0 : index
      %134 = vector.load %arg3[%c0_88, %c0_89, %c0_90] : memref<1x16x64xbf16, #tpu.memory_space<vmem>>, vector<1x16x64xbf16>
      %135 = vector.shape_cast %134 : vector<1x16x64xbf16> to vector<16x64xbf16>
      %c0_91 = arith.constant 0 : index
      %c0_92 = arith.constant 0 : index
      %c0_93 = arith.constant 0 : index
      %136 = vector.load %arg4[%c0_91, %c0_92, %c0_93] : memref<1x16x64xbf16, #tpu.memory_space<vmem>>, vector<1x16x64xbf16>
      %137 = vector.shape_cast %136 : vector<1x16x64xbf16> to vector<16x64xbf16>
      %c0_94 = arith.constant 0 : index
      %c0_95 = arith.constant 0 : index
      %138 = vector.load %arg5[%c0_94, %c0_95] : memref<64x128xbf16, #tpu.memory_space<vmem>>, vector<64x128xbf16>
      %cst_96 = arith.constant dense<0.000000e+00> : vector<16x128xf32>
      %139 = tpu.matmul %135, %138, %cst_96 {dimension_numbers = #tpu.dot_dimension_numbers<[1], [0], [0], [1], [0, 0, 1, 1], [], []>} : vector<16x64xbf16>, vector<64x128xbf16>, vector<16x128xf32> -> vector<16x128xf32>
      %c0_97 = arith.constant 0 : index
      %c0_98 = arith.constant 0 : index
      %140 = vector.load %arg6[%c0_97, %c0_98] : memref<1x128xf32, #tpu.memory_space<vmem>>, vector<1x128xf32>
      %141 = vector.broadcast %140 : vector<1x128xf32> to vector<16x128xf32>
      %142 = arith.addf %139, %141 : vector<16x128xf32>
      %c0_99 = arith.constant 0 : index
      %c0_100 = arith.constant 0 : index
      %143 = vector.load %arg7[%c0_99, %c0_100] : memref<64x128xbf16, #tpu.memory_space<vmem>>, vector<64x128xbf16>
      %cst_101 = arith.constant dense<0.000000e+00> : vector<16x128xf32>
      %144 = tpu.matmul %137, %143, %cst_101 {dimension_numbers = #tpu.dot_dimension_numbers<[1], [0], [0], [1], [0, 0, 1, 1], [], []>} : vector<16x64xbf16>, vector<64x128xbf16>, vector<16x128xf32> -> vector<16x128xf32>
      %c0_102 = arith.constant 0 : index
      %c0_103 = arith.constant 0 : index
      %145 = vector.load %arg8[%c0_102, %c0_103] : memref<1x128xf32, #tpu.memory_space<vmem>>, vector<1x128xf32>
      %146 = vector.broadcast %145 : vector<1x128xf32> to vector<16x128xf32>
      %147 = arith.addf %144, %146 : vector<16x128xf32>
      %cst_104 = arith.constant dense<0.000000e+00> : vector<16xf32>
      %148 = vector.multi_reduction <add>, %142, %cst_104 [1] : vector<16x128xf32> to vector<16xf32>
      %149 = vector.shape_cast %148 : vector<16xf32> to vector<16x1xf32>
      %cst_105 = arith.constant 1.280000e+02 : f32
      %150 = vector.broadcast %cst_105 : f32 to vector<16x1xf32>
      %151 = arith.divf %149, %150 : vector<16x1xf32>
      %152 = vector.broadcast %151 : vector<16x1xf32> to vector<16x128xf32>
      %153 = arith.subf %142, %152 : vector<16x128xf32>
      %154 = arith.mulf %153, %153 : vector<16x128xf32>
      %cst_106 = arith.constant dense<0.000000e+00> : vector<16xf32>
      %155 = vector.multi_reduction <add>, %154, %cst_106 [1] : vector<16x128xf32> to vector<16xf32>
      %156 = vector.shape_cast %155 : vector<16xf32> to vector<16x1xf32>
      %cst_107 = arith.constant 1.280000e+02 : f32
      %157 = vector.broadcast %cst_107 : f32 to vector<16x1xf32>
      %158 = arith.divf %156, %157 : vector<16x1xf32>
      %cst_108 = arith.constant 9.99999996E-13 : f32
      %159 = vector.broadcast %cst_108 : f32 to vector<16x1xf32>
      %160 = arith.addf %158, %159 : vector<16x1xf32>
      %161 = math.rsqrt %160 : vector<16x1xf32>
      %162 = vector.broadcast %161 : vector<16x1xf32> to vector<16x128xf32>
      %163 = arith.mulf %153, %162 : vector<16x128xf32>
      %164 = arith.truncf %163 : vector<16x128xf32> to vector<16x128xbf16>
      %cst_109 = arith.constant dense<0.000000e+00> : vector<16xf32>
      %165 = vector.multi_reduction <add>, %147, %cst_109 [1] : vector<16x128xf32> to vector<16xf32>
      %166 = vector.shape_cast %165 : vector<16xf32> to vector<16x1xf32>
      %cst_110 = arith.constant 1.280000e+02 : f32
      %167 = vector.broadcast %cst_110 : f32 to vector<16x1xf32>
      %168 = arith.divf %166, %167 : vector<16x1xf32>
      %169 = vector.broadcast %168 : vector<16x1xf32> to vector<16x128xf32>
      %170 = arith.subf %147, %169 : vector<16x128xf32>
      %171 = arith.mulf %170, %170 : vector<16x128xf32>
      %cst_111 = arith.constant dense<0.000000e+00> : vector<16xf32>
      %172 = vector.multi_reduction <add>, %171, %cst_111 [1] : vector<16x128xf32> to vector<16xf32>
      %173 = vector.shape_cast %172 : vector<16xf32> to vector<16x1xf32>
      %cst_112 = arith.constant 1.280000e+02 : f32
      %174 = vector.broadcast %cst_112 : f32 to vector<16x1xf32>
      %175 = arith.divf %173, %174 : vector<16x1xf32>
      %cst_113 = arith.constant 9.99999996E-13 : f32
      %176 = vector.broadcast %cst_113 : f32 to vector<16x1xf32>
      %177 = arith.addf %175, %176 : vector<16x1xf32>
      %178 = math.rsqrt %177 : vector<16x1xf32>
      %179 = vector.broadcast %178 : vector<16x1xf32> to vector<16x128xf32>
      %180 = arith.mulf %170, %179 : vector<16x128xf32>
      %181 = arith.truncf %180 : vector<16x128xf32> to vector<16x128xbf16>
      %c0_114 = arith.constant 0 : index
      %c0_115 = arith.constant 0 : index
      %c0_116 = arith.constant 0 : index
      %182 = vector.load %arg11[%c0_114, %c0_115, %c0_116] : memref<4x128x32xbf16, #tpu.memory_space<vmem>>, vector<1x128x32xbf16>
      %183 = vector.shape_cast %182 : vector<1x128x32xbf16> to vector<128x32xbf16>
      %cst_117 = arith.constant dense<0.000000e+00> : vector<16x32xf32>
      %184 = tpu.matmul %164, %183, %cst_117 {dimension_numbers = #tpu.dot_dimension_numbers<[1], [0], [0], [1], [0, 0, 1, 1], [], []>} : vector<16x128xbf16>, vector<128x32xbf16>, vector<16x32xf32> -> vector<16x32xf32>
      %c0_118 = arith.constant 0 : index
      %c0_119 = arith.constant 0 : index
      %c0_120 = arith.constant 0 : index
      %185 = vector.load %arg12[%c0_118, %c0_119, %c0_120] : memref<4x1x32xf32, #tpu.memory_space<vmem>>, vector<1x1x32xf32>
      %186 = vector.shape_cast %185 : vector<1x1x32xf32> to vector<1x32xf32>
      %187 = vector.broadcast %186 : vector<1x32xf32> to vector<16x32xf32>
      %188 = arith.addf %184, %187 : vector<16x32xf32>
      %c0_121 = arith.constant 0 : index
      %c0_122 = arith.constant 0 : index
      %c0_123 = arith.constant 0 : index
      %189 = vector.load %arg13[%c0_121, %c0_122, %c0_123] : memref<4x128x32xbf16, #tpu.memory_space<vmem>>, vector<1x128x32xbf16>
      %190 = vector.shape_cast %189 : vector<1x128x32xbf16> to vector<128x32xbf16>
      %cst_124 = arith.constant dense<0.000000e+00> : vector<16x32xf32>
      %191 = tpu.matmul %181, %190, %cst_124 {dimension_numbers = #tpu.dot_dimension_numbers<[1], [0], [0], [1], [0, 0, 1, 1], [], []>} : vector<16x128xbf16>, vector<128x32xbf16>, vector<16x32xf32> -> vector<16x32xf32>
      %c0_125 = arith.constant 0 : index
      %c0_126 = arith.constant 0 : index
      %c0_127 = arith.constant 0 : index
      %192 = vector.load %arg14[%c0_125, %c0_126, %c0_127] : memref<4x1x32xf32, #tpu.memory_space<vmem>>, vector<1x1x32xf32>
      %193 = vector.shape_cast %192 : vector<1x1x32xf32> to vector<1x32xf32>
      %194 = vector.broadcast %193 : vector<1x32xf32> to vector<16x32xf32>
      %195 = arith.addf %191, %194 : vector<16x32xf32>
      %196 = tpu.transpose %188, [1, 0] : vector<16x32xf32> -> vector<32x16xf32>
      %197 = arith.truncf %196 : vector<32x16xf32> to vector<32x16xbf16>
      %c0_128 = arith.constant 0 : index
      %c0_129 = arith.constant 0 : index
      %c0_130 = arith.constant 0 : index
      %198 = vector.load %arg18[%c0_128, %c0_129, %c0_130] : memref<4x32x16xbf16, #tpu.memory_space<vmem>>, vector<1x32x16xbf16>
      %199 = vector.shape_cast %198 : vector<1x32x16xbf16> to vector<32x16xbf16>
      %200 = vector.shape_cast %197 : vector<32x16xbf16> to vector<1x32x16xbf16>
      tpu.vector_store %arg18[%c0_128, %c0_129, %c0_130], %200 {strides = array<i32>} : memref<4x32x16xbf16, #tpu.memory_space<vmem>>, vector<1x32x16xbf16>,
      %201 = arith.truncf %195 : vector<16x32xf32> to vector<16x32xbf16>
      %c0_131 = arith.constant 0 : index
      %c0_132 = arith.constant 0 : index
      %c0_133 = arith.constant 0 : index
      %202 = vector.load %arg19[%c0_131, %c0_132, %c0_133] : memref<4x16x32xbf16, #tpu.memory_space<vmem>>, vector<1x16x32xbf16>
      %203 = vector.shape_cast %202 : vector<1x16x32xbf16> to vector<16x32xbf16>
      %204 = vector.shape_cast %201 : vector<16x32xbf16> to vector<1x16x32xbf16>
      tpu.vector_store %arg19[%c0_131, %c0_132, %c0_133], %204 {strides = array<i32>} : memref<4x16x32xbf16, #tpu.memory_space<vmem>>, vector<1x16x32xbf16>,
      %c1_134 = arith.constant 1 : index
      %c0_135 = arith.constant 0 : index
      %c0_136 = arith.constant 0 : index
      %205 = vector.load %arg11[%c1_134, %c0_135, %c0_136] : memref<4x128x32xbf16, #tpu.memory_space<vmem>>, vector<1x128x32xbf16>
      %206 = vector.shape_cast %205 : vector<1x128x32xbf16> to vector<128x32xbf16>
      %cst_137 = arith.constant dense<0.000000e+00> : vector<16x32xf32>
      %207 = tpu.matmul %164, %206, %cst_137 {dimension_numbers = #tpu.dot_dimension_numbers<[1], [0], [0], [1], [0, 0, 1, 1], [], []>} : vector<16x128xbf16>, vector<128x32xbf16>, vector<16x32xf32> -> vector<16x32xf32>
      %c1_138 = arith.constant 1 : index
      %c0_139 = arith.constant 0 : index
      %c0_140 = arith.constant 0 : index
      %208 = vector.load %arg12[%c1_138, %c0_139, %c0_140] : memref<4x1x32xf32, #tpu.memory_space<vmem>>, vector<1x1x32xf32>
      %209 = vector.shape_cast %208 : vector<1x1x32xf32> to vector<1x32xf32>
      %210 = vector.broadcast %209 : vector<1x32xf32> to vector<16x32xf32>
      %211 = arith.addf %207, %210 : vector<16x32xf32>
      %c1_141 = arith.constant 1 : index
      %c0_142 = arith.constant 0 : index
      %c0_143 = arith.constant 0 : index
      %212 = vector.load %arg13[%c1_141, %c0_142, %c0_143] : memref<4x128x32xbf16, #tpu.memory_space<vmem>>, vector<1x128x32xbf16>
      %213 = vector.shape_cast %212 : vector<1x128x32xbf16> to vector<128x32xbf16>
      %cst_144 = arith.constant dense<0.000000e+00> : vector<16x32xf32>
      %214 = tpu.matmul %181, %213, %cst_144 {dimension_numbers = #tpu.dot_dimension_numbers<[1], [0], [0], [1], [0, 0, 1, 1], [], []>} : vector<16x128xbf16>, vector<128x32xbf16>, vector<16x32xf32> -> vector<16x32xf32>
      %c1_145 = arith.constant 1 : index
      %c0_146 = arith.constant 0 : index
      %c0_147 = arith.constant 0 : index
      %215 = vector.load %arg14[%c1_145, %c0_146, %c0_147] : memref<4x1x32xf32, #tpu.memory_space<vmem>>, vector<1x1x32xf32>
      %216 = vector.shape_cast %215 : vector<1x1x32xf32> to vector<1x32xf32>
      %217 = vector.broadcast %216 : vector<1x32xf32> to vector<16x32xf32>
      %218 = arith.addf %214, %217 : vector<16x32xf32>
      %219 = tpu.transpose %211, [1, 0] : vector<16x32xf32> -> vector<32x16xf32>
      %220 = arith.truncf %219 : vector<32x16xf32> to vector<32x16xbf16>
      %c1_148 = arith.constant 1 : index
      %c0_149 = arith.constant 0 : index
      %c0_150 = arith.constant 0 : index
      %221 = vector.load %arg18[%c1_148, %c0_149, %c0_150] : memref<4x32x16xbf16, #tpu.memory_space<vmem>>, vector<1x32x16xbf16>
      %222 = vector.shape_cast %221 : vector<1x32x16xbf16> to vector<32x16xbf16>
      %223 = vector.shape_cast %220 : vector<32x16xbf16> to vector<1x32x16xbf16>
      tpu.vector_store %arg18[%c1_148, %c0_149, %c0_150], %223 {strides = array<i32>} : memref<4x32x16xbf16, #tpu.memory_space<vmem>>, vector<1x32x16xbf16>,
      %224 = arith.truncf %218 : vector<16x32xf32> to vector<16x32xbf16>
      %c1_151 = arith.constant 1 : index
      %c0_152 = arith.constant 0 : index
      %c0_153 = arith.constant 0 : index
      %225 = vector.load %arg19[%c1_151, %c0_152, %c0_153] : memref<4x16x32xbf16, #tpu.memory_space<vmem>>, vector<1x16x32xbf16>
      %226 = vector.shape_cast %225 : vector<1x16x32xbf16> to vector<16x32xbf16>
      %227 = vector.shape_cast %224 : vector<16x32xbf16> to vector<1x16x32xbf16>
      tpu.vector_store %arg19[%c1_151, %c0_152, %c0_153], %227 {strides = array<i32>} : memref<4x16x32xbf16, #tpu.memory_space<vmem>>, vector<1x16x32xbf16>,
      %c2_154 = arith.constant 2 : index
      %c0_155 = arith.constant 0 : index
      %c0_156 = arith.constant 0 : index
      %228 = vector.load %arg11[%c2_154, %c0_155, %c0_156] : memref<4x128x32xbf16, #tpu.memory_space<vmem>>, vector<1x128x32xbf16>
      %229 = vector.shape_cast %228 : vector<1x128x32xbf16> to vector<128x32xbf16>
      %cst_157 = arith.constant dense<0.000000e+00> : vector<16x32xf32>
      %230 = tpu.matmul %164, %229, %cst_157 {dimension_numbers = #tpu.dot_dimension_numbers<[1], [0], [0], [1], [0, 0, 1, 1], [], []>} : vector<16x128xbf16>, vector<128x32xbf16>, vector<16x32xf32> -> vector<16x32xf32>
      %c2_158 = arith.constant 2 : index
      %c0_159 = arith.constant 0 : index
      %c0_160 = arith.constant 0 : index
      %231 = vector.load %arg12[%c2_158, %c0_159, %c0_160] : memref<4x1x32xf32, #tpu.memory_space<vmem>>, vector<1x1x32xf32>
      %232 = vector.shape_cast %231 : vector<1x1x32xf32> to vector<1x32xf32>
      %233 = vector.broadcast %232 : vector<1x32xf32> to vector<16x32xf32>
      %234 = arith.addf %230, %233 : vector<16x32xf32>
      %c2_161 = arith.constant 2 : index
      %c0_162 = arith.constant 0 : index
      %c0_163 = arith.constant 0 : index
      %235 = vector.load %arg13[%c2_161, %c0_162, %c0_163] : memref<4x128x32xbf16, #tpu.memory_space<vmem>>, vector<1x128x32xbf16>
      %236 = vector.shape_cast %235 : vector<1x128x32xbf16> to vector<128x32xbf16>
      %cst_164 = arith.constant dense<0.000000e+00> : vector<16x32xf32>
      %237 = tpu.matmul %181, %236, %cst_164 {dimension_numbers = #tpu.dot_dimension_numbers<[1], [0], [0], [1], [0, 0, 1, 1], [], []>} : vector<16x128xbf16>, vector<128x32xbf16>, vector<16x32xf32> -> vector<16x32xf32>
      %c2_165 = arith.constant 2 : index
      %c0_166 = arith.constant 0 : index
      %c0_167 = arith.constant 0 : index
      %238 = vector.load %arg14[%c2_165, %c0_166, %c0_167] : memref<4x1x32xf32, #tpu.memory_space<vmem>>, vector<1x1x32xf32>
      %239 = vector.shape_cast %238 : vector<1x1x32xf32> to vector<1x32xf32>
      %240 = vector.broadcast %239 : vector<1x32xf32> to vector<16x32xf32>
      %241 = arith.addf %237, %240 : vector<16x32xf32>
      %242 = tpu.transpose %234, [1, 0] : vector<16x32xf32> -> vector<32x16xf32>
      %243 = arith.truncf %242 : vector<32x16xf32> to vector<32x16xbf16>
      %c2_168 = arith.constant 2 : index
      %c0_169 = arith.constant 0 : index
      %c0_170 = arith.constant 0 : index
      %244 = vector.load %arg18[%c2_168, %c0_169, %c0_170] : memref<4x32x16xbf16, #tpu.memory_space<vmem>>, vector<1x32x16xbf16>
      %245 = vector.shape_cast %244 : vector<1x32x16xbf16> to vector<32x16xbf16>
      %246 = vector.shape_cast %243 : vector<32x16xbf16> to vector<1x32x16xbf16>
      tpu.vector_store %arg18[%c2_168, %c0_169, %c0_170], %246 {strides = array<i32>} : memref<4x32x16xbf16, #tpu.memory_space<vmem>>, vector<1x32x16xbf16>,
      %247 = arith.truncf %241 : vector<16x32xf32> to vector<16x32xbf16>
      %c2_171 = arith.constant 2 : index
      %c0_172 = arith.constant 0 : index
      %c0_173 = arith.constant 0 : index
      %248 = vector.load %arg19[%c2_171, %c0_172, %c0_173] : memref<4x16x32xbf16, #tpu.memory_space<vmem>>, vector<1x16x32xbf16>
      %249 = vector.shape_cast %248 : vector<1x16x32xbf16> to vector<16x32xbf16>
      %250 = vector.shape_cast %247 : vector<16x32xbf16> to vector<1x16x32xbf16>
      tpu.vector_store %arg19[%c2_171, %c0_172, %c0_173], %250 {strides = array<i32>} : memref<4x16x32xbf16, #tpu.memory_space<vmem>>, vector<1x16x32xbf16>,
      %c3_174 = arith.constant 3 : index
      %c0_175 = arith.constant 0 : index
      %c0_176 = arith.constant 0 : index
      %251 = vector.load %arg11[%c3_174, %c0_175, %c0_176] : memref<4x128x32xbf16, #tpu.memory_space<vmem>>, vector<1x128x32xbf16>
      %252 = vector.shape_cast %251 : vector<1x128x32xbf16> to vector<128x32xbf16>
      %cst_177 = arith.constant dense<0.000000e+00> : vector<16x32xf32>
      %253 = tpu.matmul %164, %252, %cst_177 {dimension_numbers = #tpu.dot_dimension_numbers<[1], [0], [0], [1], [0, 0, 1, 1], [], []>} : vector<16x128xbf16>, vector<128x32xbf16>, vector<16x32xf32> -> vector<16x32xf32>
      %c3_178 = arith.constant 3 : index
      %c0_179 = arith.constant 0 : index
      %c0_180 = arith.constant 0 : index
      %254 = vector.load %arg12[%c3_178, %c0_179, %c0_180] : memref<4x1x32xf32, #tpu.memory_space<vmem>>, vector<1x1x32xf32>
      %255 = vector.shape_cast %254 : vector<1x1x32xf32> to vector<1x32xf32>
      %256 = vector.broadcast %255 : vector<1x32xf32> to vector<16x32xf32>
      %257 = arith.addf %253, %256 : vector<16x32xf32>
      %c3_181 = arith.constant 3 : index
      %c0_182 = arith.constant 0 : index
      %c0_183 = arith.constant 0 : index
      %258 = vector.load %arg13[%c3_181, %c0_182, %c0_183] : memref<4x128x32xbf16, #tpu.memory_space<vmem>>, vector<1x128x32xbf16>
      %259 = vector.shape_cast %258 : vector<1x128x32xbf16> to vector<128x32xbf16>
      %cst_184 = arith.constant dense<0.000000e+00> : vector<16x32xf32>
      %260 = tpu.matmul %181, %259, %cst_184 {dimension_numbers = #tpu.dot_dimension_numbers<[1], [0], [0], [1], [0, 0, 1, 1], [], []>} : vector<16x128xbf16>, vector<128x32xbf16>, vector<16x32xf32> -> vector<16x32xf32>
      %c3_185 = arith.constant 3 : index
      %c0_186 = arith.constant 0 : index
      %c0_187 = arith.constant 0 : index
      %261 = vector.load %arg14[%c3_185, %c0_186, %c0_187] : memref<4x1x32xf32, #tpu.memory_space<vmem>>, vector<1x1x32xf32>
      %262 = vector.shape_cast %261 : vector<1x1x32xf32> to vector<1x32xf32>
      %263 = vector.broadcast %262 : vector<1x32xf32> to vector<16x32xf32>
      %264 = arith.addf %260, %263 : vector<16x32xf32>
      %265 = tpu.transpose %257, [1, 0] : vector<16x32xf32> -> vector<32x16xf32>
      %266 = arith.truncf %265 : vector<32x16xf32> to vector<32x16xbf16>
      %c3_188 = arith.constant 3 : index
      %c0_189 = arith.constant 0 : index
      %c0_190 = arith.constant 0 : index
      %267 = vector.load %arg18[%c3_188, %c0_189, %c0_190] : memref<4x32x16xbf16, #tpu.memory_space<vmem>>, vector<1x32x16xbf16>
      %268 = vector.shape_cast %267 : vector<1x32x16xbf16> to vector<32x16xbf16>
      %269 = vector.shape_cast %266 : vector<32x16xbf16> to vector<1x32x16xbf16>
      tpu.vector_store %arg18[%c3_188, %c0_189, %c0_190], %269 {strides = array<i32>} : memref<4x32x16xbf16, #tpu.memory_space<vmem>>, vector<1x32x16xbf16>,
      %270 = arith.truncf %264 : vector<16x32xf32> to vector<16x32xbf16>
      %c3_191 = arith.constant 3 : index
      %c0_192 = arith.constant 0 : index
      %c0_193 = arith.constant 0 : index
      %271 = vector.load %arg19[%c3_191, %c0_192, %c0_193] : memref<4x16x32xbf16, #tpu.memory_space<vmem>>, vector<1x16x32xbf16>
      %272 = vector.shape_cast %271 : vector<1x16x32xbf16> to vector<16x32xbf16>
      %273 = vector.shape_cast %270 : vector<16x32xbf16> to vector<1x16x32xbf16>
      tpu.vector_store %arg19[%c3_191, %c0_192, %c0_193], %273 {strides = array<i32>} : memref<4x16x32xbf16, #tpu.memory_space<vmem>>, vector<1x16x32xbf16>,
    } else {
    }
    %c0 = arith.constant 0 : index
    %c0_1 = arith.constant 0 : index
    %c0_2 = arith.constant 0 : index
    %3 = vector.load %arg2[%c0, %c0_1, %c0_2] : memref<1x128x128xbf16, #tpu.memory_space<vmem>>, vector<1x128x128xbf16>
    %4 = vector.shape_cast %3 : vector<1x128x128xbf16> to vector<128x128xbf16>
    %5 = arith.extf %4 : vector<128x128xbf16> to vector<128x128xf32>
    %6 = tpu.transpose %5, [1, 0] : vector<128x128xf32> -> vector<128x128xf32>
    %7 = arith.truncf %6 : vector<128x128xf32> to vector<128x128xbf16>
    %c0_3 = arith.constant 0 : index
    %c0_4 = arith.constant 0 : index
    %8 = vector.load %arg16[%c0_3, %c0_4] : memref<1x128xf32, #tpu.memory_space<vmem>>, vector<1x128xf32>
    %9 = vector.shape_cast %8 : vector<1x128xf32> to vector<1x128xf32>
    %10 = vector.broadcast %9 : vector<1x128xf32> to vector<128x128xf32>
    %c0_5 = arith.constant 0 : index
    %c0_6 = arith.constant 0 : index
    %c0_7 = arith.constant 0 : index
    %11 = vector.load %arg9[%c0_5, %c0_6, %c0_7] : memref<4x128x32xbf16, #tpu.memory_space<vmem>>, vector<1x128x32xbf16>
    %12 = vector.shape_cast %11 : vector<1x128x32xbf16> to vector<128x32xbf16>
    %cst = arith.constant dense<0.000000e+00> : vector<128x32xf32>
    %13 = tpu.matmul %7, %12, %cst {dimension_numbers = #tpu.dot_dimension_numbers<[1], [0], [0], [1], [0, 0, 1, 1], [], []>} : vector<128x128xbf16>, vector<128x32xbf16>, vector<128x32xf32> -> vector<128x32xf32>
    %c0_8 = arith.constant 0 : index
    %c0_9 = arith.constant 0 : index
    %c0_10 = arith.constant 0 : index
    %14 = vector.load %arg10[%c0_8, %c0_9, %c0_10] : memref<4x1x32xf32, #tpu.memory_space<vmem>>, vector<1x1x32xf32>
    %15 = vector.shape_cast %14 : vector<1x1x32xf32> to vector<1x32xf32>
    %16 = vector.broadcast %15 : vector<1x32xf32> to vector<128x32xf32>
    %17 = arith.addf %13, %16 : vector<128x32xf32>
    %18 = arith.truncf %17 : vector<128x32xf32> to vector<128x32xbf16>
    %c0_11 = arith.constant 0 : index
    %c0_12 = arith.constant 0 : index
    %c0_13 = arith.constant 0 : index
    %19 = vector.load %arg18[%c0_11, %c0_12, %c0_13] : memref<4x32x16xbf16, #tpu.memory_space<vmem>>, vector<1x32x16xbf16>
    %20 = vector.shape_cast %19 : vector<1x32x16xbf16> to vector<32x16xbf16>
    %cst_14 = arith.constant dense<0.000000e+00> : vector<128x16xf32>
    %21 = tpu.matmul %18, %20, %cst_14 {dimension_numbers = #tpu.dot_dimension_numbers<[1], [0], [0], [1], [0, 0, 1, 1], [], []>} : vector<128x32xbf16>, vector<32x16xbf16>, vector<128x16xf32> -> vector<128x16xf32>
    %cst_15 = arith.constant dense<0xFF800000> : vector<128xf32>
    %22 = vector.multi_reduction <maximumf>, %21, %cst_15 [1] : vector<128x16xf32> to vector<128xf32>
    %23 = vector.shape_cast %22 : vector<128xf32> to vector<128x1xf32>
    %24 = vector.broadcast %23 : vector<128x1xf32> to vector<128x16xf32>
    %25 = arith.subf %21, %24 : vector<128x16xf32>
    %26 = math.exp %25 : vector<128x16xf32>
    %cst_16 = arith.constant dense<0.000000e+00> : vector<128xf32>
    %27 = vector.multi_reduction <add>, %26, %cst_16 [1] : vector<128x16xf32> to vector<128xf32>
    %28 = vector.shape_cast %27 : vector<128xf32> to vector<128x1xf32>
    %29 = tpu.reciprocal %28 {approx = true} : vector<128x1xf32> -> vector<128x1xf32>
    %30 = vector.broadcast %29 : vector<128x1xf32> to vector<128x16xf32>
    %31 = arith.mulf %26, %30 : vector<128x16xf32>
    %32 = arith.truncf %31 : vector<128x16xf32> to vector<128x16xbf16>
    %c0_17 = arith.constant 0 : index
    %c0_18 = arith.constant 0 : index
    %c0_19 = arith.constant 0 : index
    %33 = vector.load %arg19[%c0_17, %c0_18, %c0_19] : memref<4x16x32xbf16, #tpu.memory_space<vmem>>, vector<1x16x32xbf16>
    %34 = vector.shape_cast %33 : vector<1x16x32xbf16> to vector<16x32xbf16>
    %cst_20 = arith.constant dense<0.000000e+00> : vector<128x32xf32>
    %35 = tpu.matmul %32, %34, %cst_20 {dimension_numbers = #tpu.dot_dimension_numbers<[1], [0], [0], [1], [0, 0, 1, 1], [], []>} : vector<128x16xbf16>, vector<16x32xbf16>, vector<128x32xf32> -> vector<128x32xf32>
    %36 = arith.truncf %35 : vector<128x32xf32> to vector<128x32xbf16>
    %c0_21 = arith.constant 0 : index
    %c0_22 = arith.constant 0 : index
    %c0_23 = arith.constant 0 : index
    %37 = vector.load %arg15[%c0_21, %c0_22, %c0_23] : memref<4x32x128xbf16, #tpu.memory_space<vmem>>, vector<1x32x128xbf16>
    %38 = vector.shape_cast %37 : vector<1x32x128xbf16> to vector<32x128xbf16>
    %cst_24 = arith.constant dense<0.000000e+00> : vector<128x128xf32>
    %39 = tpu.matmul %36, %38, %cst_24 {dimension_numbers = #tpu.dot_dimension_numbers<[1], [0], [0], [1], [0, 0, 1, 1], [], []>} : vector<128x32xbf16>, vector<32x128xbf16>, vector<128x128xf32> -> vector<128x128xf32>
    %40 = arith.addf %10, %39 : vector<128x128xf32>
    %c1 = arith.constant 1 : index
    %c0_25 = arith.constant 0 : index
    %c0_26 = arith.constant 0 : index
    %41 = vector.load %arg9[%c1, %c0_25, %c0_26] : memref<4x128x32xbf16, #tpu.memory_space<vmem>>, vector<1x128x32xbf16>
    %42 = vector.shape_cast %41 : vector<1x128x32xbf16> to vector<128x32xbf16>
    %cst_27 = arith.constant dense<0.000000e+00> : vector<128x32xf32>
    %43 = tpu.matmul %7, %42, %cst_27 {dimension_numbers = #tpu.dot_dimension_numbers<[1], [0], [0], [1], [0, 0, 1, 1], [], []>} : vector<128x128xbf16>, vector<128x32xbf16>, vector<128x32xf32> -> vector<128x32xf32>
    %c1_28 = arith.constant 1 : index
    %c0_29 = arith.constant 0 : index
    %c0_30 = arith.constant 0 : index
    %44 = vector.load %arg10[%c1_28, %c0_29, %c0_30] : memref<4x1x32xf32, #tpu.memory_space<vmem>>, vector<1x1x32xf32>
    %45 = vector.shape_cast %44 : vector<1x1x32xf32> to vector<1x32xf32>
    %46 = vector.broadcast %45 : vector<1x32xf32> to vector<128x32xf32>
    %47 = arith.addf %43, %46 : vector<128x32xf32>
    %48 = arith.truncf %47 : vector<128x32xf32> to vector<128x32xbf16>
    %c1_31 = arith.constant 1 : index
    %c0_32 = arith.constant 0 : index
    %c0_33 = arith.constant 0 : index
    %49 = vector.load %arg18[%c1_31, %c0_32, %c0_33] : memref<4x32x16xbf16, #tpu.memory_space<vmem>>, vector<1x32x16xbf16>
    %50 = vector.shape_cast %49 : vector<1x32x16xbf16> to vector<32x16xbf16>
    %cst_34 = arith.constant dense<0.000000e+00> : vector<128x16xf32>
    %51 = tpu.matmul %48, %50, %cst_34 {dimension_numbers = #tpu.dot_dimension_numbers<[1], [0], [0], [1], [0, 0, 1, 1], [], []>} : vector<128x32xbf16>, vector<32x16xbf16>, vector<128x16xf32> -> vector<128x16xf32>
    %cst_35 = arith.constant dense<0xFF800000> : vector<128xf32>
    %52 = vector.multi_reduction <maximumf>, %51, %cst_35 [1] : vector<128x16xf32> to vector<128xf32>
    %53 = vector.shape_cast %52 : vector<128xf32> to vector<128x1xf32>
    %54 = vector.broadcast %53 : vector<128x1xf32> to vector<128x16xf32>
    %55 = arith.subf %51, %54 : vector<128x16xf32>
    %56 = math.exp %55 : vector<128x16xf32>
    %cst_36 = arith.constant dense<0.000000e+00> : vector<128xf32>
    %57 = vector.multi_reduction <add>, %56, %cst_36 [1] : vector<128x16xf32> to vector<128xf32>
    %58 = vector.shape_cast %57 : vector<128xf32> to vector<128x1xf32>
    %59 = tpu.reciprocal %58 {approx = true} : vector<128x1xf32> -> vector<128x1xf32>
    %60 = vector.broadcast %59 : vector<128x1xf32> to vector<128x16xf32>
    %61 = arith.mulf %56, %60 : vector<128x16xf32>
    %62 = arith.truncf %61 : vector<128x16xf32> to vector<128x16xbf16>
    %c1_37 = arith.constant 1 : index
    %c0_38 = arith.constant 0 : index
    %c0_39 = arith.constant 0 : index
    %63 = vector.load %arg19[%c1_37, %c0_38, %c0_39] : memref<4x16x32xbf16, #tpu.memory_space<vmem>>, vector<1x16x32xbf16>
    %64 = vector.shape_cast %63 : vector<1x16x32xbf16> to vector<16x32xbf16>
    %cst_40 = arith.constant dense<0.000000e+00> : vector<128x32xf32>
    %65 = tpu.matmul %62, %64, %cst_40 {dimension_numbers = #tpu.dot_dimension_numbers<[1], [0], [0], [1], [0, 0, 1, 1], [], []>} : vector<128x16xbf16>, vector<16x32xbf16>, vector<128x32xf32> -> vector<128x32xf32>
    %66 = arith.truncf %65 : vector<128x32xf32> to vector<128x32xbf16>
    %c1_41 = arith.constant 1 : index
    %c0_42 = arith.constant 0 : index
    %c0_43 = arith.constant 0 : index
    %67 = vector.load %arg15[%c1_41, %c0_42, %c0_43] : memref<4x32x128xbf16, #tpu.memory_space<vmem>>, vector<1x32x128xbf16>
    %68 = vector.shape_cast %67 : vector<1x32x128xbf16> to vector<32x128xbf16>
    %cst_44 = arith.constant dense<0.000000e+00> : vector<128x128xf32>
    %69 = tpu.matmul %66, %68, %cst_44 {dimension_numbers = #tpu.dot_dimension_numbers<[1], [0], [0], [1], [0, 0, 1, 1], [], []>} : vector<128x32xbf16>, vector<32x128xbf16>, vector<128x128xf32> -> vector<128x128xf32>
    %70 = arith.addf %40, %69 : vector<128x128xf32>
    %c2 = arith.constant 2 : index
    %c0_45 = arith.constant 0 : index
    %c0_46 = arith.constant 0 : index
    %71 = vector.load %arg9[%c2, %c0_45, %c0_46] : memref<4x128x32xbf16, #tpu.memory_space<vmem>>, vector<1x128x32xbf16>
    %72 = vector.shape_cast %71 : vector<1x128x32xbf16> to vector<128x32xbf16>
    %cst_47 = arith.constant dense<0.000000e+00> : vector<128x32xf32>
    %73 = tpu.matmul %7, %72, %cst_47 {dimension_numbers = #tpu.dot_dimension_numbers<[1], [0], [0], [1], [0, 0, 1, 1], [], []>} : vector<128x128xbf16>, vector<128x32xbf16>, vector<128x32xf32> -> vector<128x32xf32>
    %c2_48 = arith.constant 2 : index
    %c0_49 = arith.constant 0 : index
    %c0_50 = arith.constant 0 : index
    %74 = vector.load %arg10[%c2_48, %c0_49, %c0_50] : memref<4x1x32xf32, #tpu.memory_space<vmem>>, vector<1x1x32xf32>
    %75 = vector.shape_cast %74 : vector<1x1x32xf32> to vector<1x32xf32>
    %76 = vector.broadcast %75 : vector<1x32xf32> to vector<128x32xf32>
    %77 = arith.addf %73, %76 : vector<128x32xf32>
    %78 = arith.truncf %77 : vector<128x32xf32> to vector<128x32xbf16>
    %c2_51 = arith.constant 2 : index
    %c0_52 = arith.constant 0 : index
    %c0_53 = arith.constant 0 : index
    %79 = vector.load %arg18[%c2_51, %c0_52, %c0_53] : memref<4x32x16xbf16, #tpu.memory_space<vmem>>, vector<1x32x16xbf16>
    %80 = vector.shape_cast %79 : vector<1x32x16xbf16> to vector<32x16xbf16>
    %cst_54 = arith.constant dense<0.000000e+00> : vector<128x16xf32>
    %81 = tpu.matmul %78, %80, %cst_54 {dimension_numbers = #tpu.dot_dimension_numbers<[1], [0], [0], [1], [0, 0, 1, 1], [], []>} : vector<128x32xbf16>, vector<32x16xbf16>, vector<128x16xf32> -> vector<128x16xf32>
    %cst_55 = arith.constant dense<0xFF800000> : vector<128xf32>
    %82 = vector.multi_reduction <maximumf>, %81, %cst_55 [1] : vector<128x16xf32> to vector<128xf32>
    %83 = vector.shape_cast %82 : vector<128xf32> to vector<128x1xf32>
    %84 = vector.broadcast %83 : vector<128x1xf32> to vector<128x16xf32>
    %85 = arith.subf %81, %84 : vector<128x16xf32>
    %86 = math.exp %85 : vector<128x16xf32>
    %cst_56 = arith.constant dense<0.000000e+00> : vector<128xf32>
    %87 = vector.multi_reduction <add>, %86, %cst_56 [1] : vector<128x16xf32> to vector<128xf32>
    %88 = vector.shape_cast %87 : vector<128xf32> to vector<128x1xf32>
    %89 = tpu.reciprocal %88 {approx = true} : vector<128x1xf32> -> vector<128x1xf32>
    %90 = vector.broadcast %89 : vector<128x1xf32> to vector<128x16xf32>
    %91 = arith.mulf %86, %90 : vector<128x16xf32>
    %92 = arith.truncf %91 : vector<128x16xf32> to vector<128x16xbf16>
    %c2_57 = arith.constant 2 : index
    %c0_58 = arith.constant 0 : index
    %c0_59 = arith.constant 0 : index
    %93 = vector.load %arg19[%c2_57, %c0_58, %c0_59] : memref<4x16x32xbf16, #tpu.memory_space<vmem>>, vector<1x16x32xbf16>
    %94 = vector.shape_cast %93 : vector<1x16x32xbf16> to vector<16x32xbf16>
    %cst_60 = arith.constant dense<0.000000e+00> : vector<128x32xf32>
    %95 = tpu.matmul %92, %94, %cst_60 {dimension_numbers = #tpu.dot_dimension_numbers<[1], [0], [0], [1], [0, 0, 1, 1], [], []>} : vector<128x16xbf16>, vector<16x32xbf16>, vector<128x32xf32> -> vector<128x32xf32>
    %96 = arith.truncf %95 : vector<128x32xf32> to vector<128x32xbf16>
    %c2_61 = arith.constant 2 : index
    %c0_62 = arith.constant 0 : index
    %c0_63 = arith.constant 0 : index
    %97 = vector.load %arg15[%c2_61, %c0_62, %c0_63] : memref<4x32x128xbf16, #tpu.memory_space<vmem>>, vector<1x32x128xbf16>
    %98 = vector.shape_cast %97 : vector<1x32x128xbf16> to vector<32x128xbf16>
    %cst_64 = arith.constant dense<0.000000e+00> : vector<128x128xf32>
    %99 = tpu.matmul %96, %98, %cst_64 {dimension_numbers = #tpu.dot_dimension_numbers<[1], [0], [0], [1], [0, 0, 1, 1], [], []>} : vector<128x32xbf16>, vector<32x128xbf16>, vector<128x128xf32> -> vector<128x128xf32>
    %100 = arith.addf %70, %99 : vector<128x128xf32>
    %c3 = arith.constant 3 : index
    %c0_65 = arith.constant 0 : index
    %c0_66 = arith.constant 0 : index
    %101 = vector.load %arg9[%c3, %c0_65, %c0_66] : memref<4x128x32xbf16, #tpu.memory_space<vmem>>, vector<1x128x32xbf16>
    %102 = vector.shape_cast %101 : vector<1x128x32xbf16> to vector<128x32xbf16>
    %cst_67 = arith.constant dense<0.000000e+00> : vector<128x32xf32>
    %103 = tpu.matmul %7, %102, %cst_67 {dimension_numbers = #tpu.dot_dimension_numbers<[1], [0], [0], [1], [0, 0, 1, 1], [], []>} : vector<128x128xbf16>, vector<128x32xbf16>, vector<128x32xf32> -> vector<128x32xf32>
    %c3_68 = arith.constant 3 : index
    %c0_69 = arith.constant 0 : index
    %c0_70 = arith.constant 0 : index
    %104 = vector.load %arg10[%c3_68, %c0_69, %c0_70] : memref<4x1x32xf32, #tpu.memory_space<vmem>>, vector<1x1x32xf32>
    %105 = vector.shape_cast %104 : vector<1x1x32xf32> to vector<1x32xf32>
    %106 = vector.broadcast %105 : vector<1x32xf32> to vector<128x32xf32>
    %107 = arith.addf %103, %106 : vector<128x32xf32>
    %108 = arith.truncf %107 : vector<128x32xf32> to vector<128x32xbf16>
    %c3_71 = arith.constant 3 : index
    %c0_72 = arith.constant 0 : index
    %c0_73 = arith.constant 0 : index
    %109 = vector.load %arg18[%c3_71, %c0_72, %c0_73] : memref<4x32x16xbf16, #tpu.memory_space<vmem>>, vector<1x32x16xbf16>
    %110 = vector.shape_cast %109 : vector<1x32x16xbf16> to vector<32x16xbf16>
    %cst_74 = arith.constant dense<0.000000e+00> : vector<128x16xf32>
    %111 = tpu.matmul %108, %110, %cst_74 {dimension_numbers = #tpu.dot_dimension_numbers<[1], [0], [0], [1], [0, 0, 1, 1], [], []>} : vector<128x32xbf16>, vector<32x16xbf16>, vector<128x16xf32> -> vector<128x16xf32>
    %cst_75 = arith.constant dense<0xFF800000> : vector<128xf32>
    %112 = vector.multi_reduction <maximumf>, %111, %cst_75 [1] : vector<128x16xf32> to vector<128xf32>
    %113 = vector.shape_cast %112 : vector<128xf32> to vector<128x1xf32>
    %114 = vector.broadcast %113 : vector<128x1xf32> to vector<128x16xf32>
    %115 = arith.subf %111, %114 : vector<128x16xf32>
    %116 = math.exp %115 : vector<128x16xf32>
    %cst_76 = arith.constant dense<0.000000e+00> : vector<128xf32>
    %117 = vector.multi_reduction <add>, %116, %cst_76 [1] : vector<128x16xf32> to vector<128xf32>
    %118 = vector.shape_cast %117 : vector<128xf32> to vector<128x1xf32>
    %119 = tpu.reciprocal %118 {approx = true} : vector<128x1xf32> -> vector<128x1xf32>
    %120 = vector.broadcast %119 : vector<128x1xf32> to vector<128x16xf32>
    %121 = arith.mulf %116, %120 : vector<128x16xf32>
    %122 = arith.truncf %121 : vector<128x16xf32> to vector<128x16xbf16>
    %c3_77 = arith.constant 3 : index
    %c0_78 = arith.constant 0 : index
    %c0_79 = arith.constant 0 : index
    %123 = vector.load %arg19[%c3_77, %c0_78, %c0_79] : memref<4x16x32xbf16, #tpu.memory_space<vmem>>, vector<1x16x32xbf16>
    %124 = vector.shape_cast %123 : vector<1x16x32xbf16> to vector<16x32xbf16>
    %cst_80 = arith.constant dense<0.000000e+00> : vector<128x32xf32>
    %125 = tpu.matmul %122, %124, %cst_80 {dimension_numbers = #tpu.dot_dimension_numbers<[1], [0], [0], [1], [0, 0, 1, 1], [], []>} : vector<128x16xbf16>, vector<16x32xbf16>, vector<128x32xf32> -> vector<128x32xf32>
    %126 = arith.truncf %125 : vector<128x32xf32> to vector<128x32xbf16>
    %c3_81 = arith.constant 3 : index
    %c0_82 = arith.constant 0 : index
    %c0_83 = arith.constant 0 : index
    %127 = vector.load %arg15[%c3_81, %c0_82, %c0_83] : memref<4x32x128xbf16, #tpu.memory_space<vmem>>, vector<1x32x128xbf16>
    %128 = vector.shape_cast %127 : vector<1x32x128xbf16> to vector<32x128xbf16>
    %cst_84 = arith.constant dense<0.000000e+00> : vector<128x128xf32>
    %129 = tpu.matmul %126, %128, %cst_84 {dimension_numbers = #tpu.dot_dimension_numbers<[1], [0], [0], [1], [0, 0, 1, 1], [], []>} : vector<128x32xbf16>, vector<32x128xbf16>, vector<128x128xf32> -> vector<128x128xf32>
    %130 = arith.addf %100, %129 : vector<128x128xf32>
    %c0_85 = arith.constant 0 : index
    %c0_86 = arith.constant 0 : index
    %c0_87 = arith.constant 0 : index
    %131 = vector.load %arg17[%c0_85, %c0_86, %c0_87] : memref<1x128x128xf32, #tpu.memory_space<vmem>>, vector<1x128x128xf32>
    %132 = vector.shape_cast %131 : vector<1x128x128xf32> to vector<128x128xf32>
    %133 = vector.shape_cast %130 : vector<128x128xf32> to vector<1x128x128xf32>
    tpu.vector_store %arg17[%c0_85, %c0_86, %c0_87], %133 {strides = array<i32>} : memref<1x128x128xf32, #tpu.memory_space<vmem>>, vector<1x128x128xf32>,
    return
  }
  func.func @transform_0(%arg0: i32, %arg1: i32) -> (i32, i32, i32) {
    %c0_i32 = arith.constant 0 : i32
    %c0_i32_0 = arith.constant 0 : i32
    return %arg0, %c0_i32, %arg1 : i32, i32, i32
  }
  func.func @transform_1(%arg0: i32, %arg1: i32) -> (i32, i32, i32) {
    %c0_i32 = arith.constant 0 : i32
    %c0_i32_0 = arith.constant 0 : i32
    %c0_i32_1 = arith.constant 0 : i32
    return %arg0, %c0_i32, %c0_i32_0 : i32, i32, i32
  }
  func.func @transform_2(%arg0: i32, %arg1: i32) -> (i32, i32, i32) {
    %c0_i32 = arith.constant 0 : i32
    %c0_i32_0 = arith.constant 0 : i32
    %c0_i32_1 = arith.constant 0 : i32
    return %arg0, %c0_i32, %c0_i32_0 : i32, i32, i32
  }
  func.func @transform_3(%arg0: i32, %arg1: i32) -> (i32, i32) {
    %c0_i32 = arith.constant 0 : i32
    %c0_i32_0 = arith.constant 0 : i32
    %c0_i32_1 = arith.constant 0 : i32
    return %c0_i32, %c0_i32_0 : i32, i32
  }
  func.func @transform_4(%arg0: i32, %arg1: i32) -> (i32, i32) {
    %c0_i32 = arith.constant 0 : i32
    %c0_i32_0 = arith.constant 0 : i32
    %c0_i32_1 = arith.constant 0 : i32
    return %c0_i32, %c0_i32_0 : i32, i32
  }
  func.func @transform_5(%arg0: i32, %arg1: i32) -> (i32, i32) {
    %c0_i32 = arith.constant 0 : i32
    %c0_i32_0 = arith.constant 0 : i32
    %c0_i32_1 = arith.constant 0 : i32
    return %c0_i32, %c0_i32_0 : i32, i32
  }
  func.func @transform_6(%arg0: i32, %arg1: i32) -> (i32, i32) {
    %c0_i32 = arith.constant 0 : i32
    %c0_i32_0 = arith.constant 0 : i32
    %c0_i32_1 = arith.constant 0 : i32
    return %c0_i32, %c0_i32_0 : i32, i32
  }
  func.func @transform_7(%arg0: i32, %arg1: i32) -> (i32, i32, i32) {
    %c0_i32 = arith.constant 0 : i32
    %c0_i32_0 = arith.constant 0 : i32
    %c0_i32_1 = arith.constant 0 : i32
    %c0_i32_2 = arith.constant 0 : i32
    return %c0_i32, %c0_i32_0, %c0_i32_1 : i32, i32, i32
  }
  func.func @transform_8(%arg0: i32, %arg1: i32) -> (i32, i32, i32) {
    %c0_i32 = arith.constant 0 : i32
    %c0_i32_0 = arith.constant 0 : i32
    %c0_i32_1 = arith.constant 0 : i32
    %c0_i32_2 = arith.constant 0 : i32
    return %c0_i32, %c0_i32_0, %c0_i32_1 : i32, i32, i32
  }
  func.func @transform_9(%arg0: i32, %arg1: i32) -> (i32, i32, i32) {
    %c0_i32 = arith.constant 0 : i32
    %c0_i32_0 = arith.constant 0 : i32
    %c0_i32_1 = arith.constant 0 : i32
    %c0_i32_2 = arith.constant 0 : i32
    return %c0_i32, %c0_i32_0, %c0_i32_1 : i32, i32, i32
  }
  func.func @transform_10(%arg0: i32, %arg1: i32) -> (i32, i32, i32) {
    %c0_i32 = arith.constant 0 : i32
    %c0_i32_0 = arith.constant 0 : i32
    %c0_i32_1 = arith.constant 0 : i32
    %c0_i32_2 = arith.constant 0 : i32
    return %c0_i32, %c0_i32_0, %c0_i32_1 : i32, i32, i32
  }
  func.func @transform_11(%arg0: i32, %arg1: i32) -> (i32, i32, i32) {
    %c0_i32 = arith.constant 0 : i32
    %c0_i32_0 = arith.constant 0 : i32
    %c0_i32_1 = arith.constant 0 : i32
    %c0_i32_2 = arith.constant 0 : i32
    return %c0_i32, %c0_i32_0, %c0_i32_1 : i32, i32, i32
  }
  func.func @transform_12(%arg0: i32, %arg1: i32) -> (i32, i32, i32) {
    %c0_i32 = arith.constant 0 : i32
    %c0_i32_0 = arith.constant 0 : i32
    %c0_i32_1 = arith.constant 0 : i32
    %c0_i32_2 = arith.constant 0 : i32
    return %c0_i32, %c0_i32_0, %c0_i32_1 : i32, i32, i32
  }
  func.func @transform_13(%arg0: i32, %arg1: i32) -> (i32, i32, i32) {
    %c0_i32 = arith.constant 0 : i32
    %c0_i32_0 = arith.constant 0 : i32
    %c0_i32_1 = arith.constant 0 : i32
    %c0_i32_2 = arith.constant 0 : i32
    return %c0_i32, %c0_i32_0, %c0_i32_1 : i32, i32, i32
  }
  func.func @transform_14(%arg0: i32, %arg1: i32) -> (i32, i32) {
    %c0_i32 = arith.constant 0 : i32
    %c0_i32_0 = arith.constant 0 : i32
    %c0_i32_1 = arith.constant 0 : i32
    return %c0_i32, %c0_i32_0 : i32, i32
  }
  func.func @transform_15(%arg0: i32, %arg1: i32) -> (i32, i32, i32) {
    %c0_i32 = arith.constant 0 : i32
    %c0_i32_0 = arith.constant 0 : i32
    return %arg0, %arg1, %c0_i32 : i32, i32, i32
  }
}

</mosaic_0001>

<bundles_post_ra>
// kernel: tpu_custom_call.1
= control target key start
LH: loop header
LB: loop body
LE: loop exit
PB: predicated region body
PF: predicated region fallthrough
CT: control target
= control target key end

     0   :  { %s7500_s0 = inlined_call_operand.vmem [shape: bf16[2,128,256], index: 0, kind: input, shape index: {}]   ;;  %s7501_s1 = inlined_call_operand.vmem [shape: bf16[2,16,64], index: 1, kind: input, shape index: {}]   ;;  %s7502_s2 = inlined_call_operand.vmem [shape: bf16[2,16,64], index: 2, kind: input, shape index: {}]   ;;  %s7503_s3 = inlined_call_operand.vmem [shape: bf16[64,128], index: 3, kind: input, shape index: {}]   ;;  %s7504_s4 = inlined_call_operand.vmem [shape: f32[1,128], index: 4, kind: input, shape index: {}]   ;;  %s7505_s5 = inlined_call_operand.vmem [shape: bf16[64,128], index: 5, kind: input, shape index: {}]   ;;  %s7506_s6 = inlined_call_operand.vmem [shape: f32[1,128], index: 6, kind: input, shape index: {}]   ;;  %s7507_s7 = inlined_call_operand.vmem [shape: bf16[4,128,32], index: 7, kind: input, shape index: {}]   ;;  %s7508_s8 = inlined_call_operand.vmem [shape: f32[4,1,32], index: 8, kind: input, shape index: {}]   ;;  %s7509_s9 = inlined_call_operand.vmem [shape: bf16[4,128,32], index: 9, kind: input, shape index: {}]   ;;  %s7510_s10 = inlined_call_operand.vmem [shape: f32[4,1,32], index: 10, kind: input, shape index: {}]   ;;  %s7511_s11 = inlined_call_operand.vmem [shape: bf16[4,128,32], index: 11, kind: input, shape index: {}]   ;;  %s7512_s12 = inlined_call_operand.vmem [shape: f32[4,1,32], index: 12, kind: input, shape index: {}]   ;;  %s7513_s13 = inlined_call_operand.vmem [shape: bf16[4,32,128], index: 13, kind: input, shape index: {}]   ;;  %s7514_s14 = inlined_call_operand.vmem [shape: f32[1,128], index: 14, kind: input, shape index: {}]   ;;  %s7515_s15 = inlined_call_operand.hbm [shape: f32[2,256,128], index: 15, kind: output, shape index: {}]  }
   0x1   :  { %7530 = sst [smem:[#allocation17_spill]] %s7500_s0 }
   0x2   :  { %7531 = sst [smem:[#allocation18_spill]] %s7508_s8 }
   0x3   :  { %7532 = sst [smem:[#allocation19_spill]] %s7513_s13 }
   0x4   :  { %7533 = sst [smem:[#allocation20_spill]] %s7514_s14 }
   0x5   :  { %7534 = sst [smem:[#allocation21_spill]] %s7515_s15 }
   0x6   :  { %20 = vsyncpa [#allocation6], 0 }
   0x7   :  { %22 = vsyncpa [#allocation6 + $0x1], 0  ;;  %s5866_s18 = smov 0   ;;  %s5868_s19 = smov 0  }
   0x8   :  { %s5870_s20 = smov 0   ;;  %s5872_s21 = smov 0  }
   0x9   :  { %s5874_s22 = smov 0   ;;  %s5876_s23 = smov 0  }
   0xa   :  { %s5878_s24 = smov 0   ;;  %s5880_s25 = smov 0  }
   0xb LB: > { %7535 = sst [smem:[#allocation8_spill]] %s5753_s18  ;;  %s4325_s26 = sadd.s32 4294967295, %s5781_s25   ;;  %s5781_s25 = sphi %s5880_s25, %s28_s25   ;;  %s5777_s24 = sphi %s5878_s24, %s7564_s24   ;;  %s5773_s23 = sphi %s5876_s23, %s7563_s23   ;;  %s5769_s22 = sphi %s5874_s22, %s7562_s22   ;;  %s5765_s21 = sphi %s5872_s21, %s7561_s21   ;;  %s5761_s20 = sphi %s5870_s20, %s7560_s20   ;;  %s5757_s19 = sphi %s5868_s19, %s7566_s19   ;;  %s5753_s18 = sphi %s5866_s18, %s7565_s18  }
   0xc   : > { %7536 = sst [smem:[#allocation9_spill]] %s5761_s20  ;;  %s4326_s27 = sadd.s32 4294967294, %s5781_s25  }
   0xd   : > { %7537 = sst [smem:[#allocation10_spill]] %s5773_s23  ;;  %s37_s28 = sadd.s32 1, %s5773_s23 }
   0xe   : > { %7538 = sst [smem:[#allocation11_spill]] %s5777_s24  ;;  %p38_p0 = scmp.ge.s32.totalorder %s37_s28, 2 }
   0xf   : > { %s40_s29 = sadd.s32 1, %s5777_s24  ;;  %p56_p1 = scmp.ne.s32.totalorder %s5761_s20, %s5757_s19 }
  0x10   : > { %p57_p2 = scmp.eq.s32.totalorder %s5781_s25, 0  ;;  %s7568_s28 = smov (%p38_p0, %s37_s28), 0 }
  0x11   : > { %7539 = sst [smem:[#allocation12_spill]] %s7568_s28  ;;  %s7570_s29 = smov (!%p38_p0, %s40_s29), %s5777_s24 }
  0x12   : > { %s45_s30 = ssub.s32 %s5773_s23, %s7568_s28  ;;  %p5918_p3 = por %p57_p2, %p56_p1 }
  0x13   : > { %p42_p4 = scmp.ge.s32.totalorder %s7570_s29, 2  ;;  %p392_p5 = scmp.eq.s32.totalorder %s4325_s26, 3 }
  0x14   : > { %p397_p6 = scmp.ne.s32.totalorder %s5757_s19, %s5753_s18  ;;  %p398_p7 = scmp.eq.s32.totalorder %s4326_s27, 3 }
  0x15   : > { %s7572_s29 = smov (%p42_p4, %s7570_s29), 0  ;;  %p5926_p8 = por %p392_p5, %p56_p1 }
  0x16   : > { %7541 = sst [smem:[#allocation13_spill]] %s7572_s29  ;;  %p5930_p9 = por %p398_p7, %p397_p6 }
  0x17   : > { %s7542_s17 = scalar_select %p5926_p8, 1, 0 }
  0x18   : > { %s7544_s15 = scalar_select %p5930_p9, 1, 0 }
  0x19   : > { %7543 = sst [smem:[#allocation14_spill]] %s7542_s17  ;;  %s44_s28 = ssub.s32 %s5777_s24, %s7572_s29 }
  0x1a   : > { %7545 = sst [smem:[#allocation15_spill]] %s7544_s15  ;;  %s46_s14 = sor.u32 %s45_s30, %s44_s28 }
  0x1b   : > { %s49_s13 = sadd.s32 1, %s5761_s20  ;;  %p47_p10 = scmp.eq.s32.totalorder %s46_s14, 0 }
  0x1c   : > { %p4328_p11 = scmp.ge.s32.totalorder %s5781_s25, 4 }
  0x1d   : > { %s5938_s8 = scalar_select %p47_p10, %s5761_s20, %s49_s13  }
  0x1e   : > { %450 = sbr.rel (%p4328_p11) target bundleno = 61 (0x3d), region = 64 }
  0x1f   : > { %7546 = sst [smem:[#allocation16_spill]] %s5938_s8 }
  0x23   : > { %453 = sbr.rel (!%p5918_p3) target bundleno = 61 (0x3d), region = 68  ;;  %s455_s26 = sand.u32 (%p5918_p3), 1, %s5761_s20  }
  0x24   : > { %s4330_s27 = sshll.u32 (%p5918_p3), %s5777_s24, 5  ;;  %s4329_s18 = sshll.u32 (%p5918_p3), %s455_s26, 6 }
  0x25   : > { %s459_s17 = sadd.s32 (%p5918_p3), %s5773_s23, %s4330_s27  ;;  %s7547_s0 = sld [smem:[#allocation17_spill]] (%p5918_p3) }
  0x26   : > { %s4331_s15 = sshll.u32 (%p5918_p3), %s459_s17, 2  ;;  %s457_s13 = scalar_lea.vmem (%p5918_p3), [#allocation4], %s4329_s18 }
  0x2b   : > { %s5949_s14 = scalar_lea.vmem %s7547_s0, %s4331_s15 }
  0x2c   : > { %v478_v0 = vld [vmem:[%s5949_s14] sm:$0xf]  ;;  %v480_v1 = vld [vmem:[%s5949_s14 + $0x8] sm:$0xf]  ;;  %v482_v2 = vld [vmem:[%s5949_s14 + $0x10] sm:$0xf] }
  0x2d   : > { %479 = vst [vmem:[%s457_s13] sm:$0xf] %v478_v0  ;;  %v484_v3 = vld [vmem:[%s5949_s14 + $0x18] sm:$0xf]  ;;  %v486_v4 = vld [vmem:[%s5949_s14 + $0x20] sm:$0xf] }
  0x2e   : > { %481 = vst [vmem:[%s457_s13 + $0x4] sm:$0xf] %v480_v1  ;;  %v488_v5 = vld [vmem:[%s5949_s14 + $0x28] sm:$0xf]  ;;  %v490_v6 = vld [vmem:[%s5949_s14 + $0x30] sm:$0xf] }
  0x2f   : > { %483 = vst [vmem:[%s457_s13 + $0x8] sm:$0xf] %v482_v2  ;;  %v492_v7 = vld [vmem:[%s5949_s14 + $0x38] sm:$0xf]  ;;  %v494_v8 = vld [vmem:[%s5949_s14 + $0x40] sm:$0xf] }
  0x30   : > { %485 = vst [vmem:[%s457_s13 + $0xc] sm:$0xf] %v484_v3  ;;  %v496_v9 = vld [vmem:[%s5949_s14 + $0x48] sm:$0xf]  ;;  %v498_v10 = vld [vmem:[%s5949_s14 + $0x50] sm:$0xf] }
  0x31   : > { %487 = vst [vmem:[%s457_s13 + $0x10] sm:$0xf] %v486_v4  ;;  %v500_v11 = vld [vmem:[%s5949_s14 + $0x58] sm:$0xf]  ;;  %v502_v12 = vld [vmem:[%s5949_s14 + $0x60] sm:$0xf] }
  0x32   : > { %489 = vst [vmem:[%s457_s13 + $0x14] sm:$0xf] %v488_v5  ;;  %v504_v13 = vld [vmem:[%s5949_s14 + $0x68] sm:$0xf]  ;;  %v506_v14 = vld [vmem:[%s5949_s14 + $0x70] sm:$0xf] }
  0x33   : > { %491 = vst [vmem:[%s457_s13 + $0x18] sm:$0xf] %v490_v6  ;;  %v508_v15 = vld [vmem:[%s5949_s14 + $0x78] sm:$0xf] }
  0x34   : > { %493 = vst [vmem:[%s457_s13 + $0x1c] sm:$0xf] %v492_v7 }
  0x35   : > { %495 = vst [vmem:[%s457_s13 + $0x20] sm:$0xf] %v494_v8 }
  0x36   : > { %497 = vst [vmem:[%s457_s13 + $0x24] sm:$0xf] %v496_v9 }
  0x37   : > { %499 = vst [vmem:[%s457_s13 + $0x28] sm:$0xf] %v498_v10 }
  0x38   : > { %501 = vst [vmem:[%s457_s13 + $0x2c] sm:$0xf] %v500_v11 }
  0x39   : > { %503 = vst [vmem:[%s457_s13 + $0x30] sm:$0xf] %v502_v12 }
  0x3a   : > { %505 = vst [vmem:[%s457_s13 + $0x34] sm:$0xf] %v504_v13 }
  0x3b   : > { %507 = vst [vmem:[%s457_s13 + $0x38] sm:$0xf] %v506_v14 }
  0x3c   : > { %509 = vst [vmem:[%s457_s13 + $0x3c] sm:$0xf] %v508_v15 }
  0x3d PF: > { %p4332_p12 = scmp.ge.s32.totalorder %s5781_s25, 1  ;;  %p580_p13 = scmp.lt.s32.totalorder %s5781_s25, 5 }
  0x3f   : > { %p581_p0 = pnand %p4332_p12, %p580_p13 }
  0x40   : > { %s5970_s15 = sand.u32 (!%p581_p0), 1, %s5757_s19   ;;  %p644_p1 = scmp.lt.s32.totalorder (!%p581_p0), %s5769_s22, 1 }
  0x41   : > { %584 = sbr.rel (%p581_p0) target bundleno = 3274 (0xcca), region = 117  ;;  %s4333_s18 = sshll.u32 (!%p581_p0), %s5970_s15, 6 }
  0x42   : > { %s4334_s29 = sshll.u32 (!%p581_p0), %s5970_s15, 7  ;;  %s5982_s0 = scalar_lea.vmem (!%p581_p0), [#allocation4], %s4333_s18 }
  0x43   : > { %s5984_s24 = scalar_lea.vmem (!%p581_p0), [#allocation5], %s4334_s29  ;;  %p4339_p2 = scmp.ne.s32.totalorder (!%p581_p0), %s5765_s21, 0 }
  0x46   : > { %s645_s30 = scalar_select %p644_p1, %s5769_s22, 1 }
  0x47   : > { %659 = sbr.rel (%p4339_p2) target bundleno = 841 (0x349), region = 125 }
  0x48   : > { %s5113_s16 = sshll.u32 %s645_s30, 3 }
  0x49   : > { %s648_s27 = scalar_lea.vmem %s7501_s1, %s5113_s16  ;;  %s653_s13 = scalar_lea.vmem %s7502_s2, %s5113_s16 }
  0x4c   : > { %v5120_v16 = vld [vmem:[%s7503_s3 + $0x18] sm:$0xff]  ;;  %v5119_v18 = vld [vmem:[%s7503_s3 + $0x10] sm:$0xff]  ;;  %v5118_v20 = vld [vmem:[%s7503_s3 + $0x8] sm:$0xff]  ;;  %vm705_vm0 = vcmask 523264   ;;  %v5783_v36 = vmov 128.0   ;;  %vm1077_vm14 = vcmask 257024  }
  0x4d   : > { %v5124_v17 = vld [vmem:[%s7505_s5 + $0x18] sm:$0xff]  ;;  %713 = vmatpush.bf16.msra.mxu0 %v5120_v16  ;;  %v5123_v19 = vld [vmem:[%s7505_s5 + $0x10] sm:$0xff]  ;;  %v5122_v21 = vld [vmem:[%s7505_s5 + $0x8] sm:$0xff]  ;;  %5415 = vrcp.f32 %v5783_v36  ;;  %vm1070_vm15 = vcmask 125952  }
  0x4e   : > { %771 = vmatpush.bf16.msra.mxu1 %v5124_v17  ;;  %v5117_v22 = vld [vmem:[%s7503_s3] sm:$0xff]  ;;  %v5132_v39 = vld [vmem:[%s7509_s9 + $0x38] sm:$0xff]  ;;  %v5131_v43 = vld [vmem:[%s7509_s9 + $0x30] sm:$0xff] }
  0x4f   : > { %v5121_v23 = vld [vmem:[%s7505_s5] sm:$0xff]  ;;  %v5140_v40 = vld [vmem:[%s7511_s11 + $0x38] sm:$0xff]  ;;  %938 = vmatpush.bf16.msra.mxu2 %v5132_v39  ;;  %v5139_v44 = vld [vmem:[%s7511_s11 + $0x30] sm:$0xff] }
  0x50   : > { %v5115_v24 = vld [vmem:[%s648_s27] sm:$0xff]  ;;  %v5148_v41 = vld [vmem:[%s7509_s9 + $0x78] sm:$0xff]  ;;  %1020 = vmatpush.bf16.msra.mxu3 %v5140_v40  ;;  %v5147_v46 = vld [vmem:[%s7509_s9 + $0x70] sm:$0xff] }
  0x51   : > { %714 = vmatpush.bf16.msra.mxu0 %v5119_v18  ;;  %v5116_v25 = vld [vmem:[%s653_s13] sm:$0xff]  ;;  %v5156_v42 = vld [vmem:[%s7511_s11 + $0x78] sm:$0xff]  ;;  %v5155_v47 = vld [vmem:[%s7511_s11 + $0x70] sm:$0xff] }
  0x52   : > { %772 = vmatpush.bf16.msra.mxu1 %v5123_v19  ;;  %v5405_v26 = vld [vmem:[%s7504_s4] ss:$0 sm:$0xff]  ;;  %v5130_v48 = vld [vmem:[%s7509_s9 + $0x28] sm:$0xff]  ;;  %v5128_v11 = vld [vmem:[%s7509_s9 + $0x18] sm:$0xff] }
  0x53   : > { %v5406_v27 = vld [vmem:[%s7506_s6] ss:$0 sm:$0xff]  ;;  %v5416_v37 = vpop.eup %5415  ;;  %939 = vmatpush.bf16.msra.mxu2 %v5131_v43  ;;  %v5138_v49 = vld [vmem:[%s7511_s11 + $0x28] sm:$0xff]  ;;  %v5136_v12 = vld [vmem:[%s7511_s11 + $0x18] sm:$0xff] }
  0x54   : > { %v786_v38 = vmul.f32 128.0, %v5416_v37  ;;  %1021 = vmatpush.bf16.msra.mxu3 %v5139_v44  ;;  %v5146_v51 = vld [vmem:[%s7509_s9 + $0x68] sm:$0xff]  ;;  %vm790_vm1 = vweird.f32 %v5416_v37  ;;  %v5129_v7 = vld [vmem:[%s7509_s9 + $0x20] sm:$0xff]  ;;  %v5144_v13 = vld [vmem:[%s7509_s9 + $0x58] sm:$0xff] }
  0x55   : > { %715 = vmatpush.bf16.msra.mxu0 %v5118_v20  ;;  %v5154_v52 = vld [vmem:[%s7511_s11 + $0x68] sm:$0xff]  ;;  %v5137_v8 = vld [vmem:[%s7511_s11 + $0x20] sm:$0xff]  ;;  %v5152_v14 = vld [vmem:[%s7511_s11 + $0x58] sm:$0xff] }
  0x56   : > { %773 = vmatpush.bf16.msra.mxu1 %v5122_v21  ;;  %v787_v45 = vsub.f32 1.0, %v786_v38  ;;  %v5145_v9 = vld [vmem:[%s7509_s9 + $0x60] sm:$0xff]  ;;  %v5127_v15 = vld [vmem:[%s7509_s9 + $0x10] sm:$0xff]  ;;  %v5126_v19 = vld [vmem:[%s7509_s9 + $0x8] sm:$0xff] }
  0x57   : > { %940 = vmatpush.bf16.msra.mxu2 %v5130_v48  ;;  %v5153_v10 = vld [vmem:[%s7511_s11 + $0x60] sm:$0xff]  ;;  %v5135_v16 = vld [vmem:[%s7511_s11 + $0x10] sm:$0xff]  ;;  %v5134_v20 = vld [vmem:[%s7511_s11 + $0x8] sm:$0xff] }
  0x58   : > { %v788_v50 = vmul.f32 %v5416_v37, %v787_v45  ;;  %1022 = vmatpush.bf16.msra.mxu3 %v5138_v49  ;;  %v5143_v17 = vld [vmem:[%s7509_s9 + $0x50] sm:$0xff]  ;;  %v5142_v21 = vld [vmem:[%s7509_s9 + $0x48] sm:$0xff]  ;;  %v5161_v39 = vld [vmem:[%s7509_s9 + $0xa0] sm:$0xff] }
  0x59   : > { %716 = vmatpush.bf16.msra.mxu0 %v5117_v22  ;;  %v5151_v18 = vld [vmem:[%s7511_s11 + $0x50] sm:$0xff]  ;;  %v5150_v22 = vld [vmem:[%s7511_s11 + $0x48] sm:$0xff]  ;;  %v5169_v40 = vld [vmem:[%s7511_s11 + $0xa0] sm:$0xff] }
  0x5a   : > { %774 = vmatpush.bf16.msra.mxu1 %v5121_v23  ;;  %v789_v53 = vadd.f32 %v5416_v37, %v788_v50  ;;  %v5125_v23 = vld [vmem:[%s7509_s9] sm:$0xff]  ;;  %v5170_v36 = vld [vmem:[%s7511_s11 + $0xa8] sm:$0xff]  ;;  %v5160_v49 = vld [vmem:[%s7509_s9 + $0x98] sm:$0xff] }
  0x5b   : > { %941 = vmatpush.bf16.msra.mxu2 %v5129_v7  ;;  %v5186_v38 = vld [vmem:[%s7511_s11 + $0xe8] sm:$0xff]  ;;  %v5185_v44 = vld [vmem:[%s7511_s11 + $0xe0] sm:$0xff]  ;;  %v5168_v50 = vld [vmem:[%s7511_s11 + $0x98] sm:$0xff] }
  0x5c   : > { %4360 = vmatmul.msk.bf16.vlgmr.msra.gmra.mxu0 %vm705_vm0, %v5115_v24  ;;  %v6053_v54 = vsel %vm790_vm1, %v5416_v37, %v789_v53  ;;  %1023 = vmatpush.bf16.msra.mxu3 %v5137_v8  ;;  %v5133_v24 = vld [vmem:[%s7511_s11] sm:$0xff]  ;;  %v5178_v37 = vld [vmem:[%s7509_s9 + $0xe8] sm:$0xff]  ;;  %v5159_v53 = vld [vmem:[%s7509_s9 + $0x90] sm:$0xff] }
  0x5d   : > { %4381 = vmatmul.msk.bf16.vlgmr.msra.gmra.mxu1 %vm705_vm0, %v5116_v25  ;;  %1150 = vmatpush.bf16.msrb.mxu0 %v5148_v41  ;;  %v5141_v25 = vld [vmem:[%s7509_s9 + $0x40] sm:$0xff]  ;;  %v5182_v7 = vld [vmem:[%s7511_s11 + $0xc8] sm:$0xff] }
  0x5e   : > { %1234 = vmatpush.bf16.msrb.mxu1 %v5156_v42  ;;  %v5177_v41 = vld [vmem:[%s7509_s9 + $0xe0] sm:$0xff] }
  0x5f   : > { %942 = vmatpush.bf16.msra.mxu2 %v5128_v11 }
  0x60   : > { %1024 = vmatpush.bf16.msra.mxu3 %v5136_v12  ;;  %v5157_v12 = vld [vmem:[%s7509_s9 + $0x80] sm:$0xff] }
  0x61   : > { %1151 = vmatpush.bf16.msrb.mxu0 %v5147_v46 }
  0x62   : > { %1235 = vmatpush.bf16.msrb.mxu1 %v5155_v47 }
  0x63   : > { %943 = vmatpush.bf16.msra.mxu2 %v5127_v15  ;;  %v5173_v15 = vld [vmem:[%s7509_s9 + $0xc0] sm:$0xff] }
  0x64   : > { %1025 = vmatpush.bf16.msra.mxu3 %v5135_v16  ;;  %v5181_v16 = vld [vmem:[%s7511_s11 + $0xc0] sm:$0xff] }
  0x65   : > { %1152 = vmatpush.bf16.msrb.mxu0 %v5146_v51  ;;  %v5176_v51 = vld [vmem:[%s7509_s9 + $0xd8] sm:$0xff] }
  0x66   : > { %1236 = vmatpush.bf16.msrb.mxu1 %v5154_v52  ;;  %v5184_v52 = vld [vmem:[%s7511_s11 + $0xd8] sm:$0xff] }
  0x67   : > { %944 = vmatpush.bf16.msra.mxu2 %v5126_v19 }
  0x68   : > { %1026 = vmatpush.bf16.msra.mxu3 %v5134_v20 }
  0x69   : > { %1153 = vmatpush.bf16.msrb.mxu0 %v5145_v9 }
  0x6a   : > { %1237 = vmatpush.bf16.msrb.mxu1 %v5153_v10 }
  0x6b   : > { %945 = vmatpush.bf16.msra.mxu2 %v5125_v23 }
  0x6c   : > { %1027 = vmatpush.bf16.msra.mxu3 %v5133_v24 }
  0x6d   : > { %1154 = vmatpush.bf16.msrb.mxu0 %v5144_v13  ;;  %v5165_v13 = vld [vmem:[%s7511_s11 + $0x80] sm:$0xff] }
  0x6e   : > { %1238 = vmatpush.bf16.msrb.mxu1 %v5152_v14 }
  0x71   : > { %1155 = vmatpush.bf16.msrb.mxu0 %v5143_v17 }
  0x72   : > { %1239 = vmatpush.bf16.msrb.mxu1 %v5151_v18 }
  0x75   : > { %1156 = vmatpush.bf16.msrb.mxu0 %v5142_v21 }
  0x76   : > { %1240 = vmatpush.bf16.msrb.mxu1 %v5150_v22 }
  0x79   : > { %1157 = vmatpush.bf16.msrb.mxu0 %v5141_v25 }
  0xd9   : > { %v718_v28 = vpop.f32.mrf.mxu0 }
  0xda   : > { %v776_v29 = vpop.f32.mrf.mxu1  ;;  %v719_v30 = vadd.f32 %v5405_v26, %v718_v28  ;;  %v5172_v28 = vld [vmem:[%s7511_s11 + $0xb8] sm:$0xff] }
  0xdb   : > { %v777_v31 = vadd.f32 %v5406_v27, %v776_v29  ;;  %v5180_v29 = vld [vmem:[%s7509_s9 + $0xf8] sm:$0xff]  ;;  %1448 = vmatpush.bf16.msrb.mxu3 %v5172_v28 }
  0xdc   : > { %781 = vadd.xlane.f32.xlu0 %v719_v30  ;;  %1578 = vmatpush.bf16.msra.mxu0 %v5180_v29 }
  0xdd   : > { %829 = vadd.xlane.f32.xlu1 %v777_v31 }
  0xe1   : > { %v720_v32 = vpop.f32.mrf.mxu0 }
  0xe2   : > { %v778_v33 = vpop.f32.mrf.mxu1  ;;  %v721_v34 = vadd.f32 %v5405_v26, %v720_v32  ;;  %v5149_v26 = vld [vmem:[%s7511_s11 + $0x40] sm:$0xff]  ;;  %v5171_v32 = vld [vmem:[%s7511_s11 + $0xb0] sm:$0xff] }
  0xe3   : > { %v779_v35 = vadd.f32 %v5406_v27, %v778_v33  ;;  %v5164_v27 = vld [vmem:[%s7509_s9 + $0xb8] sm:$0xff]  ;;  %1241 = vmatpush.bf16.msrb.mxu1 %v5149_v26  ;;  %v5179_v33 = vld [vmem:[%s7509_s9 + $0xf0] sm:$0xff]  ;;  %1449 = vmatpush.bf16.msrb.mxu3 %v5171_v32 }
  0xe4   : > { %783 = vadd.xlane.f32.xlu0 %v721_v34  ;;  %1364 = vmatpush.bf16.msrb.mxu2 %v5164_v27 }
  0xe5   : > { %831 = vadd.xlane.f32.xlu1 %v779_v35  ;;  %1579 = vmatpush.bf16.msra.mxu0 %v5179_v33 }
  0xe7   : > { %1450 = vmatpush.bf16.msrb.mxu3 %v5170_v36 }
  0xe9   : > { %1580 = vmatpush.bf16.msra.mxu0 %v5178_v37 }
  0xeb   : > { %1451 = vmatpush.bf16.msrb.mxu3 %v5169_v40 }
  0xed   : > { %1581 = vmatpush.bf16.msra.mxu0 %v5177_v41 }
  0xef   : > { %1452 = vmatpush.bf16.msrb.mxu3 %v5168_v50 }
  0xf1   : > { %1582 = vmatpush.bf16.msra.mxu0 %v5176_v51 }
 0x14f   : > { %v782_v56 = vpop.xlane.xlu0 %781 }
 0x150   : > { %v830_v55 = vpop.xlane.xlu1 %829  ;;  %v792_v58 = vmul.f32 %v6053_v54, %v782_v56  ;;  %v5175_v56 = vld [vmem:[%s7509_s9 + $0xd0] sm:$0xff] }
 0x151   : > { %v833_v57 = vmul.f32 %v830_v55, %v6053_v54  ;;  %v5167_v55 = vld [vmem:[%s7511_s11 + $0x90] sm:$0xff]  ;;  %1583 = vmatpush.bf16.msra.mxu0 %v5175_v56 }
 0x152   : > { %v6059_v60 = vsub.f32 %v719_v30, %v792_v58  ;;  %v5188_v30 = vld [vmem:[%s7511_s11 + $0xf8] sm:$0xff]  ;;  %1453 = vmatpush.bf16.msrb.mxu3 %v5167_v55 }
 0x153   : > { %v6057_v59 = vsub.f32 %v777_v31, %v833_v57  ;;  %1662 = vmatpush.bf16.msra.mxu1 %v5188_v30  ;;  %v5163_v31 = vld [vmem:[%s7509_s9 + $0xb0] sm:$0xff] }
 0x154   : > { %v796_v62 = vmul.f32 %v6059_v60, %v6059_v60  ;;  %1365 = vmatpush.bf16.msrb.mxu2 %v5163_v31  ;;  %v5183_v57 = vld [vmem:[%s7511_s11 + $0xd0] sm:$0xff] }
 0x155   : > { %v837_v61 = vmul.f32 %v6057_v59, %v6057_v59 }
 0x156   : > { %798 = vadd.xlane.f32.xlu2 %v796_v62 }
 0x157   : > { %839 = vadd.xlane.f32.xlu0 %v837_v61  ;;  %v784_v0 = vpop.xlane.xlu0 %783 }
 0x158   : > { %v832_v63 = vpop.xlane.xlu1 %831  ;;  %v793_v2 = vmul.f32 %v6053_v54, %v784_v0  ;;  %v5158_v0 = vld [vmem:[%s7509_s9 + $0x88] sm:$0xff] }
 0x159   : > { %v834_v1 = vmul.f32 %v832_v63, %v6053_v54 }
 0x15a   : > { %v6069_v4 = vsub.f32 %v721_v34, %v793_v2  ;;  %v5187_v34 = vld [vmem:[%s7511_s11 + $0xf0] sm:$0xff] }
 0x15b   : > { %v6067_v3 = vsub.f32 %v779_v35, %v834_v1  ;;  %1663 = vmatpush.bf16.msra.mxu1 %v5187_v34  ;;  %v5162_v35 = vld [vmem:[%s7509_s9 + $0xa8] sm:$0xff] }
 0x15c   : > { %v797_v6 = vmul.f32 %v6069_v4, %v6069_v4  ;;  %1366 = vmatpush.bf16.msrb.mxu2 %v5162_v35  ;;  %v5166_v1 = vld [vmem:[%s7511_s11 + $0x88] sm:$0xff] }
 0x15d   : > { %v838_v5 = vmul.f32 %v6067_v3, %v6067_v3  ;;  %1454 = vmatpush.bf16.msrb.mxu3 %v5166_v1 }
 0x15e   : > { %800 = vadd.xlane.f32.xlu2 %v797_v6 }
 0x15f   : > { %841 = vadd.xlane.f32.xlu1 %v838_v5  ;;  %1664 = vmatpush.bf16.msra.mxu1 %v5186_v38 }
 0x160   : > { %1367 = vmatpush.bf16.msrb.mxu2 %v5161_v39 }
 0x161   : > { %1455 = vmatpush.bf16.msrb.mxu3 %v5165_v13  ;;  %v5414_v13 = vld [vmem:[%s7512_s12 + $0x2] ss:$0 sm:$0xff] }
 0x163   : > { %1665 = vmatpush.bf16.msra.mxu1 %v5185_v44 }
 0x164   : > { %1368 = vmatpush.bf16.msrb.mxu2 %v5160_v49  ;;  %v5409_v49 = vld [vmem:[%s7510_s10] ss:$0 sm:$0xff] }
 0x167   : > { %1666 = vmatpush.bf16.msra.mxu1 %v5184_v52 }
 0x168   : > { %1369 = vmatpush.bf16.msrb.mxu2 %v5159_v53 }
 0x16b   : > { %1667 = vmatpush.bf16.msra.mxu1 %v5183_v57 }
 0x16c   : > { %1370 = vmatpush.bf16.msrb.mxu2 %v5158_v0  ;;  %v5412_v0 = vld [vmem:[%s7512_s12 + $0x3] ss:$0 sm:$0xff] }
 0x16f   : > { %1668 = vmatpush.bf16.msra.mxu1 %v5182_v7 }
 0x170   : > { %1371 = vmatpush.bf16.msrb.mxu2 %v5157_v12 }
 0x173   : > { %1669 = vmatpush.bf16.msra.mxu1 %v5181_v16 }
 0x1c9   : > { %v799_v42 = vpop.xlane.xlu2 %798 }
 0x1ca   : > { %v840_v43 = vpop.xlane.xlu0 %839  ;;  %v802_v45 = vmul.f32 %v799_v42, %v6053_v54 }
 0x1cb   : > { %v843_v46 = vmul.f32 %v840_v43, %v6053_v54 }
 0x1cc   : > { %v6185_v47 = vadd.f32 1e-12, %v802_v45 }
 0x1cd   : > { %v6187_v48 = vadd.f32 1e-12, %v843_v46 }
 0x1ce   : > { %5417 = vrsqrt.f32 %v6185_v47  ;;  %vm812_vm8 = vweird.f32 %v6185_v47 }
 0x1cf   : > { %5419 = vrsqrt.f32 %v6187_v48  ;;  %vm853_vm2 = vweird.f32 %v6187_v48 }
 0x1d1   : > { %v801_v61 = vpop.xlane.xlu2 %800 }
 0x1d2   : > { %v842_v58 = vpop.xlane.xlu1 %841  ;;  %v803_v63 = vmul.f32 %v801_v61, %v6053_v54 }
 0x1d3   : > { %v844_v62 = vmul.f32 %v842_v58, %v6053_v54  ;;  %v5174_v54 = vld [vmem:[%s7509_s9 + $0xc8] sm:$0xff] }
 0x1d4   : > { %v6223_v2 = vpop.eup %5417  ;;  %v805_v6 = vadd.f32 1e-12, %v803_v63  ;;  %1584 = vmatpush.bf16.msra.mxu0 %v5174_v54 }
 0x1d5   : > { %v846_v5 = vadd.f32 1e-12, %v844_v62  ;;  %v5420_v8 = vpop.eup %5419  ;;  %v807_v9 = vmul.f32 %v6223_v2, %v6185_v47  ;;  %vm813_vm6 = vweird.f32 %v6223_v2 }
 0x1d6   : > { %v848_v10 = vmul.f32 %v5420_v8, %v6187_v48  ;;  %vm854_vm3 = vweird.f32 %v5420_v8  ;;  %vm814_vm11 = vmor %vm812_vm8, %vm813_vm6  ;;  %vm822_vm12 = vweird.f32 %v805_v6  ;;  %v5407_v48 = vld [vmem:[%s7510_s10 + $0x1] ss:$0 sm:$0xff] }
 0x1d7   : > { %5421 = vrsqrt.f32 %v846_v5  ;;  %v808_v11 = vmul.f32 %v6223_v2, %v807_v9  ;;  %vm863_vm4 = vweird.f32 %v846_v5  ;;  %vm6250_vm7 = vmor %vm853_vm2, %vm854_vm3 }
 0x1d8   : > { %5423 = vrsqrt.f32 %v805_v6  ;;  %v849_v14 = vmul.f32 %v5420_v8, %v848_v10  ;;  %1585 = vmatpush.bf16.msra.mxu0 %v5173_v15  ;;  %v5413_v15 = vld [vmem:[%s7510_s10 + $0x2] ss:$0 sm:$0xff] }
 0x1d9   : > { %v809_v17 = vmul.f32 0.5, %v808_v11 }
 0x1da   : > { %v850_v18 = vmul.f32 0.5, %v849_v14  ;;  %v5411_v14 = vld [vmem:[%s7510_s10 + $0x3] ss:$0 sm:$0xff] }
 0x1db   : > { %v810_v23 = vsub.f32 1.5, %v809_v17 }
 0x1dc   : > { %v851_v21 = vsub.f32 1.5, %v850_v18 }
 0x1dd   : > { %v5422_v19 = vpop.eup %5421  ;;  %v811_v29 = vmul.f32 %v6223_v2, %v810_v23 }
 0x1de   : > { %v5424_v20 = vpop.eup %5423  ;;  %v858_v22 = vmul.f32 %v5422_v19, %v846_v5  ;;  %v852_v27 = vmul.f32 %v5420_v8, %v851_v21  ;;  %vm864_vm5 = vweird.f32 %v5422_v19 }
 0x1df   : > { %v817_v24 = vmul.f32 %v5424_v20, %v805_v6  ;;  %vm865_vm9 = vmor %vm863_vm4, %vm864_vm5  ;;  %vm823_vm10 = vweird.f32 %v5424_v20  ;;  %v815_v36 = vsel %vm814_vm11, %v6223_v2, %v811_v29 }
 0x1e0   : > { %v859_v25 = vmul.f32 %v5422_v19, %v858_v22  ;;  %v856_v34 = vsel %vm6250_vm7, %v5420_v8, %v852_v27  ;;  %vm824_vm13 = vmor %vm822_vm12, %vm823_vm10  ;;  %v826_v42 = vmul.f32 %v815_v36, %v6059_v60 }
 0x1e1   : > { %v818_v26 = vmul.f32 %v5424_v20, %v817_v24  ;;  %v867_v40 = vmul.f32 %v856_v34, %v6057_v59  ;;  %v5408_v59 = vld [vmem:[%s7512_s12 + $0x1] ss:$0 sm:$0xff] }
 0x1e2   : > { %v860_v28 = vmul.f32 0.5, %v859_v25 }
 0x1e3   : > { %v819_v31 = vmul.f32 0.5, %v818_v26 }
 0x1e4   : > { %v861_v32 = vsub.f32 1.5, %v860_v28 }
 0x1e5   : > { %v820_v33 = vsub.f32 1.5, %v819_v31 }
 0x1e6   : > { %v862_v35 = vmul.f32 %v5422_v19, %v861_v32 }
 0x1e7   : > { %v821_v37 = vmul.f32 %v5424_v20, %v820_v33 }
 0x1e8   : > { %v866_v38 = vsel %vm865_vm9, %v5422_v19, %v862_v35 }
 0x1e9   : > { %v825_v39 = vsel %vm824_vm13, %v5424_v20, %v821_v37  ;;  %v868_v41 = vmul.f32 %v866_v38, %v6067_v3 }
 0x1ea   : > { %v827_v43 = vmul.f32 %v825_v39, %v6069_v4  ;;  %v5410_v4 = vld [vmem:[%s7512_s12] ss:$0 sm:$0xff] }
 0x1eb   : > { %v869_v44 = vpack.c.bf16 %v868_v41, %v867_v40 }
 0x1ec   : > { %v828_v45 = vpack.c.bf16 %v827_v43, %v826_v42 }
 0x1ed   : > { %1028 = vmatmul.bf16.vlgmr.msra.gmra.mxu3 %v869_v44  ;;  %1242 = vmatmul.bf16.vlgmr.msrb.gmra.mxu1 %v869_v44 }
 0x1ee   : > { %946 = vmatmul.bf16.vlgmr.msra.gmra.mxu2 %v828_v45  ;;  %1158 = vmatmul.bf16.vlgmr.msrb.gmra.mxu0 %v828_v45 }
 0x1fd   : > { %1456 = vmatmul.bf16.vlgmr.msrb.gmra.mxu3 %v869_v44  ;;  %1670 = vmatmul.bf16.vlgmr.msra.gmra.mxu1 %v869_v44 }
 0x1fe   : > { %1372 = vmatmul.bf16.vlgmr.msrb.gmra.mxu2 %v828_v45  ;;  %1586 = vmatmul.bf16.vlgmr.msra.gmra.mxu0 %v828_v45 }
 0x26a   : > { %v1243_v46 = vpop.f32.mrf.mxu1 }
 0x26b   : > { %v1159_v3 = vpop.f32.mrf.mxu0  ;;  %v1244_v47 = vadd.f32 %v5408_v59, %v1243_v46 }
 0x26c   : > { %v1160_v53 = vadd.f32 %v5407_v48, %v1159_v3 }
 0x26d   : > { %v1289_v60 = vpack.c.bf16 %v1244_v47, %v1244_v47 }
 0x26f   : > { %1292 = vst.msk [vmem:[#allocation3 + $0x8] sm:$0xf] %vm1077_vm14, %v1289_v60 }
 0x270   : > { %v1029_v50 = vpop.f32.mrf.mxu3 }
 0x271   : > { %v947_v51 = vpop.f32.mrf.mxu2  ;;  %v1030_v52 = vadd.f32 %v5410_v4, %v1029_v50 }
 0x272   : > { %v948_v55 = vadd.f32 %v5409_v49, %v947_v51  ;;  %v1245_v56 = vpop.f32.mrf.mxu1 }
 0x273   : > { %v1075_v57 = vpack.c.bf16 %v1030_v52, %v1030_v52  ;;  %v1161_v58 = vpop.f32.mrf.mxu0  ;;  %v1246_v61 = vadd.f32 %v5408_v59, %v1245_v56 }
 0x274   : > { %v5357_v62 = vpack.i.bf16 %v1160_v53, %v948_v55  ;;  %v1162_v6 = vadd.f32 %v5407_v48, %v1161_v58 }
 0x275   : > { %1078 = vst.msk [vmem:[#allocation3] sm:$0xf] %vm1077_vm14, %v1075_v57  ;;  %v1290_v63 = vpack.c.bf16 %v1246_v61, %v1246_v61 }
 0x276   : > { %5358 = vxpose.xlu2.b32.start [1/2] (short) (narrow) %v5357_v62, 32 }
 0x277   : > { %1293 = vst.msk [vmem:[#allocation3 + $0xc] sm:$0xf] %vm1077_vm14, %v1290_v63 }
 0x278   : > { %v1031_v1 = vpop.f32.mrf.mxu3 }
 0x279   : > { %v949_v2 = vpop.f32.mrf.mxu2  ;;  %v1032_v5 = vadd.f32 %v5410_v4, %v1031_v1 }
 0x27a   : > { %v950_v54 = vadd.f32 %v5409_v49, %v949_v2  ;;  %v1671_v7 = vpop.f32.mrf.mxu1 }
 0x27b   : > { %v1076_v8 = vpack.c.bf16 %v1032_v5, %v1032_v5  ;;  %v1672_v9 = vadd.f32 %v5412_v0, %v1671_v7  ;;  %v1587_v11 = vpop.f32.mrf.mxu0 }
 0x27c   : > { %v5359_v10 = vpack.i.bf16 %v1162_v6, %v950_v54  ;;  %v1588_v19 = vadd.f32 %v5411_v14, %v1587_v11 }
 0x27d   : > { %1079 = vst.msk [vmem:[#allocation3 + $0x4] sm:$0xf] %vm1077_vm14, %v1076_v8  ;;  %v1717_v12 = vpack.c.bf16 %v1672_v9, %v1672_v9 }
 0x27e   : > { %5360 = vxpose.xlu2.b32.end [2/2] (short) (narrow) %v5359_v10, 32 }
 0x27f   : > { %1720 = vst.msk [vmem:[#allocation3 + $0x18] sm:$0xf] %vm1077_vm14, %v1717_v12 }
 0x280   : > { %v1457_v16 = vpop.f32.mrf.mxu3 }
 0x281   : > { %v1373_v17 = vpop.f32.mrf.mxu2  ;;  %v1458_v18 = vadd.f32 %v5414_v13, %v1457_v16 }
 0x282   : > { %v1374_v20 = vadd.f32 %v5413_v15, %v1373_v17  ;;  %v1673_v21 = vpop.f32.mrf.mxu1 }
 0x283   : > { %v1503_v22 = vpack.c.bf16 %v1458_v18, %v1458_v18  ;;  %v1674_v23 = vadd.f32 %v5412_v0, %v1673_v21  ;;  %v1589_v26 = vpop.f32.mrf.mxu0 }
 0x284   : > { %v5381_v24 = vpack.i.bf16 %v1588_v19, %v1374_v20  ;;  %v1590_v30 = vadd.f32 %v5411_v14, %v1589_v26 }
 0x285   : > { %1506 = vst.msk [vmem:[#allocation3 + $0x10] sm:$0xf] %vm1077_vm14, %v1503_v22  ;;  %v1718_v25 = vpack.c.bf16 %v1674_v23, %v1674_v23 }
 0x286   : > { %5382 = vxpose.xlu0.b32.start [1/2] (short) (narrow) %v5381_v24, 32 }
 0x287   : > { %1721 = vst.msk [vmem:[#allocation3 + $0x1c] sm:$0xf] %vm1077_vm14, %v1718_v25 }
 0x288   : > { %v1459_v27 = vpop.f32.mrf.mxu3 }
 0x289   : > { %v1375_v28 = vpop.f32.mrf.mxu2  ;;  %v1460_v29 = vadd.f32 %v5414_v13, %v1459_v27 }
 0x28a   : > { %v1376_v31 = vadd.f32 %v5413_v15, %v1375_v28 }
 0x28b   : > { %v1504_v32 = vpack.c.bf16 %v1460_v29, %v1460_v29 }
 0x28c   : > { %v5383_v33 = vpack.i.bf16 %v1590_v30, %v1376_v31 }
 0x28d   : > { %1507 = vst.msk [vmem:[#allocation3 + $0x14] sm:$0xf] %vm1077_vm14, %v1504_v32 }
 0x28e   : > { %5384 = vxpose.xlu0.b32.end [2/2] (short) (narrow) %v5383_v33, 32 }
 0x30f   : > { %v5361_v34 = vpop.trf.xlu2 }
 0x310   : > { %v5365_v35 = vunpack.i.h.bf16 %v5361_v34  ;;  %v5362_v36 = vunpack.i.l.bf16 %v5361_v34 }
 0x312   : > { %v1280_v37 = vpack.c.bf16 %v5365_v35, %v5365_v35  ;;  %v1066_v38 = vpack.c.bf16 %v5362_v36, %v5362_v36 }
 0x314   : > { %1285 = vst.msk [vmem:[#allocation2 + $0x10] sm:$0xf] %vm1070_vm15, %v1280_v37 }
 0x315   : > { %1071 = vst.msk [vmem:[#allocation2] sm:$0xf] %vm1070_vm15, %v1066_v38 }
 0x317   : > { %v5366_v39 = vpop.trf.xlu2 }
 0x318   : > { %v5370_v40 = vunpack.i.h.bf16 %v5366_v39  ;;  %v5367_v41 = vunpack.i.l.bf16 %v5366_v39 }
 0x31a   : > { %v1281_v42 = vpack.c.bf16 %v5370_v40, %v5370_v40  ;;  %v1067_v43 = vpack.c.bf16 %v5367_v41, %v5367_v41 }
 0x31c   : > { %1286 = vst.msk [vmem:[#allocation2 + $0x14] sm:$0xf] %vm1070_vm15, %v1281_v42 }
 0x31d   : > { %1072 = vst.msk [vmem:[#allocation2 + $0x4] sm:$0xf] %vm1070_vm15, %v1067_v43 }
 0x31f   : > { %v5371_v44 = vpop.trf.xlu2 }
 0x320   : > { %v5375_v45 = vunpack.i.h.bf16 %v5371_v44  ;;  %v5372_v59 = vunpack.i.l.bf16 %v5371_v44 }
 0x322   : > { %v1282_v46 = vpack.c.bf16 %v5375_v45, %v5375_v45  ;;  %v1068_v3 = vpack.c.bf16 %v5372_v59, %v5372_v59 }
 0x324   : > { %1287 = vst.msk [vmem:[#allocation2 + $0x18] sm:$0xf] %vm1070_vm15, %v1282_v46 }
 0x325   : > { %1073 = vst.msk [vmem:[#allocation2 + $0x8] sm:$0xf] %vm1070_vm15, %v1068_v3 }
 0x327   : > { %v5376_v47 = vpop.trf.xlu2 }
 0x328   : > { %v5380_v60 = vunpack.i.h.bf16 %v5376_v47  ;;  %v5377_v4 = vunpack.i.l.bf16 %v5376_v47 }
 0x32a   : > { %v5385_v48 = vpop.trf.xlu0  ;;  %v1283_v49 = vpack.c.bf16 %v5380_v60, %v5380_v60  ;;  %v1069_v50 = vpack.c.bf16 %v5377_v4, %v5377_v4 }
 0x32b   : > { %v5389_v51 = vunpack.i.h.bf16 %v5385_v48  ;;  %v5386_v52 = vunpack.i.l.bf16 %v5385_v48 }
 0x32c   : > { %1288 = vst.msk [vmem:[#allocation2 + $0x1c] sm:$0xf] %vm1070_vm15, %v1283_v49 }
 0x32d   : > { %v1708_v53 = vpack.c.bf16 %v5389_v51, %v5389_v51  ;;  %v1494_v55 = vpack.c.bf16 %v5386_v52, %v5386_v52  ;;  %1074 = vst.msk [vmem:[#allocation2 + $0xc] sm:$0xf] %vm1070_vm15, %v1069_v50 }
 0x32f   : > { %1713 = vst.msk [vmem:[#allocation2 + $0x30] sm:$0xf] %vm1070_vm15, %v1708_v53 }
 0x330   : > { %1499 = vst.msk [vmem:[#allocation2 + $0x20] sm:$0xf] %vm1070_vm15, %v1494_v55 }
 0x332   : > { %v5390_v56 = vpop.trf.xlu0 }
 0x333   : > { %v5394_v57 = vunpack.i.h.bf16 %v5390_v56  ;;  %v5391_v58 = vunpack.i.l.bf16 %v5390_v56 }
 0x335   : > { %v1709_v61 = vpack.c.bf16 %v5394_v57, %v5394_v57  ;;  %v1495_v62 = vpack.c.bf16 %v5391_v58, %v5391_v58 }
 0x337   : > { %1714 = vst.msk [vmem:[#allocation2 + $0x34] sm:$0xf] %vm1070_vm15, %v1709_v61 }
 0x338   : > { %1500 = vst.msk [vmem:[#allocation2 + $0x24] sm:$0xf] %vm1070_vm15, %v1495_v62 }
 0x33a   : > { %v5395_v63 = vpop.trf.xlu0 }
 0x33b   : > { %v5399_v0 = vunpack.i.h.bf16 %v5395_v63  ;;  %v5396_v1 = vunpack.i.l.bf16 %v5395_v63 }
 0x33d   : > { %v1710_v2 = vpack.c.bf16 %v5399_v0, %v5399_v0  ;;  %v1496_v5 = vpack.c.bf16 %v5396_v1, %v5396_v1 }
 0x33f   : > { %1715 = vst.msk [vmem:[#allocation2 + $0x38] sm:$0xf] %vm1070_vm15, %v1710_v2 }
 0x340   : > { %1501 = vst.msk [vmem:[#allocation2 + $0x28] sm:$0xf] %vm1070_vm15, %v1496_v5 }
 0x342   : > { %v5400_v6 = vpop.trf.xlu0 }
 0x343   : > { %v5404_v54 = vunpack.i.h.bf16 %v5400_v6  ;;  %v5401_v7 = vunpack.i.l.bf16 %v5400_v6 }
 0x345   : > { %v1711_v8 = vpack.c.bf16 %v5404_v54, %v5404_v54  ;;  %v1497_v9 = vpack.c.bf16 %v5401_v7, %v5401_v7 }
 0x347   : > { %1716 = vst.msk [vmem:[#allocation2 + $0x3c] sm:$0xf] %vm1070_vm15, %v1711_v8 }
 0x348   : > { %1502 = vst.msk [vmem:[#allocation2 + $0x2c] sm:$0xf] %vm1070_vm15, %v1497_v9 }
 0x349 PF: > { %v5242_v10 = vld [vmem:[%s5982_s0] sm:$0xff]   ;;  %v5273_v13 = vld [vmem:[%s5982_s0 + $0x8] sm:$0xff]   ;;  %v5274_v16 = vld [vmem:[%s5982_s0 + $0x10] sm:$0xff]   ;;  %s7550_s20 = sld [smem:[#allocation18_spill]]  ;;  %vm1939_vm0 = vcmask 261120   ;;  %vm2013_vm1 = vcmask 130048  }
 0x34a   : > { %v5243_v11 = vunpack.c.l.bf16 %v5242_v10  ;;  %v5244_v12 = vunpack.c.h.bf16 %v5242_v10  ;;  %v5247_v14 = vunpack.c.l.bf16 %v5273_v13  ;;  %v5248_v15 = vunpack.c.h.bf16 %v5273_v13  ;;  %v5275_v19 = vld [vmem:[%s5982_s0 + $0x18] sm:$0xff]   ;;  %v5276_v22 = vld [vmem:[%s5982_s0 + $0x20] sm:$0xff]   ;;  %v5277_v25 = vld [vmem:[%s5982_s0 + $0x28] sm:$0xff]   ;;  %s7553_s29 = sld [smem:[#allocation20_spill]]  ;;  %s5108_s18 = sshll.u32 %s5765_s21, 4 }
 0x34b   : > { %v5251_v17 = vunpack.c.l.bf16 %v5274_v16  ;;  %v5252_v18 = vunpack.c.h.bf16 %v5274_v16  ;;  %v5255_v20 = vunpack.c.l.bf16 %v5275_v19  ;;  %v5256_v21 = vunpack.c.h.bf16 %v5275_v19  ;;  %v5196_v28 = vld [vmem:[%s7507_s7 + $0x38] sm:$0xff]  ;;  %v5278_v29 = vld [vmem:[%s5982_s0 + $0x30] sm:$0xff]   ;;  %v5194_v32 = vld [vmem:[%s7507_s7 + $0x28] sm:$0xff]  ;;  %s5109_s16 = sshll.u32 %s5769_s22, 5  ;;  %s7554_s23 = sld [smem:[#allocation21_spill]] }
 0x34c   : > { %1754 = vxpose.xlu0.b32.start [1/16] %v5243_v11, 128  ;;  %v5259_v23 = vunpack.c.l.bf16 %v5276_v22  ;;  %v5260_v24 = vunpack.c.h.bf16 %v5276_v22  ;;  %v5263_v26 = vunpack.c.l.bf16 %v5277_v25  ;;  %v5264_v27 = vunpack.c.h.bf16 %v5277_v25  ;;  %1866 = vmatpush.bf16.msra.mxu0 %v5196_v28  ;;  %v5195_v30 = vld [vmem:[%s7507_s7 + $0x30] sm:$0xff]  ;;  %v5193_v33 = vld [vmem:[%s7507_s7 + $0x20] sm:$0xff]  ;;  %v5192_v35 = vld [vmem:[%s7507_s7 + $0x18] sm:$0xff]  ;;  %s4211_s27 = sadd.s32 %s5109_s16, %s5108_s18  ;;  %s4214_s26 = sshll.u32 %s5984_s24, 4  ;;  %s4215_s26 = int_to_ptr.vmem [resolvable:$true] %s4214_s26 }
 0x34d   : > { %v5267_v31 = vunpack.c.l.bf16 %v5278_v29  ;;  %v5268_v34 = vunpack.c.h.bf16 %v5278_v29  ;;  %v5279_v36 = vld [vmem:[%s5982_s0 + $0x38] sm:$0xff]   ;;  %v5191_v37 = vld [vmem:[%s7507_s7 + $0x10] sm:$0xff]  ;;  %v5190_v40 = vld [vmem:[%s7507_s7 + $0x8] sm:$0xff]  ;;  %s7552_s0 = sld [smem:[#allocation19_spill]]  ;;  %s5110_s13 = sshll.u32 %s4211_s27, 3 }
 0x34e   : > { %v5271_v38 = vunpack.c.l.bf16 %v5279_v36  ;;  %v5272_v39 = vunpack.c.h.bf16 %v5279_v36  ;;  %v5189_v41 = vld [vmem:[%s7507_s7] sm:$0xff]  ;;  %v5198_v57 = vld [vmem:[#allocation2 + $0x8] sm:$0xff]  ;;  %s4200_s22 = scalar_lea.sflag [#allocation6], %s5970_s15 }
 0x34f   : > { %1970 = vmatpush.bf16.msra.mxu1 %v5198_v57  ;;  %v5197_v61 = vld [vmem:[#allocation2] sm:$0xff]  ;;  %s7551_s14 = smov %s7550_s20 }
 0x350   : > { %1867 = vmatpush.bf16.msra.mxu0 %v5195_v30  ;;  %v5425_v6 = vld [vmem:[%s7550_s20] ss:$0 sm:$0xff] }
 0x351   : > { %s7555_s30 = smov %s7554_s23  ;;  %s4213_s20 = scalar_lea.hbm %s7554_s23, %s5110_s13 }
 0x352   : > { %s4216_s21 = sshll.u32 %s4213_s20, 4  ;;  %s5707_s28 = scalar_lea.hbm %s7555_s30, 512  ;;  %s4217_s21 = int_to_ptr.hbm [resolvable:$true] %s4216_s21 }
 0x353   : > { %1971 = vmatpush.bf16.msra.mxu1 %v5197_v61  ;;  %s5701_s18 = sshra.s32 %s4217_s21, 4  ;;  %s5702_s18 = int_to_ptr.hbm [resolvable:$true] %s5701_s18 }
 0x354   : > { %1755 = vxpose.xlu0.b32.cont [2/16] %v5244_v12, 128  ;;  %1868 = vmatpush.bf16.msra.mxu0 %v5194_v32  ;;  %s5703_s16 = scalar_lea.hbm %s5702_s18, 128  ;;  %p5708_p6 = scmp.lt.s32.totalorder %s5702_s18, %s7555_s30 }
 0x355   : > { %p5704_p3 = scmp.ne.s32.totalorder %s5702_s18, %s5703_s16  ;;  %p5709_p7 = scmp.lt.s32.totalorder %s5707_s28, %s5703_s16 }
 0x357   : > { %p5705_p4 = pnand %p5704_p3, %p5926_p8  ;;  %p5710_p10 = por %p5709_p7, %p5708_p6 }
 0x358   : > { %1869 = vmatpush.bf16.msra.mxu0 %v5193_v33 }
 0x359   : > { %p5706_p5 = pneg %p5705_p4 }
 0x35b   : > { %p5711_p11 = pnand %p5710_p10, %p5706_p5 }
 0x35c   : > { %1756 = vxpose.xlu0.b32.cont [3/16] %v5247_v14, 128  ;;  %1870 = vmatpush.bf16.msra.mxu0 %v5192_v35 }
 0x360   : > { %1871 = vmatpush.bf16.msra.mxu0 %v5191_v37 }
 0x364   : > { %1757 = vxpose.xlu0.b32.cont [4/16] %v5248_v15, 128  ;;  %1872 = vmatpush.bf16.msra.mxu0 %v5190_v40 }
 0x368   : > { %1873 = vmatpush.bf16.msra.mxu0 %v5189_v41 }
 0x36c   : > { %1758 = vxpose.xlu0.b32.cont [5/16] %v5251_v17, 128 }
 0x374   : > { %1759 = vxpose.xlu0.b32.cont [6/16] %v5252_v18, 128 }
 0x37c   : > { %1760 = vxpose.xlu0.b32.cont [7/16] %v5255_v20, 128 }
 0x384   : > { %1761 = vxpose.xlu0.b32.cont [8/16] %v5256_v21, 128 }
 0x38c   : > { %1762 = vxpose.xlu0.b32.cont [9/16] %v5259_v23, 128 }
 0x394   : > { %1763 = vxpose.xlu0.b32.cont [10/16] %v5260_v24, 128 }
 0x39c   : > { %1764 = vxpose.xlu0.b32.cont [11/16] %v5263_v26, 128 }
 0x3a4   : > { %1765 = vxpose.xlu0.b32.cont [12/16] %v5264_v27, 128 }
 0x3ac   : > { %1766 = vxpose.xlu0.b32.cont [13/16] %v5267_v31, 128 }
 0x3b4   : > { %1767 = vxpose.xlu0.b32.cont [14/16] %v5268_v34, 128 }
 0x3bc   : > { %1768 = vxpose.xlu0.b32.cont [15/16] %v5271_v38, 128 }
 0x3c4   : > { %1769 = vxpose.xlu0.b32.end [16/16] %v5272_v39, 128 }
 0x3f0   : > { %v1770_v42 = vpop.trf.xlu0 }
 0x3f8   : > { %v1771_v43 = vpop.trf.xlu0 }
 0x3f9   : > { %v6342_v44 = vpack.c.bf16 %v1771_v43, %v1770_v42 }
 0x3fb   : > { %1874 = vmatmul.bf16.vlgmr.msra.gmra.mxu0 %v6342_v44 }
 0x400   : > { %v1772_v45 = vpop.trf.xlu0 }
 0x408   : > { %v1773_v59 = vpop.trf.xlu0 }
 0x409   : > { %v6345_v46 = vpack.c.bf16 %v1773_v59, %v1772_v45 }
 0x40b   : > { %1879 = vmatmul.bf16.gmra.mxu0 %v6345_v46 }
 0x410   : > { %v1774_v3 = vpop.trf.xlu0 }
 0x418   : > { %v1775_v47 = vpop.trf.xlu0 }
 0x419   : > { %v6348_v60 = vpack.c.bf16 %v1775_v47, %v1774_v3 }
 0x41b   : > { %1884 = vmatmul.bf16.gmra.mxu0 %v6348_v60 }
 0x420   : > { %v1776_v4 = vpop.trf.xlu0 }
 0x428   : > { %v1777_v48 = vpop.trf.xlu0 }
 0x429   : > { %v6351_v49 = vpack.c.bf16 %v1777_v48, %v1776_v4 }
 0x42b   : > { %1889 = vmatmul.bf16.gmra.mxu0 %v6351_v49 }
 0x430   : > { %v1778_v50 = vpop.trf.xlu0 }
 0x438   : > { %v1779_v51 = vpop.trf.xlu0 }
 0x439   : > { %v6354_v52 = vpack.c.bf16 %v1779_v51, %v1778_v50 }
 0x43b   : > { %1894 = vmatmul.bf16.gmra.mxu0 %v6354_v52 }
 0x440   : > { %v1780_v53 = vpop.trf.xlu0 }
 0x448   : > { %v1781_v55 = vpop.trf.xlu0 }
 0x449   : > { %v6357_v56 = vpack.c.bf16 %v1781_v55, %v1780_v53 }
 0x44b   : > { %1899 = vmatmul.bf16.gmra.mxu0 %v6357_v56 }
 0x450   : > { %v1782_v58 = vpop.trf.xlu0 }
 0x458   : > { %v1783_v62 = vpop.trf.xlu0 }
 0x459   : > { %v6360_v63 = vpack.c.bf16 %v1783_v62, %v1782_v58 }
 0x45b   : > { %1904 = vmatmul.bf16.gmra.mxu0 %v6360_v63 }
 0x460   : > { %v1784_v0 = vpop.trf.xlu0 }
 0x468   : > { %v1785_v2 = vpop.trf.xlu0 }
 0x469   : > { %v6363_v5 = vpack.c.bf16 %v1785_v2, %v1784_v0 }
 0x46b   : > { %1909 = vmatmul.bf16.gmra.mxu0 %v6363_v5 }
 0x478   : > { %v1875_v1 = vpop.f32.mrf.mxu0 }
 0x479   : > { %v1876_v7 = vadd.f32 %v5425_v6, %v1875_v1 }
 0x480   : > { %v1877_v54 = vpop.f32.mrf.mxu0 }
 0x481   : > { %v1878_v8 = vadd.f32 %v5425_v6, %v1877_v54 }
 0x483   : > { %v1915_v9 = vpack.c.bf16 %v1878_v8, %v1876_v7 }
 0x485   : > { %4780 = vmatmul.msk.bf16.vlgmr.msra.gmra.mxu1 %vm1939_vm0, %v1915_v9 }
 0x488   : > { %v1880_v10 = vpop.f32.mrf.mxu0 }
 0x489   : > { %v1881_v12 = vadd.f32 %v5425_v6, %v1880_v10 }
 0x490   : > { %v1882_v11 = vpop.f32.mrf.mxu0 }
 0x491   : > { %v1883_v13 = vadd.f32 %v5425_v6, %v1882_v11 }
 0x493   : > { %v1916_v14 = vpack.c.bf16 %v1883_v13, %v1881_v12 }
 0x495   : > { %4781 = vmatmul.msk.bf16.gmra.mxu1 %vm1939_vm0, %v1916_v14 }
 0x498   : > { %v1885_v15 = vpop.f32.mrf.mxu0 }
 0x499   : > { %v1886_v17 = vadd.f32 %v5425_v6, %v1885_v15 }
 0x4a0   : > { %v1887_v16 = vpop.f32.mrf.mxu0 }
 0x4a1   : > { %v1888_v18 = vadd.f32 %v5425_v6, %v1887_v16 }
 0x4a3   : > { %v1917_v19 = vpack.c.bf16 %v1888_v18, %v1886_v17 }
 0x4a5   : > { %4782 = vmatmul.msk.bf16.gmra.mxu1 %vm1939_vm0, %v1917_v19 }
 0x4a8   : > { %v1890_v20 = vpop.f32.mrf.mxu0 }
 0x4a9   : > { %v1891_v22 = vadd.f32 %v5425_v6, %v1890_v20 }
 0x4b0   : > { %v1892_v21 = vpop.f32.mrf.mxu0 }
 0x4b1   : > { %v1893_v23 = vadd.f32 %v5425_v6, %v1892_v21 }
 0x4b3   : > { %v1918_v24 = vpack.c.bf16 %v1893_v23, %v1891_v22 }
 0x4b5   : > { %4783 = vmatmul.msk.bf16.gmra.mxu1 %vm1939_vm0, %v1918_v24 }
 0x4b8   : > { %v1895_v25 = vpop.f32.mrf.mxu0 }
 0x4b9   : > { %v1896_v26 = vadd.f32 %v5425_v6, %v1895_v25 }
 0x4c0   : > { %v1897_v27 = vpop.f32.mrf.mxu0 }
 0x4c1   : > { %v1898_v28 = vadd.f32 %v5425_v6, %v1897_v27 }
 0x4c3   : > { %v1919_v29 = vpack.c.bf16 %v1898_v28, %v1896_v26 }
 0x4c5   : > { %4784 = vmatmul.msk.bf16.gmra.mxu1 %vm1939_vm0, %v1919_v29 }
 0x4c8   : > { %v1900_v30 = vpop.f32.mrf.mxu0 }
 0x4c9   : > { %v1901_v31 = vadd.f32 %v5425_v6, %v1900_v30 }
 0x4d0   : > { %v1902_v32 = vpop.f32.mrf.mxu0 }
 0x4d1   : > { %v1903_v33 = vadd.f32 %v5425_v6, %v1902_v32 }
 0x4d3   : > { %v1920_v34 = vpack.c.bf16 %v1903_v33, %v1901_v31 }
 0x4d5   : > { %4785 = vmatmul.msk.bf16.gmra.mxu1 %vm1939_vm0, %v1920_v34 }
 0x4d8   : > { %v1905_v35 = vpop.f32.mrf.mxu0 }
 0x4d9   : > { %v1906_v36 = vadd.f32 %v5425_v6, %v1905_v35 }
 0x4e0   : > { %v1907_v37 = vpop.f32.mrf.mxu0 }
 0x4e1   : > { %v1908_v38 = vadd.f32 %v5425_v6, %v1907_v37 }
 0x4e3   : > { %v1921_v39 = vpack.c.bf16 %v1908_v38, %v1906_v36 }
 0x4e5   : > { %4786 = vmatmul.msk.bf16.gmra.mxu1 %vm1939_vm0, %v1921_v39 }
 0x4e8   : > { %v1910_v40 = vpop.f32.mrf.mxu0 }
 0x4e9   : > { %v1911_v41 = vadd.f32 %v5425_v6, %v1910_v40 }
 0x4f0   : > { %v1912_v42 = vpop.f32.mrf.mxu0 }
 0x4f1   : > { %v1913_v43 = vadd.f32 %v5425_v6, %v1912_v42 }
 0x4f3   : > { %v1922_v3 = vpack.c.bf16 %v1913_v43, %v1911_v41 }
 0x4f5   : > { %4787 = vmatmul.msk.bf16.gmra.mxu1 %vm1939_vm0, %v1922_v3 }
 0x502   : > { %v1973_v45 = vpop.f32.mrf.mxu1 }
 0x503   : > { %v2014_v59 = vsel %vm2013_vm1, %v1973_v45, -inf }
 0x504   : > { %2015 = vmax.xlane.f32.xlu1 %v2014_v59 }
 0x50a   : > { %v1975_v47 = vpop.f32.mrf.mxu1 }
 0x50b   : > { %v2017_v4 = vsel %vm2013_vm1, %v1975_v47, -inf }
 0x50c   : > { %2018 = vmax.xlane.f32.xlu1 %v2017_v4 }
 0x512   : > { %v1978_v48 = vpop.f32.mrf.mxu1 }
 0x513   : > { %v2020_v50 = vsel %vm2013_vm1, %v1978_v48, -inf }
 0x514   : > { %2021 = vmax.xlane.f32.xlu2 %v2020_v50 }
 0x51a   : > { %v1980_v51 = vpop.f32.mrf.mxu1 }
 0x51b   : > { %v2023_v53 = vsel %vm2013_vm1, %v1980_v51, -inf }
 0x51c   : > { %2024 = vmax.xlane.f32.xlu2 %v2023_v53 }
 0x522   : > { %v1983_v55 = vpop.f32.mrf.mxu1 }
 0x523   : > { %v2026_v57 = vsel %vm2013_vm1, %v1983_v55, -inf }
 0x524   : > { %2027 = vmax.xlane.f32.xlu1 %v2026_v57 }
 0x52a   : > { %v1985_v58 = vpop.f32.mrf.mxu1 }
 0x52b   : > { %v2029_v61 = vsel %vm2013_vm1, %v1985_v58, -inf }
 0x52c   : > { %2030 = vmax.xlane.f32.xlu2 %v2029_v61 }
 0x532   : > { %v1988_v62 = vpop.f32.mrf.mxu1 }
 0x533   : > { %v2032_v0 = vsel %vm2013_vm1, %v1988_v62, -inf }
 0x534   : > { %2033 = vmax.xlane.f32.xlu1 %v2032_v0 }
 0x53a   : > { %v6384_v1 = vpop.f32.mrf.mxu1 }
 0x53b   : > { %v2035_v2 = vsel %vm2013_vm1, %v6384_v1, -inf }
 0x53c   : > { %2036 = vmax.xlane.f32.xlu2 %v2035_v2 }
 0x542   : > { %v6388_v7 = vpop.f32.mrf.mxu1 }
 0x543   : > { %v2038_v20 = vsel %vm2013_vm1, %v6388_v7, -inf }
 0x54a   : > { %v6394_v14 = vpop.f32.mrf.mxu1 }
 0x54b   : > { %v2041_v27 = vsel %vm2013_vm1, %v6394_v14, -inf }
 0x552   : > { %v6402_v21 = vpop.f32.mrf.mxu1 }
 0x553   : > { %v2044_v34 = vsel %vm2013_vm1, %v6402_v21, -inf }
 0x55a   : > { %v6410_v29 = vpop.f32.mrf.mxu1 }
 0x55b   : > { %v2047_v41 = vsel %vm2013_vm1, %v6410_v29, -inf }
 0x562   : > { %v6420_v38 = vpop.f32.mrf.mxu1 }
 0x56a   : > { %v6432_v4 = vpop.f32.mrf.mxu1 }
 0x56b   : > { %v2053_v57 = vsel %vm2013_vm1, %v6432_v4, -inf }
 0x577   : > { %v2016_v6 = vpop.xlane.xlu1 %2015 }
 0x578   : > { %v2062_v54 = vsub.f32 %v1973_v45, %v2016_v6  ;;  %v5199_v6 = vld [vmem:[#allocation3] sm:$0xff] }
 0x579   : > { %2237 = vmatpush.bf16.msra.mxu2 %v5199_v6 }
 0x57a   : > { %v2078_v8 = vmul.f32 1.442695, %v2062_v54 }
 0x57c   : > { %5430 = vpow2.f32 %v2078_v8 }
 0x57f   : > { %v2019_v9 = vpop.xlane.xlu1 %2018 }
 0x580   : > { %v2063_v10 = vsub.f32 %v1975_v47, %v2019_v9  ;;  %v2050_v47 = vsel %vm2013_vm1, %v6420_v38, -inf }
 0x582   : > { %v6390_v11 = vpop.eup %5430  ;;  %v2080_v12 = vmul.f32 1.442695, %v2063_v10 }
 0x583   : > { %v2110_v13 = vsel %vm2013_vm1, %v6390_v11, 0.0 }
 0x584   : > { %5432 = vpow2.f32 %v2080_v12  ;;  %2111 = vadd.xlane.f32.xlu1 %v2110_v13 }
 0x587   : > { %v2022_v15 = vpop.xlane.xlu2 %2021 }
 0x588   : > { %v2064_v16 = vsub.f32 %v1978_v48, %v2022_v15 }
 0x58a   : > { %v6396_v17 = vpop.eup %5432  ;;  %v2082_v18 = vmul.f32 1.442695, %v2064_v16 }
 0x58b   : > { %v2113_v19 = vsel %vm2013_vm1, %v6396_v17, 0.0 }
 0x58c   : > { %5434 = vpow2.f32 %v2082_v18  ;;  %2114 = vadd.xlane.f32.xlu2 %v2113_v19  ;;  %2039 = vmax.xlane.f32.xlu1 %v2038_v20 }
 0x58f   : > { %v2025_v22 = vpop.xlane.xlu2 %2024 }
 0x590   : > { %v2065_v23 = vsub.f32 %v1980_v51, %v2025_v22 }
 0x592   : > { %v6404_v24 = vpop.eup %5434  ;;  %v2084_v25 = vmul.f32 1.442695, %v2065_v23 }
 0x593   : > { %v2116_v26 = vsel %vm2013_vm1, %v6404_v24, 0.0 }
 0x594   : > { %5436 = vpow2.f32 %v2084_v25  ;;  %2117 = vadd.xlane.f32.xlu1 %v2116_v26  ;;  %2042 = vmax.xlane.f32.xlu2 %v2041_v27 }
 0x597   : > { %v2028_v28 = vpop.xlane.xlu1 %2027 }
 0x598   : > { %v2066_v30 = vsub.f32 %v1983_v55, %v2028_v28 }
 0x59a   : > { %v6412_v31 = vpop.eup %5436  ;;  %v2086_v32 = vmul.f32 1.442695, %v2066_v30 }
 0x59b   : > { %v2119_v33 = vsel %vm2013_vm1, %v6412_v31, 0.0 }
 0x59c   : > { %5438 = vpow2.f32 %v2086_v32  ;;  %2120 = vadd.xlane.f32.xlu2 %v2119_v33  ;;  %2045 = vmax.xlane.f32.xlu1 %v2044_v34 }
 0x59f   : > { %v2031_v35 = vpop.xlane.xlu2 %2030 }
 0x5a0   : > { %v2067_v36 = vsub.f32 %v1985_v58, %v2031_v35  ;;  %v6441_v58 = vpop.f32.mrf.mxu1 }
 0x5a1   : > { %v2056_v0 = vsel %vm2013_vm1, %v6441_v58, -inf }
 0x5a2   : > { %v6418_v37 = vpop.eup %5438  ;;  %v2088_v39 = vmul.f32 1.442695, %v2067_v36 }
 0x5a3   : > { %v2122_v40 = vsel %vm2013_vm1, %v6418_v37, 0.0 }
 0x5a4   : > { %5440 = vpow2.f32 %v2088_v39  ;;  %2123 = vadd.xlane.f32.xlu1 %v2122_v40  ;;  %2048 = vmax.xlane.f32.xlu2 %v2047_v41 }
 0x5a7   : > { %v2034_v42 = vpop.xlane.xlu1 %2033 }
 0x5a8   : > { %v2068_v43 = vsub.f32 %v1988_v62, %v2034_v42 }
 0x5aa   : > { %v6426_v45 = vpop.eup %5440  ;;  %v2090_v59 = vmul.f32 1.442695, %v2068_v43 }
 0x5ab   : > { %v2125_v3 = vsel %vm2013_vm1, %v6426_v45, 0.0 }
 0x5ac   : > { %5442 = vpow2.f32 %v2090_v59  ;;  %2126 = vadd.xlane.f32.xlu2 %v2125_v3  ;;  %2051 = vmax.xlane.f32.xlu1 %v2050_v47 }
 0x5af   : > { %v2037_v48 = vpop.xlane.xlu2 %2036 }
 0x5b0   : > { %v2069_v50 = vsub.f32 %v6384_v1, %v2037_v48  ;;  %v6449_v1 = vpop.f32.mrf.mxu1 }
 0x5b1   : > { %v2059_v2 = vsel %vm2013_vm1, %v6449_v1, -inf }
 0x5b2   : > { %v6435_v51 = vpop.eup %5442  ;;  %v2092_v53 = vmul.f32 1.442695, %v2069_v50  ;;  %v5209_v50 = vld [vmem:[%s7507_s7 + $0x78] sm:$0xff] }
 0x5b3   : > { %v2128_v55 = vsel %vm2013_vm1, %v6435_v51, 0.0  ;;  %2462 = vmatpush.bf16.msrb.mxu2 %v5209_v50 }
 0x5b4   : > { %5444 = vpow2.f32 %v2092_v53  ;;  %2129 = vadd.xlane.f32.xlu1 %v2128_v55  ;;  %2054 = vmax.xlane.f32.xlu2 %v2053_v57  ;;  %v5208_v55 = vld [vmem:[%s7507_s7 + $0x70] sm:$0xff] }
 0x5b7   : > { %2463 = vmatpush.bf16.msrb.mxu2 %v5208_v55  ;;  %v5202_v55 = vld [vmem:[%s7507_s7 + $0x40] sm:$0xff] }
 0x5ba   : > { %v6443_v61 = vpop.eup %5444 }
 0x5bb   : > { %v2131_v62 = vsel %vm2013_vm1, %v6443_v61, 0.0 }
 0x5bc   : > { %2132 = vadd.xlane.f32.xlu2 %v2131_v62  ;;  %2057 = vmax.xlane.f32.xlu1 %v2056_v0 }
 0x5c4   : > { %2060 = vmax.xlane.f32.xlu2 %v2059_v2 }
 0x5f7   : > { %v2112_v54 = vpop.xlane.xlu1 %2111 }
 0x5f8   : > { %5446 = vrcp.f32 %v2112_v54 }
 0x5fe   : > { %v5447_v13 = vpop.eup %5446 }
 0x5ff   : > { %v2115_v8 = vpop.xlane.xlu2 %2114  ;;  %v2040_v9 = vpop.xlane.xlu1 %2039  ;;  %v2174_v19 = vmul.f32 %v5447_v13, %v6390_v11 }
 0x600   : > { %5448 = vrcp.f32 %v2115_v8  ;;  %v2070_v10 = vsub.f32 %v6388_v7, %v2040_v9  ;;  %v5207_v9 = vld [vmem:[%s7507_s7 + $0x68] sm:$0xff] }
 0x601   : > { %2464 = vmatpush.bf16.msrb.mxu2 %v5207_v9 }
 0x602   : > { %v2094_v12 = vmul.f32 1.442695, %v2070_v10 }
 0x604   : > { %5450 = vpow2.f32 %v2094_v12 }
 0x606   : > { %v5449_v15 = vpop.eup %5448 }
 0x607   : > { %v2118_v16 = vpop.xlane.xlu1 %2117  ;;  %v2043_v18 = vpop.xlane.xlu2 %2042  ;;  %v2175_v20 = vmul.f32 %v5449_v15, %v6396_v17 }
 0x608   : > { %v2071_v22 = vsub.f32 %v6394_v14, %v2043_v18 }
 0x609   : > { %v2190_v23 = vpack.c.bf16 %v2175_v20, %v2174_v19 }
 0x60a   : > { %v6457_v25 = vpop.eup %5450  ;;  %v2096_v26 = vmul.f32 1.442695, %v2071_v22 }
 0x60b   : > { %4792 = vmatmul.msk.bf16.vlgmr.msra.gmra.mxu2 %vm2013_vm1, %v2190_v23  ;;  %v2134_v7 = vsel %vm2013_vm1, %v6457_v25, 0.0 }
 0x60c   : > { %5452 = vpow2.f32 %v2096_v26  ;;  %2135 = vadd.xlane.f32.xlu1 %v2134_v7 }
 0x60d   : > { %5454 = vrcp.f32 %v2118_v16 }
 0x60f   : > { %v2121_v27 = vpop.xlane.xlu2 %2120  ;;  %v2046_v28 = vpop.xlane.xlu1 %2045 }
 0x610   : > { %5456 = vrcp.f32 %v2121_v27  ;;  %v2072_v11 = vsub.f32 %v6402_v21, %v2046_v28 }
 0x612   : > { %v6463_v17 = vpop.eup %5452  ;;  %v2098_v14 = vmul.f32 1.442695, %v2072_v11  ;;  %v5205_v11 = vld [vmem:[%s7507_s7 + $0x58] sm:$0xff] }
 0x613   : > { %v2137_v30 = vsel %vm2013_vm1, %v6463_v17, 0.0  ;;  %v5455_v32 = vpop.eup %5454 }
 0x614   : > { %5458 = vpow2.f32 %v2098_v14  ;;  %2138 = vadd.xlane.f32.xlu2 %v2137_v30  ;;  %v2176_v36 = vmul.f32 %v5455_v32, %v6404_v24  ;;  %v5200_v14 = vld [vmem:[%s7552_s0] sm:$0xff]  ;;  %v5204_v32 = vld [vmem:[%s7507_s7 + $0x50] sm:$0xff] }
 0x616   : > { %v5457_v33 = vpop.eup %5456 }
 0x617   : > { %v2124_v34 = vpop.xlane.xlu1 %2123  ;;  %v2049_v35 = vpop.xlane.xlu2 %2048  ;;  %v2177_v39 = vmul.f32 %v5457_v33, %v6412_v31 }
 0x618   : > { %v2073_v40 = vsub.f32 %v6410_v29, %v2049_v35 }
 0x619   : > { %v2191_v41 = vpack.c.bf16 %v2177_v39, %v2176_v36 }
 0x61a   : > { %v6470_v21 = vpop.eup %5458  ;;  %v2100_v42 = vmul.f32 1.442695, %v2073_v40 }
 0x61b   : > { %4793 = vmatmul.msk.bf16.gmra.mxu2 %vm2013_vm1, %v2191_v41  ;;  %v2140_v43 = vsel %vm2013_vm1, %v6470_v21, 0.0 }
 0x61c   : > { %5460 = vpow2.f32 %v2100_v42  ;;  %2141 = vadd.xlane.f32.xlu1 %v2140_v43  ;;  %v5203_v43 = vld [vmem:[%s7507_s7 + $0x48] sm:$0xff] }
 0x61d   : > { %5462 = vrcp.f32 %v2124_v34 }
 0x61f   : > { %v2127_v59 = vpop.xlane.xlu2 %2126  ;;  %v2052_v3 = vpop.xlane.xlu1 %2051 }
 0x620   : > { %5464 = vrcp.f32 %v2127_v59  ;;  %v2074_v24 = vsub.f32 %v6420_v38, %v2052_v3 }
 0x622   : > { %v6476_v31 = vpop.eup %5460  ;;  %v2102_v29 = vmul.f32 1.442695, %v2074_v24 }
 0x623   : > { %v2143_v47 = vsel %vm2013_vm1, %v6476_v31, 0.0  ;;  %v5463_v48 = vpop.eup %5462 }
 0x624   : > { %5466 = vpow2.f32 %v2102_v29  ;;  %2144 = vadd.xlane.f32.xlu2 %v2143_v47  ;;  %v2178_v62 = vmul.f32 %v5463_v48, %v6418_v37 }
 0x626   : > { %v5465_v53 = vpop.eup %5464 }
 0x627   : > { %v2130_v38 = vpop.xlane.xlu1 %2129  ;;  %v2055_v57 = vpop.xlane.xlu2 %2054  ;;  %v2179_v0 = vmul.f32 %v5465_v53, %v6426_v45 }
 0x628   : > { %v2075_v2 = vsub.f32 %v6432_v4, %v2055_v57 }
 0x629   : > { %v2192_v6 = vpack.c.bf16 %v2179_v0, %v2178_v62 }
 0x62a   : > { %v6489_v54 = vpop.eup %5466  ;;  %v2104_v8 = vmul.f32 1.442695, %v2075_v2 }
 0x62b   : > { %4794 = vmatmul.msk.bf16.gmra.mxu2 %vm2013_vm1, %v2192_v6  ;;  %v2146_v10 = vsel %vm2013_vm1, %v6489_v54, 0.0 }
 0x62c   : > { %5468 = vpow2.f32 %v2104_v8  ;;  %2147 = vadd.xlane.f32.xlu1 %v2146_v10 }
 0x62d   : > { %5470 = vrcp.f32 %v2130_v38 }
 0x62f   : > { %v2133_v37 = vpop.xlane.xlu2 %2132  ;;  %v2058_v45 = vpop.xlane.xlu1 %2057 }
 0x630   : > { %5472 = vrcp.f32 %v2133_v37  ;;  %v2076_v4 = vsub.f32 %v6441_v58, %v2058_v45 }
 0x632   : > { %v6498_v12 = vpop.eup %5468  ;;  %v2106_v13 = vmul.f32 1.442695, %v2076_v4 }
 0x633   : > { %v2149_v15 = vsel %vm2013_vm1, %v6498_v12, 0.0  ;;  %v5471_v16 = vpop.eup %5470 }
 0x634   : > { %5474 = vpow2.f32 %v2106_v13  ;;  %2150 = vadd.xlane.f32.xlu2 %v2149_v15  ;;  %v2180_v20 = vmul.f32 %v5471_v16, %v6435_v51 }
 0x636   : > { %v5473_v18 = vpop.eup %5472 }
 0x637   : > { %v2061_v19 = vpop.xlane.xlu2 %2060  ;;  %v2181_v22 = vmul.f32 %v5473_v18, %v6443_v61  ;;  %v5206_v61 = vld [vmem:[%s7507_s7 + $0x60] sm:$0xff] }
 0x638   : > { %v2077_v23 = vsub.f32 %v6449_v1, %v2061_v19  ;;  %2465 = vmatpush.bf16.msrb.mxu2 %v5206_v61  ;;  %v5201_v1 = vld [vmem:[%s7552_s0 + $0x8] sm:$0xff]  ;;  %v5218_v61 = vld [vmem:[%s7507_s7 + $0x98] sm:$0xff] }
 0x639   : > { %v2193_v26 = vpack.c.bf16 %v2181_v22, %v2180_v20  ;;  %2333 = vmatpush.bf16.msra.mxu3 %v5201_v1  ;;  %v5210_v22 = vld [vmem:[#allocation2 + $0x10] sm:$0xff] }
 0x63a   : > { %v6505_v7 = vpop.eup %5474  ;;  %v2108_v58 = vmul.f32 1.442695, %v2077_v23  ;;  %v5222_v23 = vld [vmem:[%s7507_s7 + $0xb8] sm:$0xff] }
 0x63b   : > { %4795 = vmatmul.msk.bf16.gmra.mxu2 %vm2013_vm1, %v2193_v26  ;;  %v2152_v27 = vsel %vm2013_vm1, %v6505_v7, 0.0 }
 0x63c   : > { %5476 = vpow2.f32 %v2108_v58  ;;  %2153 = vadd.xlane.f32.xlu1 %v2152_v27  ;;  %2466 = vmatpush.bf16.msrb.mxu2 %v5205_v11  ;;  %v5220_v58 = vld [vmem:[%s7507_s7 + $0xa8] sm:$0xff]  ;;  %v5217_v11 = vld [vmem:[%s7507_s7 + $0x90] sm:$0xff] }
 0x63d   : > { %2334 = vmatpush.bf16.msra.mxu3 %v5200_v14  ;;  %v5216_v14 = vld [vmem:[%s7507_s7 + $0x88] sm:$0xff] }
 0x640   : > { %2467 = vmatpush.bf16.msrb.mxu2 %v5204_v32  ;;  %v5215_v32 = vld [vmem:[%s7507_s7 + $0x80] sm:$0xff] }
 0x642   : > { %v6510_v28 = vpop.eup %5476 }
 0x643   : > { %v2155_v51 = vsel %vm2013_vm1, %v6510_v28, 0.0 }
 0x644   : > { %2156 = vadd.xlane.f32.xlu2 %v2155_v51  ;;  %2468 = vmatpush.bf16.msrb.mxu2 %v5203_v43  ;;  %v6591_v43 = vld [vmem:[%s7551_s14 + $0x1] ss:$0 sm:$0xff] }
 0x648   : > { %2469 = vmatpush.bf16.msrb.mxu2 %v5202_v55 }
 0x64c   : > { %3059 = vmatpush.bf16.msra.mxu2 %v5222_v23 }
 0x67f   : > { %v2136_v30 = vpop.xlane.xlu1 %2135 }
 0x680   : > { %5478 = vrcp.f32 %v2136_v30 }
 0x686   : > { %v5479_v34 = vpop.eup %5478 }
 0x687   : > { %v2139_v33 = vpop.xlane.xlu2 %2138  ;;  %v2182_v39 = vmul.f32 %v5479_v34, %v6457_v25 }
 0x688   : > { %5480 = vrcp.f32 %v2139_v33 }
 0x68e   : > { %v5481_v35 = vpop.eup %5480  ;;  %v2239_v36 = vpop.f32.mrf.mxu2 }
 0x68f   : > { %v2183_v40 = vmul.f32 %v5481_v35, %v6463_v17  ;;  %v2142_v42 = vpop.xlane.xlu1 %2141 }
 0x690   : > { %5482 = vrcp.f32 %v2142_v42 }
 0x691   : > { %v2194_v41 = vpack.c.bf16 %v2183_v40, %v2182_v39 }
 0x693   : > { %4796 = vmatmul.msk.bf16.gmra.mxu2 %vm2013_vm1, %v2194_v41 }
 0x696   : > { %v2241_v59 = vpop.f32.mrf.mxu2  ;;  %v5483_v29 = vpop.eup %5482 }
 0x697   : > { %v2279_v3 = vpack.c.bf16 %v2241_v59, %v2239_v36  ;;  %v2145_v24 = vpop.xlane.xlu2 %2144  ;;  %v2184_v17 = vmul.f32 %v5483_v29, %v6470_v21 }
 0x698   : > { %5484 = vrcp.f32 %v2145_v24 }
 0x699   : > { %4808 = vmatmul.msk.bf16.vlgmr.msra.gmra.mxu3 %vm1939_vm0, %v2279_v3 }
 0x69e   : > { %v5485_v25 = vpop.eup %5484  ;;  %v2244_v47 = vpop.f32.mrf.mxu2 }
 0x69f   : > { %v2185_v48 = vmul.f32 %v5485_v25, %v6476_v31  ;;  %v2148_v53 = vpop.xlane.xlu1 %2147 }
 0x6a0   : > { %5486 = vrcp.f32 %v2148_v53 }
 0x6a1   : > { %v2195_v50 = vpack.c.bf16 %v2185_v48, %v2184_v17 }
 0x6a3   : > { %4797 = vmatmul.msk.bf16.gmra.mxu2 %vm2013_vm1, %v2195_v50 }
 0x6a6   : > { %v2246_v38 = vpop.f32.mrf.mxu2  ;;  %v5487_v0 = vpop.eup %5486 }
 0x6a7   : > { %v2280_v57 = vpack.c.bf16 %v2246_v38, %v2244_v47  ;;  %v2151_v62 = vpop.xlane.xlu2 %2150  ;;  %v2186_v31 = vmul.f32 %v5487_v0, %v6489_v54 }
 0x6a8   : > { %5488 = vrcp.f32 %v2151_v62 }
 0x6a9   : > { %4809 = vmatmul.msk.bf16.gmra.mxu3 %vm1939_vm0, %v2280_v57 }
 0x6ae   : > { %v5489_v21 = vpop.eup %5488  ;;  %v2249_v2 = vpop.f32.mrf.mxu2 }
 0x6af   : > { %v2187_v6 = vmul.f32 %v5489_v21, %v6498_v12  ;;  %v2154_v9 = vpop.xlane.xlu1 %2153  ;;  %v5211_v12 = vld [vmem:[#allocation2 + $0x18] sm:$0xff] }
 0x6b0   : > { %5490 = vrcp.f32 %v2154_v9  ;;  %2566 = vmatpush.bf16.msrb.mxu1 %v5211_v12  ;;  %v5230_v12 = vld [vmem:[%s7507_s7 + $0xd0] sm:$0xff] }
 0x6b1   : > { %v2196_v8 = vpack.c.bf16 %v2187_v6, %v2186_v31 }
 0x6b3   : > { %4798 = vmatmul.msk.bf16.gmra.mxu2 %vm2013_vm1, %v2196_v8  ;;  %v5235_v8 = vld [vmem:[%s7507_s7 + $0xf8] sm:$0xff] }
 0x6b4   : > { %2567 = vmatpush.bf16.msrb.mxu1 %v5210_v22  ;;  %v5228_v22 = vld [vmem:[%s7507_s7 + $0xc0] sm:$0xff] }
 0x6b6   : > { %v2251_v10 = vpop.f32.mrf.mxu2  ;;  %v5491_v4 = vpop.eup %5490 }
 0x6b7   : > { %v2281_v37 = vpack.c.bf16 %v2251_v10, %v2249_v2  ;;  %v2157_v45 = vpop.xlane.xlu2 %2156  ;;  %v2188_v16 = vmul.f32 %v5491_v4, %v6505_v7  ;;  %v5221_v7 = vld [vmem:[%s7507_s7 + $0xb0] sm:$0xff]  ;;  %v5232_v4 = vld [vmem:[%s7507_s7 + $0xe0] sm:$0xff] }
 0x6b8   : > { %5492 = vrcp.f32 %v2157_v45  ;;  %3060 = vmatpush.bf16.msra.mxu2 %v5221_v7  ;;  %v5234_v10 = vld [vmem:[%s7507_s7 + $0xf0] sm:$0xff] }
 0x6b9   : > { %4810 = vmatmul.msk.bf16.gmra.mxu3 %vm1939_vm0, %v2281_v37  ;;  %v5233_v37 = vld [vmem:[%s7507_s7 + $0xe8] sm:$0xff] }
 0x6bc   : > { %3061 = vmatpush.bf16.msra.mxu2 %v5220_v58 }
 0x6be   : > { %v5493_v13 = vpop.eup %5492  ;;  %v2254_v15 = vpop.f32.mrf.mxu2 }
 0x6bf   : > { %v2189_v54 = vmul.f32 %v5493_v13, %v6510_v28  ;;  %v5219_v28 = vld [vmem:[%s7507_s7 + $0xa0] sm:$0xff] }
 0x6c0   : > { %3062 = vmatpush.bf16.msra.mxu2 %v5219_v28 }
 0x6c1   : > { %v2197_v18 = vpack.c.bf16 %v2189_v54, %v2188_v16  ;;  %v5231_v54 = vld [vmem:[%s7507_s7 + $0xd8] sm:$0xff] }
 0x6c3   : > { %4799 = vmatmul.msk.bf16.gmra.mxu2 %vm2013_vm1, %v2197_v18 }
 0x6c4   : > { %3063 = vmatpush.bf16.msra.mxu2 %v5218_v61 }
 0x6c6   : > { %v2256_v19 = vpop.f32.mrf.mxu2 }
 0x6c7   : > { %v2282_v20 = vpack.c.bf16 %v2256_v19, %v2254_v15  ;;  %v5229_v19 = vld [vmem:[%s7507_s7 + $0xc8] sm:$0xff] }
 0x6c8   : > { %3064 = vmatpush.bf16.msra.mxu2 %v5217_v11 }
 0x6c9   : > { %4811 = vmatmul.msk.bf16.gmra.mxu3 %vm1939_vm0, %v2282_v20 }
 0x6cc   : > { %3065 = vmatpush.bf16.msra.mxu2 %v5216_v14 }
 0x6d0   : > { %3066 = vmatpush.bf16.msra.mxu2 %v5215_v32 }
 0x6d3   : > { %2470 = vmatmul.bf16.vlgmr.msrb.gmra.mxu2 %v6342_v44 }
 0x6d4   : > { %3656 = vmatpush.bf16.msrb.mxu2 %v5235_v8 }
 0x6d8   : > { %3657 = vmatpush.bf16.msrb.mxu2 %v5234_v10 }
 0x6dc   : > { %3658 = vmatpush.bf16.msrb.mxu2 %v5233_v37 }
 0x6e0   : > { %3659 = vmatpush.bf16.msrb.mxu2 %v5232_v4 }
 0x6e3   : > { %2475 = vmatmul.bf16.gmra.mxu2 %v6345_v46 }
 0x6e4   : > { %3660 = vmatpush.bf16.msrb.mxu2 %v5231_v54 }
 0x6e8   : > { %3661 = vmatpush.bf16.msrb.mxu2 %v5230_v12 }
 0x6ec   : > { %3662 = vmatpush.bf16.msrb.mxu2 %v5229_v19 }
 0x6f0   : > { %3663 = vmatpush.bf16.msrb.mxu2 %v5228_v22 }
 0x6f3   : > { %2480 = vmatmul.bf16.gmra.mxu2 %v6348_v60 }
 0x703   : > { %2485 = vmatmul.bf16.gmra.mxu2 %v6351_v49 }
 0x713   : > { %2490 = vmatmul.bf16.gmra.mxu2 %v6354_v52 }
 0x716   : > { %v2259_v26 = vpop.f32.mrf.mxu2 }
 0x71e   : > { %v2261_v27 = vpop.f32.mrf.mxu2 }
 0x71f   : > { %v2283_v51 = vpack.c.bf16 %v2261_v27, %v2259_v26  ;;  %v5224_v27 = vld [vmem:[#allocation2 + $0x28] sm:$0xff] }
 0x720   : > { %3163 = vmatpush.bf16.msra.mxu1 %v5224_v27 }
 0x721   : > { %4812 = vmatmul.msk.bf16.gmra.mxu3 %vm1939_vm0, %v2283_v51  ;;  %v5223_v51 = vld [vmem:[#allocation2 + $0x20] sm:$0xff] }
 0x723   : > { %2495 = vmatmul.bf16.gmra.mxu2 %v6357_v56 }
 0x724   : > { %3164 = vmatpush.bf16.msra.mxu1 %v5223_v51  ;;  %v5237_v51 = vld [vmem:[#allocation2 + $0x38] sm:$0xff] }
 0x726   : > { %v2264_v1 = vpop.f32.mrf.mxu2 }
 0x72e   : > { %v2266_v30 = vpop.f32.mrf.mxu2 }
 0x72f   : > { %v2284_v33 = vpack.c.bf16 %v2266_v30, %v2264_v1 }
 0x731   : > { %4813 = vmatmul.msk.bf16.gmra.mxu3 %vm1939_vm0, %v2284_v33 }
 0x733   : > { %2500 = vmatmul.bf16.gmra.mxu2 %v6360_v63 }
 0x736   : > { %v2269_v34 = vpop.f32.mrf.mxu2 }
 0x73e   : > { %v2271_v35 = vpop.f32.mrf.mxu2 }
 0x73f   : > { %v2285_v36 = vpack.c.bf16 %v2271_v35, %v2269_v34 }
 0x741   : > { %4814 = vmatmul.msk.bf16.gmra.mxu3 %vm1939_vm0, %v2285_v36  ;;  %v6652_v36 = vld [vmem:[%s7551_s14 + $0x2] ss:$0 sm:$0xff] }
 0x743   : > { %2505 = vmatmul.bf16.gmra.mxu2 %v6363_v5 }
 0x746   : > { %v2274_v39 = vpop.f32.mrf.mxu2 }
 0x74e   : > { %v2276_v40 = vpop.f32.mrf.mxu2 }
 0x74f   : > { %v2286_v41 = vpack.c.bf16 %v2276_v40, %v2274_v39 }
 0x751   : > { %4815 = vmatmul.msk.bf16.gmra.mxu3 %vm1939_vm0, %v2286_v41 }
 0x753   : > { %3067 = vmatmul.bf16.vlgmr.msra.gmra.mxu2 %v6342_v44 }
 0x756   : > { %v2471_v42 = vpop.f32.mrf.mxu2 }
 0x757   : > { %v2472_v3 = vadd.f32 %v6591_v43, %v2471_v42 }
 0x75e   : > { %v2473_v59 = vpop.f32.mrf.mxu2 }
 0x75f   : > { %v2474_v24 = vadd.f32 %v6591_v43, %v2473_v59 }
 0x761   : > { %v2511_v29 = vpack.c.bf16 %v2474_v24, %v2472_v3 }
 0x763   : > { %4873 = vmatmul.msk.bf16.vlgmr.msrb.gmra.mxu1 %vm1939_vm0, %v2511_v29  ;;  %3072 = vmatmul.bf16.gmra.mxu2 %v6345_v46 }
 0x764   : > { %3760 = vmatpush.bf16.msrb.mxu1 %v5237_v51 }
 0x766   : > { %v2476_v25 = vpop.f32.mrf.mxu2 }
 0x767   : > { %v2477_v17 = vadd.f32 %v6591_v43, %v2476_v25 }
 0x76e   : > { %v2478_v47 = vpop.f32.mrf.mxu2 }
 0x76f   : > { %v2479_v48 = vadd.f32 %v6591_v43, %v2478_v47 }
 0x771   : > { %v2512_v50 = vpack.c.bf16 %v2479_v48, %v2477_v17 }
 0x773   : > { %4874 = vmatmul.msk.bf16.gmra.mxu1 %vm1939_vm0, %v2512_v50  ;;  %3077 = vmatmul.bf16.gmra.mxu2 %v6348_v60 }
 0x776   : > { %v2481_v53 = vpop.f32.mrf.mxu2 }
 0x777   : > { %v2482_v38 = vadd.f32 %v6591_v43, %v2481_v53 }
 0x77e   : > { %v2483_v55 = vpop.f32.mrf.mxu2 }
 0x77f   : > { %v2484_v57 = vadd.f32 %v6591_v43, %v2483_v55 }
 0x781   : > { %v2513_v62 = vpack.c.bf16 %v2484_v57, %v2482_v38 }
 0x783   : > { %4875 = vmatmul.msk.bf16.gmra.mxu1 %vm1939_vm0, %v2513_v62  ;;  %3082 = vmatmul.bf16.gmra.mxu2 %v6351_v49 }
 0x786   : > { %v2486_v0 = vpop.f32.mrf.mxu2 }
 0x787   : > { %v2487_v2 = vadd.f32 %v6591_v43, %v2486_v0 }
 0x78e   : > { %v2488_v21 = vpop.f32.mrf.mxu2 }
 0x78f   : > { %v2489_v31 = vadd.f32 %v6591_v43, %v2488_v21 }
 0x791   : > { %v2514_v6 = vpack.c.bf16 %v2489_v31, %v2487_v2 }
 0x793   : > { %4876 = vmatmul.msk.bf16.gmra.mxu1 %vm1939_vm0, %v2514_v6  ;;  %3087 = vmatmul.bf16.gmra.mxu2 %v6354_v52 }
 0x796   : > { %v2491_v9 = vpop.f32.mrf.mxu2 }
 0x797   : > { %v2492_v13 = vadd.f32 %v6591_v43, %v2491_v9 }
 0x79e   : > { %v2493_v45 = vpop.f32.mrf.mxu2 }
 0x79f   : > { %v2494_v15 = vadd.f32 %v6591_v43, %v2493_v45 }
 0x7a1   : > { %v2515_v16 = vpack.c.bf16 %v2494_v15, %v2492_v13 }
 0x7a3   : > { %4877 = vmatmul.msk.bf16.gmra.mxu1 %vm1939_vm0, %v2515_v16  ;;  %3092 = vmatmul.bf16.gmra.mxu2 %v6357_v56 }
 0x7a6   : > { %v2496_v18 = vpop.f32.mrf.mxu2 }
 0x7a7   : > { %v2497_v23 = vadd.f32 %v6591_v43, %v2496_v18 }
 0x7ae   : > { %v2498_v20 = vpop.f32.mrf.mxu2 }
 0x7af   : > { %v2499_v26 = vadd.f32 %v6591_v43, %v2498_v20 }
 0x7b1   : > { %v2516_v7 = vpack.c.bf16 %v2499_v26, %v2497_v23 }
 0x7b3   : > { %4878 = vmatmul.msk.bf16.gmra.mxu1 %vm1939_vm0, %v2516_v7  ;;  %3097 = vmatmul.bf16.gmra.mxu2 %v6360_v63 }
 0x7b6   : > { %v2501_v58 = vpop.f32.mrf.mxu2 }
 0x7b7   : > { %v2502_v61 = vadd.f32 %v6591_v43, %v2501_v58 }
 0x7be   : > { %v2503_v28 = vpop.f32.mrf.mxu2 }
 0x7bf   : > { %v2504_v1 = vadd.f32 %v6591_v43, %v2503_v28 }
 0x7c1   : > { %v2517_v11 = vpack.c.bf16 %v2504_v1, %v2502_v61  ;;  %v5236_v61 = vld [vmem:[#allocation2 + $0x30] sm:$0xff] }
 0x7c2   : > { %3761 = vmatpush.bf16.msrb.mxu1 %v5236_v61 }
 0x7c3   : > { %4879 = vmatmul.msk.bf16.gmra.mxu1 %vm1939_vm0, %v2517_v11  ;;  %3102 = vmatmul.bf16.gmra.mxu2 %v6363_v5 }
 0x7c6   : > { %v2506_v14 = vpop.f32.mrf.mxu2 }
 0x7c7   : > { %v2507_v32 = vadd.f32 %v6591_v43, %v2506_v14 }
 0x7ce   : > { %v2508_v30 = vpop.f32.mrf.mxu2 }
 0x7cf   : > { %v2509_v33 = vadd.f32 %v6591_v43, %v2508_v30 }
 0x7d1   : > { %v2518_v34 = vpack.c.bf16 %v2509_v33, %v2507_v32 }
 0x7d3   : > { %4880 = vmatmul.msk.bf16.gmra.mxu1 %vm1939_vm0, %v2518_v34  ;;  %3664 = vmatmul.bf16.vlgmr.msrb.gmra.mxu2 %v6342_v44 }
 0x7d6   : > { %v3068_v35 = vpop.f32.mrf.mxu2 }
 0x7d7   : > { %v3069_v40 = vadd.f32 %v6652_v36, %v3068_v35 }
 0x7de   : > { %v3070_v39 = vpop.f32.mrf.mxu2 }
 0x7df   : > { %v3071_v41 = vadd.f32 %v6652_v36, %v3070_v39 }
 0x7e0   : > { %v6656_v42 = vpop.f32.mrf.mxu1 }
 0x7e1   : > { %v3108_v59 = vpack.c.bf16 %v3071_v41, %v3069_v40  ;;  %v2609_v43 = vsel %vm2013_vm1, %v6656_v42, -inf }
 0x7e2   : > { %2610 = vmax.xlane.f32.xlu0 %v2609_v43 }
 0x7e3   : > { %4970 = vmatmul.msk.bf16.vlgmr.msra.gmra.mxu1 %vm1939_vm0, %v3108_v59  ;;  %3669 = vmatmul.bf16.gmra.mxu2 %v6345_v46 }
 0x7e6   : > { %v3073_v44 = vpop.f32.mrf.mxu2 }
 0x7e7   : > { %v3074_v25 = vadd.f32 %v6652_v36, %v3073_v44 }
 0x7e8   : > { %v6662_v3 = vpop.f32.mrf.mxu1 }
 0x7e9   : > { %v2612_v24 = vsel %vm2013_vm1, %v6662_v3, -inf }
 0x7ea   : > { %2613 = vmax.xlane.f32.xlu1 %v2612_v24 }
 0x7ee   : > { %v3075_v29 = vpop.f32.mrf.mxu2 }
 0x7ef   : > { %v3076_v47 = vadd.f32 %v6652_v36, %v3075_v29 }
 0x7f0   : > { %v6668_v17 = vpop.f32.mrf.mxu1 }
 0x7f1   : > { %v3109_v48 = vpack.c.bf16 %v3076_v47, %v3074_v25  ;;  %v2615_v50 = vsel %vm2013_vm1, %v6668_v17, -inf }
 0x7f2   : > { %2616 = vmax.xlane.f32.xlu2 %v2615_v50 }
 0x7f3   : > { %4971 = vmatmul.msk.bf16.gmra.mxu1 %vm1939_vm0, %v3109_v48  ;;  %3674 = vmatmul.bf16.gmra.mxu2 %v6348_v60 }
 0x7f6   : > { %v3078_v46 = vpop.f32.mrf.mxu2 }
 0x7f7   : > { %v3079_v57 = vadd.f32 %v6652_v36, %v3078_v46 }
 0x7f8   : > { %v6674_v53 = vpop.f32.mrf.mxu1 }
 0x7f9   : > { %v2618_v55 = vsel %vm2013_vm1, %v6674_v53, -inf }
 0x7fa   : > { %2619 = vmax.xlane.f32.xlu1 %v2618_v55 }
 0x7fe   : > { %v3080_v38 = vpop.f32.mrf.mxu2 }
 0x7ff   : > { %v3081_v62 = vadd.f32 %v6652_v36, %v3080_v38 }
 0x800   : > { %v6680_v0 = vpop.f32.mrf.mxu1 }
 0x801   : > { %v3110_v21 = vpack.c.bf16 %v3081_v62, %v3079_v57  ;;  %v2621_v2 = vsel %vm2013_vm1, %v6680_v0, -inf }
 0x802   : > { %2622 = vmax.xlane.f32.xlu2 %v2621_v2 }
 0x803   : > { %4972 = vmatmul.msk.bf16.gmra.mxu1 %vm1939_vm0, %v3110_v21  ;;  %3679 = vmatmul.bf16.gmra.mxu2 %v6351_v49 }
 0x806   : > { %v3083_v60 = vpop.f32.mrf.mxu2 }
 0x807   : > { %v3084_v9 = vadd.f32 %v6652_v36, %v3083_v60 }
 0x808   : > { %v6686_v31 = vpop.f32.mrf.mxu1 }
 0x809   : > { %v2624_v6 = vsel %vm2013_vm1, %v6686_v31, -inf }
 0x80a   : > { %2625 = vmax.xlane.f32.xlu1 %v2624_v6 }
 0x80e   : > { %v3085_v8 = vpop.f32.mrf.mxu2 }
 0x80f   : > { %v3086_v10 = vadd.f32 %v6652_v36, %v3085_v8 }
 0x810   : > { %v6692_v37 = vpop.f32.mrf.mxu1 }
 0x811   : > { %v3111_v45 = vpack.c.bf16 %v3086_v10, %v3084_v9  ;;  %v2627_v4 = vsel %vm2013_vm1, %v6692_v37, -inf }
 0x812   : > { %2628 = vmax.xlane.f32.xlu2 %v2627_v4 }
 0x813   : > { %4973 = vmatmul.msk.bf16.gmra.mxu1 %vm1939_vm0, %v3111_v45  ;;  %3684 = vmatmul.bf16.gmra.mxu2 %v6354_v52 }
 0x816   : > { %v3088_v49 = vpop.f32.mrf.mxu2 }
 0x817   : > { %v3089_v54 = vadd.f32 %v6652_v36, %v3088_v49 }
 0x818   : > { %v6698_v13 = vpop.f32.mrf.mxu1 }
 0x819   : > { %v2630_v15 = vsel %vm2013_vm1, %v6698_v13, -inf }
 0x81a   : > { %2631 = vmax.xlane.f32.xlu1 %v2630_v15 }
 0x81e   : > { %v3090_v16 = vpop.f32.mrf.mxu2 }
 0x81f   : > { %v3091_v18 = vadd.f32 %v6652_v36, %v3090_v16 }
 0x820   : > { %v6704_v12 = vpop.f32.mrf.mxu1 }
 0x821   : > { %v3112_v19 = vpack.c.bf16 %v3091_v18, %v3089_v54  ;;  %v2633_v8 = vsel %vm2013_vm1, %v6704_v12, -inf }
 0x823   : > { %4974 = vmatmul.msk.bf16.gmra.mxu1 %vm1939_vm0, %v3112_v19  ;;  %3689 = vmatmul.bf16.gmra.mxu2 %v6357_v56 }
 0x826   : > { %v3093_v52 = vpop.f32.mrf.mxu2 }
 0x827   : > { %v3094_v23 = vadd.f32 %v6652_v36, %v3093_v52 }
 0x828   : > { %v6708_v20 = vpop.f32.mrf.mxu1 }
 0x829   : > { %v2636_v19 = vsel %vm2013_vm1, %v6708_v20, -inf }
 0x82e   : > { %v3095_v22 = vpop.f32.mrf.mxu2 }
 0x82f   : > { %v3096_v26 = vadd.f32 %v6652_v36, %v3095_v22 }
 0x830   : > { %v6712_v7 = vpop.f32.mrf.mxu1 }
 0x831   : > { %v3113_v58 = vpack.c.bf16 %v3096_v26, %v3094_v23  ;;  %v2639_v51 = vsel %vm2013_vm1, %v6712_v7, -inf }
 0x833   : > { %4975 = vmatmul.msk.bf16.gmra.mxu1 %vm1939_vm0, %v3113_v58  ;;  %3694 = vmatmul.bf16.gmra.mxu2 %v6360_v63 }
 0x836   : > { %v3098_v27 = vpop.f32.mrf.mxu2 }
 0x837   : > { %v3099_v1 = vadd.f32 %v6652_v36, %v3098_v27 }
 0x838   : > { %v6716_v28 = vpop.f32.mrf.mxu1 }
 0x83e   : > { %v3100_v56 = vpop.f32.mrf.mxu2 }
 0x83f   : > { %v3101_v11 = vadd.f32 %v6652_v36, %v3100_v56 }
 0x840   : > { %v6720_v14 = vpop.f32.mrf.mxu1 }
 0x841   : > { %v3114_v30 = vpack.c.bf16 %v3101_v11, %v3099_v1 }
 0x843   : > { %4976 = vmatmul.msk.bf16.gmra.mxu1 %vm1939_vm0, %v3114_v30  ;;  %3699 = vmatmul.bf16.gmra.mxu2 %v6363_v5  ;;  %v6737_v5 = vld [vmem:[%s7551_s14 + $0x3] ss:$0 sm:$0xff] }
 0x846   : > { %v3103_v63 = vpop.f32.mrf.mxu2 }
 0x847   : > { %v3104_v34 = vadd.f32 %v6652_v36, %v3103_v63 }
 0x848   : > { %v6724_v32 = vpop.f32.mrf.mxu1 }
 0x84e   : > { %v3105_v33 = vpop.f32.mrf.mxu2 }
 0x84f   : > { %v3106_v35 = vadd.f32 %v6652_v36, %v3105_v33 }
 0x850   : > { %v6728_v39 = vpop.f32.mrf.mxu1 }
 0x851   : > { %v3115_v40 = vpack.c.bf16 %v3106_v35, %v3104_v34 }
 0x853   : > { %4977 = vmatmul.msk.bf16.gmra.mxu1 %vm1939_vm0, %v3115_v40 }
 0x855   : > { %v2611_v41 = vpop.xlane.xlu0 %2610 }
 0x856   : > { %v2657_v59 = vsub.f32 %v6656_v42, %v2611_v41  ;;  %v3665_v43 = vpop.f32.mrf.mxu2  ;;  %v2642_v41 = vsel %vm2013_vm1, %v6716_v28, -inf }
 0x857   : > { %v3666_v47 = vadd.f32 %v6737_v5, %v3665_v43 }
 0x858   : > { %v2673_v44 = vmul.f32 1.442695, %v2657_v59  ;;  %v6732_v24 = vpop.f32.mrf.mxu1 }
 0x85a   : > { %5494 = vpow2.f32 %v2673_v44 }
 0x85d   : > { %v2614_v29 = vpop.xlane.xlu1 %2613 }
 0x85e   : > { %v2658_v36 = vsub.f32 %v6662_v3, %v2614_v29  ;;  %v3667_v25 = vpop.f32.mrf.mxu2 }
 0x85f   : > { %v3668_v48 = vadd.f32 %v6737_v5, %v3667_v25 }
 0x860   : > { %v6742_v50 = vpop.eup %5494  ;;  %v2675_v42 = vmul.f32 1.442695, %v2658_v36  ;;  %v6744_v46 = vpop.f32.mrf.mxu1 }
 0x861   : > { %v3705_v55 = vpack.c.bf16 %v3668_v48, %v3666_v47  ;;  %v2705_v38 = vsel %vm2013_vm1, %v6742_v50, 0.0  ;;  %v2645_v47 = vsel %vm2013_vm1, %v6720_v14, -inf }
 0x862   : > { %5496 = vpow2.f32 %v2675_v42  ;;  %2706 = vadd.xlane.f32.xlu2 %v2705_v38 }
 0x863   : > { %5067 = vmatmul.msk.bf16.vlgmr.msrb.gmra.mxu1 %vm1939_vm0, %v3705_v55 }
 0x865   : > { %v2617_v57 = vpop.xlane.xlu2 %2616 }
 0x866   : > { %v2659_v3 = vsub.f32 %v6668_v17, %v2617_v57  ;;  %v3670_v62 = vpop.f32.mrf.mxu2 }
 0x867   : > { %v3671_v17 = vadd.f32 %v6737_v5, %v3670_v62 }
 0x868   : > { %v6750_v21 = vpop.eup %5496  ;;  %v2677_v2 = vmul.f32 1.442695, %v2659_v3  ;;  %v6752_v60 = vpop.f32.mrf.mxu1 }
 0x869   : > { %v2708_v6 = vsel %vm2013_vm1, %v6750_v21, 0.0 }
 0x86a   : > { %5498 = vpow2.f32 %v2677_v2  ;;  %2709 = vadd.xlane.f32.xlu1 %v2708_v6  ;;  %2634 = vmax.xlane.f32.xlu2 %v2633_v8  ;;  %v2648_v6 = vsel %vm2013_vm1, %v6724_v32, -inf }
 0x86d   : > { %v2620_v9 = vpop.xlane.xlu1 %2619 }
 0x86e   : > { %v2660_v10 = vsub.f32 %v6674_v53, %v2620_v9  ;;  %v3672_v45 = vpop.f32.mrf.mxu2 }
 0x86f   : > { %v3673_v4 = vadd.f32 %v6737_v5, %v3672_v45 }
 0x870   : > { %v6761_v49 = vpop.eup %5498  ;;  %v2679_v15 = vmul.f32 1.442695, %v2660_v10  ;;  %v6763_v16 = vpop.f32.mrf.mxu1  ;;  %v2651_v10 = vsel %vm2013_vm1, %v6728_v39, -inf }
 0x871   : > { %v3706_v54 = vpack.c.bf16 %v3673_v4, %v3671_v17  ;;  %v2711_v18 = vsel %vm2013_vm1, %v6761_v49, 0.0 }
 0x872   : > { %5500 = vpow2.f32 %v2679_v15  ;;  %2712 = vadd.xlane.f32.xlu2 %v2711_v18  ;;  %2637 = vmax.xlane.f32.xlu1 %v2636_v19 }
 0x873   : > { %5068 = vmatmul.msk.bf16.gmra.mxu1 %vm1939_vm0, %v3706_v54  ;;  %v2654_v54 = vsel %vm2013_vm1, %v6732_v24, -inf }
 0x875   : > { %v2623_v53 = vpop.xlane.xlu2 %2622 }
 0x876   : > { %v2661_v52 = vsub.f32 %v6680_v0, %v2623_v53  ;;  %v3675_v22 = vpop.f32.mrf.mxu2 }
 0x877   : > { %v3676_v11 = vadd.f32 %v6737_v5, %v3675_v22 }
 0x878   : > { %v6771_v23 = vpop.eup %5500  ;;  %v2681_v26 = vmul.f32 1.442695, %v2661_v52  ;;  %v6773_v58 = vpop.f32.mrf.mxu1 }
 0x879   : > { %v2714_v27 = vsel %vm2013_vm1, %v6771_v23, 0.0  ;;  %v3215_v56 = vsel %vm2013_vm1, %v6773_v58, -inf }
 0x87a   : > { %5502 = vpow2.f32 %v2681_v26  ;;  %2715 = vadd.xlane.f32.xlu1 %v2714_v27  ;;  %2640 = vmax.xlane.f32.xlu2 %v2639_v51 }
 0x87b   : > { %3216 = vmax.xlane.f32.xlu0 %v3215_v56 }
 0x87d   : > { %v2626_v0 = vpop.xlane.xlu1 %2625 }
 0x87e   : > { %v2662_v61 = vsub.f32 %v6686_v31, %v2626_v0  ;;  %v3677_v1 = vpop.f32.mrf.mxu2 }
 0x87f   : > { %v3678_v30 = vadd.f32 %v6737_v5, %v3677_v1  ;;  %v5212_v1 = vld [vmem:[#allocation3 + $0x8] sm:$0xff] }
 0x880   : > { %v6784_v63 = vpop.eup %5502  ;;  %v2683_v33 = vmul.f32 1.442695, %v2662_v61  ;;  %v6786_v34 = vpop.f32.mrf.mxu1  ;;  %2833 = vmatpush.bf16.msrb.mxu3 %v5212_v1  ;;  %v3209_v1 = vsel %vm2013_vm1, %v6752_v60, -inf }
 0x881   : > { %v3707_v35 = vpack.c.bf16 %v3678_v30, %v3676_v11  ;;  %v2717_v40 = vsel %vm2013_vm1, %v6784_v63, 0.0  ;;  %v3218_v31 = vsel %vm2013_vm1, %v6786_v34, -inf }
 0x882   : > { %5504 = vpow2.f32 %v2683_v33  ;;  %2718 = vadd.xlane.f32.xlu2 %v2717_v40  ;;  %2643 = vmax.xlane.f32.xlu1 %v2642_v41  ;;  %v6835_v41 = vpop.f32.mrf.mxu3 }
 0x883   : > { %3219 = vmax.xlane.f32.xlu0 %v3218_v31  ;;  %5069 = vmatmul.msk.bf16.gmra.mxu1 %vm1939_vm0, %v3707_v35 }
 0x885   : > { %v2629_v59 = vpop.xlane.xlu2 %2628 }
 0x886   : > { %v2663_v43 = vsub.f32 %v6692_v37, %v2629_v59  ;;  %v3680_v44 = vpop.f32.mrf.mxu2 }
 0x887   : > { %v3681_v38 = vadd.f32 %v6737_v5, %v3680_v44 }
 0x888   : > { %v6796_v29 = vpop.eup %5504  ;;  %v2685_v36 = vmul.f32 1.442695, %v2663_v43  ;;  %v6826_v51 = vpop.f32.mrf.mxu1 }
 0x889   : > { %v2720_v25 = vsel %vm2013_vm1, %v6796_v29, 0.0 }
 0x88a   : > { %5506 = vpow2.f32 %v2685_v36  ;;  %2721 = vadd.xlane.f32.xlu1 %v2720_v25  ;;  %2646 = vmax.xlane.f32.xlu2 %v2645_v47  ;;  %v6840_v44 = vpop.f32.mrf.mxu3 }
 0x88d   : > { %v2632_v48 = vpop.xlane.xlu1 %2631 }
 0x88e   : > { %v2664_v42 = vsub.f32 %v6698_v13, %v2632_v48  ;;  %v3682_v55 = vpop.f32.mrf.mxu2 }
 0x88f   : > { %v3683_v37 = vadd.f32 %v6737_v5, %v3682_v55 }
 0x890   : > { %v6805_v57 = vpop.eup %5506  ;;  %v2687_v3 = vmul.f32 1.442695, %v2664_v42  ;;  %v6831_v30 = vpop.f32.mrf.mxu1 }
 0x891   : > { %v3708_v62 = vpack.c.bf16 %v3683_v37, %v3681_v38  ;;  %v2723_v2 = vsel %vm2013_vm1, %v6805_v57, 0.0 }
 0x892   : > { %5508 = vpow2.f32 %v2687_v3  ;;  %2724 = vadd.xlane.f32.xlu2 %v2723_v2  ;;  %2649 = vmax.xlane.f32.xlu1 %v2648_v6  ;;  %v6843_v55 = vpop.f32.mrf.mxu3 }
 0x893   : > { %5070 = vmatmul.msk.bf16.gmra.mxu1 %vm1939_vm0, %v3708_v62 }
 0x896   : > { %v3685_v13 = vpop.f32.mrf.mxu2 }
 0x897   : > { %v3686_v17 = vadd.f32 %v6737_v5, %v3685_v13 }
 0x898   : > { %v6812_v8 = vpop.eup %5508  ;;  %v6837_v59 = vpop.f32.mrf.mxu1 }
 0x899   : > { %v2726_v9 = vsel %vm2013_vm1, %v6812_v8, 0.0 }
 0x89a   : > { %2727 = vadd.xlane.f32.xlu1 %v2726_v9  ;;  %2652 = vmax.xlane.f32.xlu2 %v2651_v10 }
 0x89e   : > { %v3687_v45 = vpop.f32.mrf.mxu2 }
 0x89f   : > { %v3688_v4 = vadd.f32 %v6737_v5, %v3687_v45  ;;  %v6853_v45 = vpop.f32.mrf.mxu3 }
 0x8a1   : > { %v3709_v15 = vpack.c.bf16 %v3688_v4, %v3686_v17  ;;  %v3206_v4 = vsel %vm2013_vm1, %v6744_v46, -inf }
 0x8a2   : > { %2655 = vmax.xlane.f32.xlu1 %v2654_v54 }
 0x8a3   : > { %5071 = vmatmul.msk.bf16.gmra.mxu1 %vm1939_vm0, %v3709_v15 }
 0x8a6   : > { %v3690_v18 = vpop.f32.mrf.mxu2 }
 0x8a7   : > { %v3691_v53 = vadd.f32 %v6737_v5, %v3690_v18 }
 0x8ae   : > { %v3692_v19 = vpop.f32.mrf.mxu2 }
 0x8af   : > { %v3693_v52 = vadd.f32 %v6737_v5, %v3692_v19 }
 0x8b1   : > { %v3710_v22 = vpack.c.bf16 %v3693_v52, %v3691_v53 }
 0x8b3   : > { %5072 = vmatmul.msk.bf16.gmra.mxu1 %vm1939_vm0, %v3710_v22 }
 0x8b6   : > { %v3695_v26 = vpop.f32.mrf.mxu2 }
 0x8b7   : > { %v3696_v56 = vadd.f32 %v6737_v5, %v3695_v26 }
 0x8be   : > { %v3697_v27 = vpop.f32.mrf.mxu2 }
 0x8bf   : > { %v3698_v0 = vadd.f32 %v6737_v5, %v3697_v27 }
 0x8c1   : > { %v3711_v61 = vpack.c.bf16 %v3698_v0, %v3696_v56  ;;  %v6867_v56 = vpop.f32.mrf.mxu3 }
 0x8c3   : > { %5073 = vmatmul.msk.bf16.gmra.mxu1 %vm1939_vm0, %v3711_v61 }
 0x8c6   : > { %v3700_v11 = vpop.f32.mrf.mxu2 }
 0x8c7   : > { %v3701_v35 = vadd.f32 %v6737_v5, %v3700_v11 }
 0x8ce   : > { %v3702_v33 = vpop.f32.mrf.mxu2 }
 0x8cf   : > { %v3703_v40 = vadd.f32 %v6737_v5, %v3702_v33 }
 0x8d1   : > { %v3712_v31 = vpack.c.bf16 %v3703_v40, %v3701_v35  ;;  %v3212_v35 = vsel %vm2013_vm1, %v6763_v16, -inf }
 0x8d3   : > { %5074 = vmatmul.msk.bf16.gmra.mxu1 %vm1939_vm0, %v3712_v31 }
 0x8d5   : > { %v2707_v43 = vpop.xlane.xlu2 %2706 }
 0x8d6   : > { %5510 = vrcp.f32 %v2707_v43  ;;  %v6881_v43 = vpop.f32.mrf.mxu3 }
 0x8dc   : > { %v5511_v42 = vpop.eup %5510 }
 0x8dd   : > { %v2710_v36 = vpop.xlane.xlu1 %2709  ;;  %v2635_v25 = vpop.xlane.xlu2 %2634  ;;  %v2769_v38 = vmul.f32 %v5511_v42, %v6742_v50 }
 0x8de   : > { %5512 = vrcp.f32 %v2710_v36  ;;  %v2665_v47 = vsub.f32 %v6704_v12, %v2635_v25 }
 0x8e0   : > { %v2689_v48 = vmul.f32 1.442695, %v2665_v47 }
 0x8e2   : > { %5514 = vpow2.f32 %v2689_v48 }
 0x8e4   : > { %v5513_v5 = vpop.eup %5512 }
 0x8e5   : > { %v2770_v37 = vmul.f32 %v5513_v5, %v6750_v21  ;;  %v2713_v3 = vpop.xlane.xlu2 %2712  ;;  %v2638_v62 = vpop.xlane.xlu1 %2637 }
 0x8e6   : > { %v2666_v2 = vsub.f32 %v6708_v20, %v2638_v62  ;;  %v6891_v62 = vpop.f32.mrf.mxu1 }
 0x8e7   : > { %v2785_v6 = vpack.c.bf16 %v2770_v37, %v2769_v38 }
 0x8e8   : > { %v6848_v13 = vpop.eup %5514  ;;  %v2691_v9 = vmul.f32 1.442695, %v2666_v2  ;;  %v6893_v2 = vpop.f32.mrf.mxu3 }
 0x8e9   : > { %4885 = vmatmul.msk.bf16.vlgmr.msrb.gmra.mxu3 %vm2013_vm1, %v2785_v6  ;;  %v2729_v12 = vsel %vm2013_vm1, %v6848_v13, 0.0 }
 0x8ea   : > { %5516 = vpow2.f32 %v2691_v9  ;;  %2730 = vadd.xlane.f32.xlu2 %v2729_v12 }
 0x8eb   : > { %5518 = vrcp.f32 %v2713_v3 }
 0x8ed   : > { %v2716_v10 = vpop.xlane.xlu1 %2715  ;;  %v2641_v50 = vpop.xlane.xlu2 %2640 }
 0x8ee   : > { %5520 = vrcp.f32 %v2716_v10  ;;  %v2667_v21 = vsub.f32 %v6712_v7, %v2641_v50  ;;  %v3221_v10 = vsel %vm2013_vm1, %v6826_v51, -inf }
 0x8f0   : > { %v6856_v20 = vpop.eup %5516  ;;  %v2693_v17 = vmul.f32 1.442695, %v2667_v21 }
 0x8f1   : > { %v2732_v15 = vsel %vm2013_vm1, %v6856_v20, 0.0  ;;  %v5519_v54 = vpop.eup %5518 }
 0x8f2   : > { %5522 = vpow2.f32 %v2693_v17  ;;  %3207 = vmax.xlane.f32.xlu2 %v3206_v4  ;;  %2733 = vadd.xlane.f32.xlu1 %v2732_v15  ;;  %v2771_v52 = vmul.f32 %v5519_v54, %v6761_v49  ;;  %v6902_v17 = vpop.f32.mrf.mxu1  ;;  %v6906_v54 = vpop.f32.mrf.mxu3 }
 0x8f4   : > { %v5521_v18 = vpop.eup %5520 }
 0x8f5   : > { %v2719_v19 = vpop.xlane.xlu2 %2718  ;;  %v2644_v53 = vpop.xlane.xlu1 %2643  ;;  %v2772_v7 = vmul.f32 %v5521_v18, %v6771_v23 }
 0x8f6   : > { %v2668_v22 = vsub.f32 %v6716_v28, %v2644_v53 }
 0x8f7   : > { %v2786_v26 = vpack.c.bf16 %v2772_v7, %v2771_v52 }
 0x8f8   : > { %v6865_v27 = vpop.eup %5522  ;;  %v2695_v0 = vmul.f32 1.442695, %v2668_v22  ;;  %v3224_v22 = vsel %vm2013_vm1, %v6831_v30, -inf }
 0x8f9   : > { %4886 = vmatmul.msk.bf16.gmra.mxu3 %vm2013_vm1, %v2786_v26  ;;  %v2735_v61 = vsel %vm2013_vm1, %v6865_v27, 0.0 }
 0x8fa   : > { %5524 = vpow2.f32 %v2695_v0  ;;  %2736 = vadd.xlane.f32.xlu2 %v2735_v61  ;;  %3210 = vmax.xlane.f32.xlu1 %v3209_v1  ;;  %v6918_v26 = vpop.f32.mrf.mxu1  ;;  %v3227_v61 = vsel %vm2013_vm1, %v6837_v59, -inf }
 0x8fb   : > { %5526 = vrcp.f32 %v2719_v19 }
 0x8fd   : > { %v2722_v49 = vpop.xlane.xlu1 %2721  ;;  %v2647_v28 = vpop.xlane.xlu2 %2646 }
 0x8fe   : > { %5528 = vrcp.f32 %v2722_v49  ;;  %v2669_v23 = vsub.f32 %v6720_v14, %v2647_v28 }
 0x900   : > { %v6875_v11 = vpop.eup %5524  ;;  %v2697_v33 = vmul.f32 1.442695, %v2669_v23 }
 0x901   : > { %v2738_v40 = vsel %vm2013_vm1, %v6875_v11, 0.0  ;;  %v5527_v31 = vpop.eup %5526 }
 0x902   : > { %5530 = vpow2.f32 %v2697_v33  ;;  %3213 = vmax.xlane.f32.xlu2 %v3212_v35  ;;  %2739 = vadd.xlane.f32.xlu1 %v2738_v40  ;;  %v2773_v14 = vmul.f32 %v5527_v31, %v6784_v63  ;;  %v6929_v33 = vpop.f32.mrf.mxu1 }
 0x904   : > { %v5529_v36 = vpop.eup %5528 }
 0x905   : > { %v2725_v25 = vpop.xlane.xlu2 %2724  ;;  %v2650_v47 = vpop.xlane.xlu1 %2649  ;;  %v2774_v48 = vmul.f32 %v5529_v36, %v6796_v29 }
 0x906   : > { %v2670_v42 = vsub.f32 %v6724_v32, %v2650_v47 }
 0x907   : > { %v2787_v5 = vpack.c.bf16 %v2774_v48, %v2773_v14 }
 0x908   : > { %v6886_v38 = vpop.eup %5530  ;;  %v2699_v37 = vmul.f32 1.442695, %v2670_v42 }
 0x909   : > { %4887 = vmatmul.msk.bf16.gmra.mxu3 %vm2013_vm1, %v2787_v5  ;;  %v2741_v3 = vsel %vm2013_vm1, %v6886_v38, 0.0 }
 0x90a   : > { %5532 = vpow2.f32 %v2699_v37  ;;  %2742 = vadd.xlane.f32.xlu1 %v2741_v3  ;;  %v6940_v47 = vpop.f32.mrf.mxu1 }
 0x90b   : > { %5534 = vrcp.f32 %v2725_v25 }
 0x90d   : > { %v2728_v63 = vpop.xlane.xlu1 %2727  ;;  %v2653_v29 = vpop.xlane.xlu2 %2652 }
 0x90e   : > { %5536 = vrcp.f32 %v2728_v63  ;;  %v2671_v32 = vsub.f32 %v6728_v39, %v2653_v29  ;;  %v5214_v29 = vld [vmem:[%s7552_s0 + $0x18] sm:$0xff] }
 0x90f   : > { %2930 = vmatpush.bf16.msrb.mxu0 %v5214_v29 }
 0x910   : > { %v6896_v6 = vpop.eup %5532  ;;  %v2701_v9 = vmul.f32 1.442695, %v2671_v32 }
 0x911   : > { %v2744_v12 = vsel %vm2013_vm1, %v6896_v6, 0.0  ;;  %v5535_v50 = vpop.eup %5534 }
 0x912   : > { %5538 = vpow2.f32 %v2701_v9  ;;  %2745 = vadd.xlane.f32.xlu2 %v2744_v12  ;;  %3222 = vmax.xlane.f32.xlu1 %v3221_v10  ;;  %v2775_v15 = vmul.f32 %v5535_v50, %v6805_v57  ;;  %v3217_v57 = vpop.xlane.xlu0 %3216  ;;  %v6948_v42 = vpop.f32.mrf.mxu1  ;;  %v5213_v9 = vld [vmem:[%s7552_s0 + $0x10] sm:$0xff] }
 0x913   : > { %v3257_v0 = vsub.f32 %v6773_v58, %v3217_v57  ;;  %v3230_v58 = vsel %vm2013_vm1, %v6891_v62, -inf  ;;  %v3245_v5 = vsel %vm2013_vm1, %v6948_v42, -inf  ;;  %2931 = vmatpush.bf16.msrb.mxu0 %v5213_v9 }
 0x914   : > { %v5537_v21 = vpop.eup %5536 }
 0x915   : > { %v2656_v4 = vpop.xlane.xlu1 %2655  ;;  %v2776_v39 = vmul.f32 %v5537_v21, %v6812_v8  ;;  %v6916_v8 = vpop.f32.mrf.mxu3  ;;  %v3276_v49 = vmul.f32 1.442695, %v3257_v0 }
 0x916   : > { %v2672_v18 = vsub.f32 %v6732_v24, %v2656_v4 }
 0x917   : > { %v2788_v19 = vpack.c.bf16 %v2776_v39, %v2775_v15 }
 0x918   : > { %v6909_v53 = vpop.eup %5538  ;;  %v2703_v52 = vmul.f32 1.442695, %v2672_v18 }
 0x919   : > { %4888 = vmatmul.msk.bf16.gmra.mxu3 %vm2013_vm1, %v2788_v19  ;;  %v2747_v7 = vsel %vm2013_vm1, %v6909_v53, 0.0 }
 0x91a   : > { %5540 = vpow2.f32 %v2703_v52  ;;  %2748 = vadd.xlane.f32.xlu2 %v2747_v7  ;;  %3225 = vmax.xlane.f32.xlu1 %v3224_v22  ;;  %v3220_v28 = vpop.xlane.xlu0 %3219  ;;  %v6954_v3 = vpop.f32.mrf.mxu1 }
 0x91b   : > { %5542 = vpow2.f32 %v3276_v49  ;;  %v3258_v35 = vsub.f32 %v6786_v34, %v3220_v28  ;;  %v3248_v63 = vsel %vm2013_vm1, %v6954_v3, -inf }
 0x91d   : > { %v6927_v23 = vpop.f32.mrf.mxu3  ;;  %v3278_v40 = vmul.f32 1.442695, %v3258_v35 }
 0x91f   : > { %5544 = vpow2.f32 %v3278_v40 }
 0x920   : > { %v6920_v24 = vpop.eup %5540 }
 0x921   : > { %v2750_v1 = vsel %vm2013_vm1, %v6920_v24, 0.0  ;;  %v6934_v31 = vpop.eup %5542 }
 0x922   : > { %3228 = vmax.xlane.f32.xlu2 %v3227_v61  ;;  %2751 = vadd.xlane.f32.xlu0 %v2750_v1  ;;  %v3311_v36 = vsel %vm2013_vm1, %v6934_v31, 0.0  ;;  %v6987_v9 = vpop.f32.mrf.mxu1 }
 0x925   : > { %v6938_v25 = vpop.f32.mrf.mxu3  ;;  %v6942_v14 = vpop.eup %5544 }
 0x926   : > { %v3314_v34 = vsel %vm2013_vm1, %v6942_v14, 0.0 }
 0x92a   : > { %3231 = vmax.xlane.f32.xlu2 %v3230_v58 }
 0x92d   : > { %v6946_v48 = vpop.f32.mrf.mxu3 }
 0x932   : > { %3312 = vadd.xlane.f32.xlu2 %v3311_v36 }
 0x935   : > { %v6952_v37 = vpop.f32.mrf.mxu3 }
 0x93a   : > { %3315 = vadd.xlane.f32.xlu2 %v3314_v34  ;;  %v3233_v34 = vsel %vm2013_vm1, %v6902_v17, -inf }
 0x93d   : > { %v6961_v32 = vpop.f32.mrf.mxu3 }
 0x942   : > { %3246 = vmax.xlane.f32.xlu2 %v3245_v5 }
 0x945   : > { %v6966_v12 = vpop.f32.mrf.mxu3 }
 0x94a   : > { %3249 = vmax.xlane.f32.xlu2 %v3248_v63 }
 0x94d   : > { %v6968_v50 = vpop.f32.mrf.mxu3 }
 0x95d   : > { %v2731_v10 = vpop.xlane.xlu2 %2730 }
 0x95e   : > { %5546 = vrcp.f32 %v2731_v10 }
 0x964   : > { %v5547_v18 = vpop.eup %5546 }
 0x965   : > { %v3208_v21 = vpop.xlane.xlu2 %3207  ;;  %v2734_v4 = vpop.xlane.xlu1 %2733  ;;  %v2777_v7 = vmul.f32 %v5547_v18, %v6848_v13  ;;  %v3236_v18 = vsel %vm2013_vm1, %v6918_v26, -inf }
 0x966   : > { %v3254_v15 = vsub.f32 %v6744_v46, %v3208_v21  ;;  %5548 = vrcp.f32 %v2734_v4 }
 0x968   : > { %v3270_v39 = vmul.f32 1.442695, %v3254_v15 }
 0x96a   : > { %5550 = vpow2.f32 %v3270_v39 }
 0x96c   : > { %v5549_v19 = vpop.eup %5548  ;;  %v2835_v52 = vpop.f32.mrf.mxu3 }
 0x96d   : > { %v2778_v22 = vmul.f32 %v5549_v19, %v6856_v20  ;;  %v2737_v57 = vpop.xlane.xlu2 %2736  ;;  %v3211_v0 = vpop.xlane.xlu1 %3210 }
 0x96e   : > { %v3255_v61 = vsub.f32 %v6752_v60, %v3211_v0 }
 0x96f   : > { %v2789_v1 = vpack.c.bf16 %v2778_v22, %v2777_v7 }
 0x970   : > { %v6974_v49 = vpop.eup %5550  ;;  %v3272_v28 = vmul.f32 1.442695, %v3255_v61  ;;  %v3239_v61 = vsel %vm2013_vm1, %v6929_v33, -inf }
 0x971   : > { %4889 = vmatmul.msk.bf16.gmra.mxu3 %vm2013_vm1, %v2789_v1  ;;  %v3302_v46 = vsel %vm2013_vm1, %v6974_v49, 0.0 }
 0x972   : > { %5552 = vpow2.f32 %v3272_v28  ;;  %3303 = vadd.xlane.f32.xlu0 %v3302_v46 }
 0x973   : > { %5554 = vrcp.f32 %v2737_v57 }
 0x974   : > { %v2837_v35 = vpop.f32.mrf.mxu3 }
 0x975   : > { %v2875_v13 = vpack.c.bf16 %v2837_v35, %v2835_v52  ;;  %v3214_v58 = vpop.xlane.xlu2 %3213  ;;  %v2740_v20 = vpop.xlane.xlu1 %2739 }
 0x976   : > { %v3256_v40 = vsub.f32 %v6763_v16, %v3214_v58  ;;  %5556 = vrcp.f32 %v2740_v20 }
 0x977   : > { %4905 = vmatmul.msk.bf16.vlgmr.msrb.gmra.mxu0 %vm1939_vm0, %v2875_v13 }
 0x978   : > { %v6981_v60 = vpop.eup %5552  ;;  %v3274_v36 = vmul.f32 1.442695, %v3256_v40 }
 0x979   : > { %v3305_v5 = vsel %vm2013_vm1, %v6981_v60, 0.0  ;;  %v5555_v63 = vpop.eup %5554 }
 0x97a   : > { %5558 = vpow2.f32 %v3274_v36  ;;  %3234 = vmax.xlane.f32.xlu0 %v3233_v34  ;;  %3306 = vadd.xlane.f32.xlu1 %v3305_v5  ;;  %v2779_v10 = vmul.f32 %v5555_v63, %v6865_v27  ;;  %v3242_v63 = vsel %vm2013_vm1, %v6940_v47, -inf }
 0x97c   : > { %v5557_v29 = vpop.eup %5556  ;;  %v2840_v16 = vpop.f32.mrf.mxu3 }
 0x97d   : > { %v2780_v21 = vmul.f32 %v5557_v29, %v6875_v11  ;;  %v2743_v4 = vpop.xlane.xlu1 %2742  ;;  %v6998_v11 = vpop.f32.mrf.mxu1 }
 0x97e   : > { %5560 = vrcp.f32 %v2743_v4 }
 0x97f   : > { %v2790_v15 = vpack.c.bf16 %v2780_v21, %v2779_v10 }
 0x980   : > { %v6991_v39 = vpop.eup %5558 }
 0x981   : > { %4890 = vmatmul.msk.bf16.gmra.mxu3 %vm2013_vm1, %v2790_v15  ;;  %v3308_v19 = vsel %vm2013_vm1, %v6991_v39, 0.0 }
 0x982   : > { %3237 = vmax.xlane.f32.xlu0 %v3236_v18  ;;  %3309 = vadd.xlane.f32.xlu1 %v3308_v19 }
 0x984   : > { %v2842_v52 = vpop.f32.mrf.mxu3  ;;  %v5561_v1 = vpop.eup %5560 }
 0x985   : > { %v2876_v7 = vpack.c.bf16 %v2842_v52, %v2840_v16  ;;  %v2746_v27 = vpop.xlane.xlu2 %2745  ;;  %v3223_v22 = vpop.xlane.xlu1 %3222  ;;  %v2781_v35 = vmul.f32 %v5561_v1, %v6886_v38 }
 0x986   : > { %5562 = vrcp.f32 %v2746_v27  ;;  %v3259_v57 = vsub.f32 %v6826_v51, %v3223_v22  ;;  %v7009_v34 = vpop.f32.mrf.mxu1 }
 0x987   : > { %4906 = vmatmul.msk.bf16.gmra.mxu0 %vm1939_vm0, %v2876_v7 }
 0x988   : > { %v3280_v0 = vmul.f32 1.442695, %v3259_v57 }
 0x98a   : > { %5564 = vpow2.f32 %v3280_v0  ;;  %3240 = vmax.xlane.f32.xlu1 %v3239_v61 }
 0x98c   : > { %v5563_v28 = vpop.eup %5562  ;;  %v2845_v46 = vpop.f32.mrf.mxu3 }
 0x98d   : > { %v2782_v13 = vmul.f32 %v5563_v28, %v6896_v6  ;;  %v2749_v58 = vpop.xlane.xlu2 %2748  ;;  %v3226_v20 = vpop.xlane.xlu1 %3225 }
 0x98e   : > { %v3260_v40 = vsub.f32 %v6831_v30, %v3226_v20  ;;  %v7022_v19 = vpop.f32.mrf.mxu1  ;;  %v3803_v20 = vsel %vm2013_vm1, %v6998_v11, -inf }
 0x98f   : > { %v2791_v51 = vpack.c.bf16 %v2782_v13, %v2781_v35 }
 0x990   : > { %v7007_v36 = vpop.eup %5564  ;;  %v3282_v5 = vmul.f32 1.442695, %v3260_v40 }
 0x991   : > { %4891 = vmatmul.msk.bf16.gmra.mxu3 %vm2013_vm1, %v2791_v51  ;;  %v3317_v38 = vsel %vm2013_vm1, %v7007_v36, 0.0 }
 0x992   : > { %5566 = vpow2.f32 %v3282_v5  ;;  %3243 = vmax.xlane.f32.xlu1 %v3242_v63  ;;  %3318 = vadd.xlane.f32.xlu0 %v3317_v38  ;;  %v3806_v5 = vsel %vm2013_vm1, %v7009_v34, -inf }
 0x993   : > { %5568 = vrcp.f32 %v2749_v58 }
 0x994   : > { %v2847_v6 = vpop.f32.mrf.mxu3 }
 0x995   : > { %v2877_v30 = vpack.c.bf16 %v2847_v6, %v2845_v46  ;;  %v3229_v29 = vpop.xlane.xlu2 %3228  ;;  %v2752_v16 = vpop.xlane.xlu0 %2751  ;;  %v3251_v46 = vsel %vm2013_vm1, %v6987_v9, -inf }
 0x996   : > { %v3261_v10 = vsub.f32 %v6837_v59, %v3229_v29  ;;  %5570 = vrcp.f32 %v2752_v16  ;;  %v3809_v29 = vsel %vm2013_vm1, %v7022_v19, -inf }
 0x997   : > { %4907 = vmatmul.msk.bf16.gmra.mxu0 %vm1939_vm0, %v2877_v30 }
 0x998   : > { %v7018_v21 = vpop.eup %5566  ;;  %v3284_v4 = vmul.f32 1.442695, %v3261_v10 }
 0x999   : > { %v3320_v15 = vsel %vm2013_vm1, %v7018_v21, 0.0  ;;  %v5569_v18 = vpop.eup %5568 }
 0x99a   : > { %5572 = vpow2.f32 %v3284_v4  ;;  %3321 = vadd.xlane.f32.xlu0 %v3320_v15  ;;  %v2783_v27 = vmul.f32 %v5569_v18, %v6909_v53  ;;  %v7034_v53 = vpop.f32.mrf.mxu1 }
 0x99c   : > { %v5571_v52 = vpop.eup %5570  ;;  %v2850_v7 = vpop.f32.mrf.mxu3 }
 0x99d   : > { %v2784_v59 = vmul.f32 %v5571_v52, %v6920_v24  ;;  %v3232_v22 = vpop.xlane.xlu2 %3231 }
 0x99e   : > { %v3262_v57 = vsub.f32 %v6891_v62, %v3232_v22 }
 0x99f   : > { %v2792_v0 = vpack.c.bf16 %v2784_v59, %v2783_v27  ;;  %v5225_v59 = vld [vmem:[#allocation3 + $0x10] sm:$0xff] }
 0x9a0   : > { %v7027_v61 = vpop.eup %5572  ;;  %v3286_v1 = vmul.f32 1.442695, %v3262_v57  ;;  %3430 = vmatpush.bf16.msra.mxu3 %v5225_v59 }
 0x9a1   : > { %4892 = vmatmul.msk.bf16.gmra.mxu3 %vm2013_vm1, %v2792_v0  ;;  %v3323_v28 = vsel %vm2013_vm1, %v7027_v61, 0.0 }
 0x9a2   : > { %5574 = vpow2.f32 %v3286_v1  ;;  %3324 = vadd.xlane.f32.xlu1 %v3323_v28  ;;  %3252 = vmax.xlane.f32.xlu0 %v3251_v46  ;;  %v7047_v51 = vpop.f32.mrf.mxu1 }
 0x9a4   : > { %v2852_v24 = vpop.f32.mrf.mxu3 }
 0x9a5   : > { %v2878_v35 = vpack.c.bf16 %v2852_v24, %v2850_v7  ;;  %v7036_v62 = vpop.xlane.xlu2 %3312  ;;  %v7079_v24 = vld [vmem:[%s7553_s29] ss:$0 sm:$0xff] }
 0x9a7   : > { %4908 = vmatmul.msk.bf16.gmra.mxu0 %vm1939_vm0, %v2878_v35 }
 0x9a8   : > { %v7039_v13 = vpop.eup %5574 }
 0x9a9   : > { %v3326_v58 = vsel %vm2013_vm1, %v7039_v13, 0.0 }
 0x9aa   : > { %3327 = vadd.xlane.f32.xlu1 %v3326_v58  ;;  %3804 = vmax.xlane.f32.xlu0 %v3803_v20  ;;  %v7052_v6 = vpop.f32.mrf.mxu1  ;;  %v2376_v20 = vadd.f32 %v7079_v24, %v6835_v41 }
 0x9ad   : > { %v7045_v40 = vpop.xlane.xlu2 %3315 }
 0x9b2   : > { %3807 = vmax.xlane.f32.xlu1 %v3806_v5  ;;  %v7061_v52 = vpop.f32.mrf.mxu1 }
 0x9b5   : > { %v3247_v63 = vpop.xlane.xlu2 %3246 }
 0x9b6   : > { %v3267_v38 = vsub.f32 %v6948_v42, %v3247_v63 }
 0x9b8   : > { %v3296_v30 = vmul.f32 1.442695, %v3267_v38 }
 0x9ba   : > { %5576 = vpow2.f32 %v3296_v30  ;;  %3810 = vmax.xlane.f32.xlu1 %v3809_v29  ;;  %v7067_v27 = vpop.f32.mrf.mxu1 }
 0x9bd   : > { %v3250_v16 = vpop.xlane.xlu2 %3249 }
 0x9be   : > { %v3268_v10 = vsub.f32 %v6954_v3, %v3250_v16  ;;  %v3824_v3 = vsel %vm2013_vm1, %v7067_v27, -inf }
 0x9c0   : > { %v7057_v4 = vpop.eup %5576  ;;  %v3298_v15 = vmul.f32 1.442695, %v3268_v10 }
 0x9c1   : > { %v3341_v18 = vsel %vm2013_vm1, %v7057_v4, 0.0 }
 0x9c2   : > { %5578 = vpow2.f32 %v3298_v15  ;;  %3342 = vadd.xlane.f32.xlu1 %v3341_v18  ;;  %v7071_v22 = vpop.f32.mrf.mxu1 }
 0x9c3   : > { %v3827_v57 = vsel %vm2013_vm1, %v7071_v22, -inf }
 0x9c8   : > { %v7063_v42 = vpop.eup %5578 }
 0x9c9   : > { %v3344_v7 = vsel %vm2013_vm1, %v7063_v42, 0.0 }
 0x9ca   : > { %3345 = vadd.xlane.f32.xlu1 %v3344_v7 }
 0x9d2   : > { %3825 = vmax.xlane.f32.xlu1 %v3824_v3 }
 0x9da   : > { %3828 = vmax.xlane.f32.xlu1 %v3827_v57 }
 0x9e5   : > { %v3304_v0 = vpop.xlane.xlu0 %3303 }
 0x9e6   : > { %5580 = vrcp.f32 %v3304_v0 }
 0x9ec   : > { %v5581_v58 = vpop.eup %5580 }
 0x9ed   : > { %v3235_v1 = vpop.xlane.xlu0 %3234  ;;  %v3307_v28 = vpop.xlane.xlu1 %3306  ;;  %v3366_v30 = vmul.f32 %v5581_v58, %v6974_v49 }
 0x9ee   : > { %v3263_v46 = vsub.f32 %v6902_v17, %v3235_v1  ;;  %5582 = vrcp.f32 %v3307_v28 }
 0x9f0   : > { %v3288_v35 = vmul.f32 1.442695, %v3263_v46 }
 0x9f2   : > { %5584 = vpow2.f32 %v3288_v35 }
 0x9f4   : > { %v5583_v5 = vpop.eup %5582  ;;  %v2855_v63 = vpop.f32.mrf.mxu3 }
 0x9f5   : > { %v2933_v38 = vpop.f32.mrf.mxu0  ;;  %v3367_v29 = vmul.f32 %v5583_v5, %v6981_v60  ;;  %v3238_v16 = vpop.xlane.xlu0 %3237 }
 0x9f6   : > { %v7085_v17 = vadd.f32 %v2933_v38, %v2376_v20  ;;  %v3310_v10 = vpop.xlane.xlu1 %3309  ;;  %v3264_v15 = vsub.f32 %v6918_v26, %v3238_v16 }
 0x9f7   : > { %v3382_v18 = vpack.c.bf16 %v3367_v29, %v3366_v30  ;;  %5586 = vrcp.f32 %v3310_v10 }
 0x9f8   : > { %v7088_v7 = vpop.eup %5584  ;;  %v3290_v3 = vmul.f32 1.442695, %v3264_v15 }
 0x9f9   : > { %4982 = vmatmul.msk.bf16.vlgmr.msra.gmra.mxu3 %vm2013_vm1, %v3382_v18  ;;  %v3329_v41 = vsel %vm2013_vm1, %v7088_v7, 0.0 }
 0x9fa   : > { %5588 = vpow2.f32 %v3290_v3  ;;  %3330 = vadd.xlane.f32.xlu2 %v3329_v41 }
 0x9fb   : > { %5590 = vrcp.f32 %v7036_v62  ;;  %v2378_v62 = vadd.f32 %v7079_v24, %v6843_v55  ;;  %v3812_v55 = vsel %vm2013_vm1, %v7034_v53, -inf }
 0x9fc   : > { %v2857_v49 = vpop.f32.mrf.mxu3 }
 0x9fd   : > { %v7094_v60 = vpop.f32.mrf.mxu0  ;;  %v2879_v59 = vpack.c.bf16 %v2857_v49, %v2855_v63  ;;  %v5587_v0 = vpop.eup %5586 }
 0x9fe   : > { %v3241_v57 = vpop.xlane.xlu1 %3240  ;;  %v3368_v58 = vmul.f32 %v5587_v0, %v6991_v39 }
 0x9ff   : > { %v3265_v26 = vsub.f32 %v6929_v33, %v3241_v57  ;;  %4909 = vmatmul.msk.bf16.gmra.mxu0 %vm1939_vm0, %v2879_v59  ;;  %v3815_v59 = vsel %vm2013_vm1, %v7047_v51, -inf }
 0xa00   : > { %v7098_v1 = vpop.eup %5588 }
 0xa01   : > { %v3292_v28 = vmul.f32 1.442695, %v3265_v26  ;;  %v3332_v46 = vsel %vm2013_vm1, %v7098_v1, 0.0  ;;  %v5591_v35 = vpop.eup %5590 }
 0xa02   : > { %3333 = vadd.xlane.f32.xlu2 %v3332_v46  ;;  %v3369_v33 = vmul.f32 %v5591_v35, %v6934_v31 }
 0xa03   : > { %5592 = vpow2.f32 %v3292_v28 }
 0xa04   : > { %v2860_v20 = vpop.f32.mrf.mxu3  ;;  %v3383_v16 = vpack.c.bf16 %v3369_v33, %v3368_v58 }
 0xa05   : > { %v2938_v5 = vpop.f32.mrf.mxu0  ;;  %v3319_v38 = vpop.xlane.xlu0 %3318 }
 0xa06   : > { %v7106_v63 = vadd.f32 %v2938_v5, %v2378_v62  ;;  %v3244_v30 = vpop.xlane.xlu1 %3243  ;;  %5594 = vrcp.f32 %v3319_v38 }
 0xa07   : > { %v3266_v29 = vsub.f32 %v6940_v47, %v3244_v30 }
 0xa09   : > { %v7109_v10 = vpop.eup %5592  ;;  %v3294_v15 = vmul.f32 1.442695, %v3266_v29  ;;  %4983 = vmatmul.msk.bf16.gmra.mxu3 %vm2013_vm1, %v3383_v16 }
 0xa0a   : > { %v3335_v39 = vsel %vm2013_vm1, %v7109_v10, 0.0  ;;  %3813 = vmax.xlane.f32.xlu2 %v3812_v55 }
 0xa0b   : > { %5596 = vpow2.f32 %v3294_v15  ;;  %3336 = vadd.xlane.f32.xlu0 %v3335_v39 }
 0xa0c   : > { %5598 = vrcp.f32 %v7045_v40  ;;  %v2862_v31 = vpop.f32.mrf.mxu3  ;;  %v5595_v41 = vpop.eup %5594  ;;  %v2380_v40 = vadd.f32 %v7079_v24, %v6867_v56  ;;  %v3818_v56 = vsel %vm2013_vm1, %v7052_v6, -inf }
 0xa0d   : > { %v7117_v47 = vpop.f32.mrf.mxu0  ;;  %v2880_v18 = vpack.c.bf16 %v2862_v31, %v2860_v20  ;;  %v3322_v3 = vpop.xlane.xlu0 %3321  ;;  %v3371_v0 = vmul.f32 %v5595_v41, %v7007_v36  ;;  %v2382_v41 = vadd.f32 %v7079_v24, %v6893_v2 }
 0xa0f   : > { %4910 = vmatmul.msk.bf16.gmra.mxu0 %vm1939_vm0, %v2880_v18  ;;  %v3821_v18 = vsel %vm2013_vm1, %v7061_v52, -inf }
 0xa11   : > { %v7120_v49 = vpop.eup %5596 }
 0xa12   : > { %v3338_v57 = vsel %vm2013_vm1, %v7120_v49, 0.0  ;;  %v5599_v26 = vpop.eup %5598  ;;  %3816 = vmax.xlane.f32.xlu2 %v3815_v59 }
 0xa13   : > { %3339 = vadd.xlane.f32.xlu0 %v3338_v57  ;;  %v3370_v35 = vmul.f32 %v5599_v26, %v6942_v14 }
 0xa14   : > { %v2865_v28 = vpop.f32.mrf.mxu3 }
 0xa15   : > { %v2943_v46 = vpop.f32.mrf.mxu0  ;;  %v3253_v58 = vpop.xlane.xlu0 %3252  ;;  %v3384_v33 = vpack.c.bf16 %v3371_v0, %v3370_v35 }
 0xa16   : > { %v7130_v62 = vadd.f32 %v2943_v46, %v2380_v40  ;;  %v3325_v20 = vpop.xlane.xlu1 %3324  ;;  %v3269_v5 = vsub.f32 %v6987_v9, %v3253_v58  ;;  %v7157_v58 = vpop.f32.mrf.mxu1 }
 0xa17   : > { %5600 = vrcp.f32 %v3325_v20 }
 0xa18   : > { %v3300_v38 = vmul.f32 1.442695, %v3269_v5 }
 0xa19   : > { %4984 = vmatmul.msk.bf16.gmra.mxu3 %vm2013_vm1, %v3384_v33 }
 0xa1a   : > { %5602 = vpow2.f32 %v3300_v38 }
 0xa1b   : > { %3819 = vmax.xlane.f32.xlu0 %v3818_v56  ;;  %5604 = vrcp.f32 %v3322_v3  ;;  %v3830_v56 = vsel %vm2013_vm1, %v7157_v58, -inf }
 0xa1c   : > { %v2867_v36 = vpop.f32.mrf.mxu3 }
 0xa1d   : > { %v7136_v30 = vpop.f32.mrf.mxu0  ;;  %v2881_v14 = vpack.c.bf16 %v2867_v36, %v2865_v28  ;;  %v3805_v29 = vpop.xlane.xlu0 %3804 }
 0xa1e   : > { %v7138_v16 = vpop.xlane.xlu1 %3327  ;;  %v3851_v9 = vsub.f32 %v6998_v11, %v3805_v29  ;;  %v5601_v15 = vpop.eup %5600 }
 0xa1f   : > { %4911 = vmatmul.msk.bf16.gmra.mxu0 %vm1939_vm0, %v2881_v14  ;;  %v3373_v11 = vmul.f32 %v5601_v15, %v7027_v61  ;;  %v7170_v14 = vpop.f32.mrf.mxu1 }
 0xa20   : > { %v7142_v55 = vpop.eup %5602  ;;  %v3867_v39 = vmul.f32 1.442695, %v3851_v9 }
 0xa21   : > { %v3347_v31 = vsel %vm2013_vm1, %v7142_v55, 0.0  ;;  %v5605_v3 = vpop.eup %5604 }
 0xa22   : > { %5606 = vpow2.f32 %v3867_v39  ;;  %3348 = vadd.xlane.f32.xlu2 %v3347_v31  ;;  %v3372_v26 = vmul.f32 %v5605_v3, %v7018_v21 }
 0xa23   : > { %3822 = vmax.xlane.f32.xlu0 %v3821_v18 }
 0xa24   : > { %v2870_v59 = vpop.f32.mrf.mxu3  ;;  %v3385_v46 = vpack.c.bf16 %v3373_v11, %v3372_v26 }
 0xa25   : > { %v2948_v57 = vpop.f32.mrf.mxu0 }
 0xa26   : > { %v7152_v40 = vadd.f32 %v2948_v57, %v2382_v41  ;;  %v3808_v0 = vpop.xlane.xlu1 %3807 }
 0xa27   : > { %v3852_v28 = vsub.f32 %v7009_v34, %v3808_v0  ;;  %v7180_v39 = vpop.f32.mrf.mxu1 }
 0xa28   : > { %v7155_v35 = vpop.eup %5606  ;;  %v3836_v18 = vsel %vm2013_vm1, %v7180_v39, -inf }
 0xa29   : > { %v3869_v20 = vmul.f32 1.442695, %v3852_v28  ;;  %4985 = vmatmul.msk.bf16.gmra.mxu3 %vm2013_vm1, %v3385_v46  ;;  %v3899_v2 = vsel %vm2013_vm1, %v7155_v35, 0.0 }
 0xa2a   : > { %3900 = vadd.xlane.f32.xlu2 %v3899_v2 }
 0xa2b   : > { %5608 = vpow2.f32 %v3869_v20 }
 0xa2c   : > { %v2872_v61 = vpop.f32.mrf.mxu3 }
 0xa2d   : > { %v2882_v21 = vpack.c.bf16 %v2872_v61, %v2870_v59  ;;  %v5227_v61 = vld [vmem:[%s7552_s0 + $0x28] sm:$0xff] }
 0xa2e   : > { %v3811_v5 = vpop.xlane.xlu1 %3810  ;;  %3527 = vmatpush.bf16.msra.mxu0 %v5227_v61 }
 0xa2f   : > { %v3853_v33 = vsub.f32 %v7022_v19, %v3811_v5  ;;  %4912 = vmatmul.msk.bf16.gmra.mxu0 %vm1939_vm0, %v2882_v21  ;;  %v3833_v19 = vsel %vm2013_vm1, %v7170_v14, -inf  ;;  %v7186_v41 = vpop.f32.mrf.mxu1 }
 0xa30   : > { %v3839_v57 = vsel %vm2013_vm1, %v7186_v41, -inf }
 0xa31   : > { %v7164_v34 = vpop.eup %5608  ;;  %v3871_v38 = vmul.f32 1.442695, %v3853_v33 }
 0xa32   : > { %v3902_v36 = vsel %vm2013_vm1, %v7164_v34, 0.0  ;;  %3831 = vmax.xlane.f32.xlu2 %v3830_v56 }
 0xa33   : > { %5610 = vpow2.f32 %v3871_v38  ;;  %3903 = vadd.xlane.f32.xlu0 %v3902_v36  ;;  %v7207_v38 = vpop.f32.mrf.mxu0 }
 0xa36   : > { %v7172_v29 = vpop.xlane.xlu1 %3342 }
 0xa39   : > { %v7174_v9 = vpop.eup %5610 }
 0xa3a   : > { %v3905_v15 = vsel %vm2013_vm1, %v7174_v9, 0.0  ;;  %3834 = vmax.xlane.f32.xlu2 %v3833_v19 }
 0xa3b   : > { %3906 = vadd.xlane.f32.xlu0 %v3905_v15 }
 0xa3e   : > { %v7182_v31 = vpop.xlane.xlu1 %3345 }
 0xa43   : > { %3837 = vmax.xlane.f32.xlu0 %v3836_v18  ;;  %v2384_v18 = vadd.f32 %v7079_v24, %v6916_v8 }
 0xa46   : > { %v3826_v3 = vpop.xlane.xlu1 %3825 }
 0xa47   : > { %v3858_v11 = vsub.f32 %v7067_v27, %v3826_v3 }
 0xa49   : > { %v3881_v59 = vmul.f32 1.442695, %v3858_v11 }
 0xa4b   : > { %5612 = vpow2.f32 %v3881_v59  ;;  %3840 = vmax.xlane.f32.xlu0 %v3839_v57 }
 0xa4e   : > { %v3829_v26 = vpop.xlane.xlu1 %3828 }
 0xa4f   : > { %v3859_v0 = vsub.f32 %v7071_v22, %v3829_v26  ;;  %v5226_v22 = vld [vmem:[%s7552_s0 + $0x20] sm:$0xff] }
 0xa50   : > { %3528 = vmatpush.bf16.msra.mxu0 %v5226_v22 }
 0xa51   : > { %v7192_v28 = vpop.eup %5612  ;;  %v3883_v46 = vmul.f32 1.442695, %v3859_v0 }
 0xa52   : > { %v3920_v20 = vsel %vm2013_vm1, %v7192_v28, 0.0 }
 0xa53   : > { %5614 = vpow2.f32 %v3883_v46  ;;  %3921 = vadd.xlane.f32.xlu0 %v3920_v20 }
 0xa54   : > { %5616 = vrcp.f32 %v7138_v16 }
 0xa59   : > { %v7196_v2 = vpop.eup %5614 }
 0xa5a   : > { %v3923_v27 = vsel %vm2013_vm1, %v7196_v2, 0.0  ;;  %v5617_v5 = vpop.eup %5616 }
 0xa5b   : > { %3924 = vadd.xlane.f32.xlu0 %v3923_v27  ;;  %v3374_v56 = vmul.f32 %v5617_v5, %v7039_v13 }
 0xa6d   : > { %v3331_v21 = vpop.xlane.xlu2 %3330 }
 0xa6e   : > { %5618 = vrcp.f32 %v3331_v21 }
 0xa74   : > { %v5619_v33 = vpop.eup %5618 }
 0xa75   : > { %v3375_v36 = vmul.f32 %v5619_v33, %v7088_v7  ;;  %v3334_v19 = vpop.xlane.xlu2 %3333 }
 0xa76   : > { %5620 = vrcp.f32 %v3334_v19 }
 0xa77   : > { %v3386_v15 = vpack.c.bf16 %v3375_v36, %v3374_v56 }
 0xa79   : > { %4986 = vmatmul.msk.bf16.gmra.mxu3 %vm2013_vm1, %v3386_v15 }
 0xa7c   : > { %v2953_v3 = vpop.f32.mrf.mxu0  ;;  %v3432_v16 = vpop.f32.mrf.mxu3 }
 0xa7d   : > { %v7214_v11 = vadd.f32 %v2953_v3, %v2384_v18  ;;  %v3814_v59 = vpop.xlane.xlu2 %3813  ;;  %v5621_v0 = vpop.eup %5620 }
 0xa7e   : > { %v3337_v57 = vpop.xlane.xlu0 %3336  ;;  %v3854_v26 = vsub.f32 %v7034_v53, %v3814_v59  ;;  %v3376_v27 = vmul.f32 %v5621_v0, %v7098_v1  ;;  %v2386_v1 = vadd.f32 %v7079_v24, %v6938_v25 }
 0xa7f   : > { %5622 = vrcp.f32 %v3337_v57  ;;  %v7236_v57 = vpop.f32.mrf.mxu1 }
 0xa80   : > { %v3873_v13 = vmul.f32 1.442695, %v3854_v26 }
 0xa82   : > { %5624 = vpow2.f32 %v3873_v13 }
 0xa84   : > { %v7217_v46 = vpop.f32.mrf.mxu0  ;;  %v3434_v20 = vpop.f32.mrf.mxu3 }
 0xa85   : > { %v5623_v7 = vpop.eup %5622  ;;  %v3472_v61 = vpack.c.bf16 %v3434_v20, %v3432_v16  ;;  %v3817_v22 = vpop.xlane.xlu2 %3816 }
 0xa86   : > { %v3377_v8 = vmul.f32 %v5623_v7, %v7109_v10  ;;  %v3340_v21 = vpop.xlane.xlu0 %3339  ;;  %v3855_v5 = vsub.f32 %v7047_v51, %v3817_v22 }
 0xa87   : > { %5002 = vmatmul.msk.bf16.vlgmr.msra.gmra.mxu0 %vm1939_vm0, %v3472_v61  ;;  %5626 = vrcp.f32 %v3340_v21 }
 0xa88   : > { %v3387_v53 = vpack.c.bf16 %v3377_v8, %v3376_v27  ;;  %v7223_v33 = vpop.eup %5624  ;;  %v3875_v56 = vmul.f32 1.442695, %v3855_v5  ;;  %v5238_v8 = vld [vmem:[#allocation3 + $0x18] sm:$0xff] }
 0xa89   : > { %v3908_v36 = vsel %vm2013_vm1, %v7223_v33, 0.0  ;;  %4027 = vmatpush.bf16.msrb.mxu3 %v5238_v8 }
 0xa8a   : > { %4987 = vmatmul.msk.bf16.gmra.mxu3 %vm2013_vm1, %v3387_v53  ;;  %5628 = vpow2.f32 %v3875_v56  ;;  %3909 = vadd.xlane.f32.xlu1 %v3908_v36  ;;  %v7255_v53 = vpop.f32.mrf.mxu1 }
 0xa8b   : > { %5630 = vrcp.f32 %v7172_v29 }
 0xa8c   : > { %v2958_v51 = vpop.f32.mrf.mxu0  ;;  %v3437_v10 = vpop.f32.mrf.mxu3 }
 0xa8d   : > { %v7231_v19 = vadd.f32 %v2958_v51, %v2386_v1  ;;  %v5627_v3 = vpop.eup %5626 }
 0xa8e   : > { %v3820_v15 = vpop.xlane.xlu0 %3819  ;;  %v3378_v25 = vmul.f32 %v5627_v3, %v7120_v49  ;;  %v3842_v49 = vsel %vm2013_vm1, %v7236_v57, -inf }
 0xa8f   : > { %v3856_v18 = vsub.f32 %v7052_v6, %v3820_v15 }
 0xa90   : > { %v7234_v16 = vpop.eup %5628 }
 0xa91   : > { %v3877_v59 = vmul.f32 1.442695, %v3856_v18  ;;  %v3911_v26 = vsel %vm2013_vm1, %v7234_v16, 0.0  ;;  %v5631_v13 = vpop.eup %5630  ;;  %v3845_v18 = vsel %vm2013_vm1, %v7255_v53, -inf }
 0xa92   : > { %3912 = vadd.xlane.f32.xlu1 %v3911_v26  ;;  %v3379_v7 = vmul.f32 %v5631_v13, %v7057_v4 }
 0xa93   : > { %5632 = vpow2.f32 %v3877_v59 }
 0xa94   : > { %v7241_v29 = vpop.f32.mrf.mxu0  ;;  %v3439_v0 = vpop.f32.mrf.mxu3  ;;  %v3388_v22 = vpack.c.bf16 %v3379_v7, %v3378_v25 }
 0xa95   : > { %v3473_v6 = vpack.c.bf16 %v3439_v0, %v3437_v10  ;;  %v3349_v20 = vpop.xlane.xlu2 %3348 }
 0xa96   : > { %v3823_v27 = vpop.xlane.xlu0 %3822  ;;  %5634 = vrcp.f32 %v3349_v20 }
 0xa97   : > { %v3857_v61 = vsub.f32 %v7061_v52, %v3823_v27  ;;  %5003 = vmatmul.msk.bf16.gmra.mxu0 %vm1939_vm0, %v3473_v6  ;;  %v2388_v52 = vadd.f32 %v7079_v24, %v6952_v37  ;;  %v7270_v6 = vpop.f32.mrf.mxu1 }
 0xa99   : > { %v7246_v21 = vpop.eup %5632  ;;  %v3879_v5 = vmul.f32 1.442695, %v3857_v61  ;;  %v3848_v61 = vsel %vm2013_vm1, %v7270_v6, -inf }
 0xa9a   : > { %4988 = vmatmul.msk.bf16.gmra.mxu3 %vm2013_vm1, %v3388_v22  ;;  %v3914_v4 = vsel %vm2013_vm1, %v7246_v21, 0.0  ;;  %3843 = vmax.xlane.f32.xlu1 %v3842_v49 }
 0xa9b   : > { %5636 = vpow2.f32 %v3879_v5  ;;  %3915 = vadd.xlane.f32.xlu2 %v3914_v4 }
 0xa9c   : > { %5638 = vrcp.f32 %v7182_v31  ;;  %v2963_v56 = vpop.f32.mrf.mxu0  ;;  %v3442_v36 = vpop.f32.mrf.mxu3 }
 0xa9d   : > { %v7258_v1 = vadd.f32 %v2963_v56, %v2388_v52  ;;  %v3901_v51 = vpop.xlane.xlu2 %3900  ;;  %v5635_v10 = vpop.eup %5634 }
 0xa9e   : > { %v3381_v37 = vmul.f32 %v5635_v10, %v7142_v55 }
 0xaa1   : > { %v7260_v15 = vpop.eup %5636 }
 0xaa2   : > { %v3917_v3 = vsel %vm2013_vm1, %v7260_v15, 0.0  ;;  %v5639_v59 = vpop.eup %5638  ;;  %3846 = vmax.xlane.f32.xlu1 %v3845_v18 }
 0xaa3   : > { %3918 = vadd.xlane.f32.xlu2 %v3917_v3  ;;  %v3380_v13 = vmul.f32 %v5639_v59, %v7063_v42  ;;  %v2390_v42 = vadd.f32 %v7079_v24, %v6966_v12 }
 0xaa4   : > { %v7267_v31 = vpop.f32.mrf.mxu0  ;;  %v3444_v26 = vpop.f32.mrf.mxu3 }
 0xaa5   : > { %v3474_v25 = vpack.c.bf16 %v3444_v26, %v3442_v36  ;;  %v3832_v0 = vpop.xlane.xlu2 %3831  ;;  %v3389_v27 = vpack.c.bf16 %v3381_v37, %v3380_v13 }
 0xaa6   : > { %v3904_v7 = vpop.xlane.xlu0 %3903  ;;  %v3860_v20 = vsub.f32 %v7157_v58, %v3832_v0 }
 0xaa7   : > { %5004 = vmatmul.msk.bf16.gmra.mxu0 %vm1939_vm0, %v3474_v25  ;;  %5640 = vrcp.f32 %v3904_v7 }
 0xaa8   : > { %v3885_v8 = vmul.f32 1.442695, %v3860_v20 }
 0xaaa   : > { %4989 = vmatmul.msk.bf16.gmra.mxu3 %vm2013_vm1, %v3389_v27  ;;  %5642 = vpow2.f32 %v3885_v8 }
 0xaab   : > { %3849 = vmax.xlane.f32.xlu2 %v3848_v61  ;;  %5644 = vrcp.f32 %v3901_v51 }
 0xaac   : > { %v2968_v55 = vpop.f32.mrf.mxu0  ;;  %v3447_v22 = vpop.f32.mrf.mxu3 }
 0xaad   : > { %v7279_v5 = vadd.f32 %v2968_v55, %v2390_v42  ;;  %v3835_v58 = vpop.xlane.xlu2 %3834  ;;  %v5641_v52 = vpop.eup %5640 }
 0xaae   : > { %v3907_v49 = vpop.xlane.xlu0 %3906  ;;  %v3861_v4 = vsub.f32 %v7170_v14, %v3835_v58  ;;  %v3964_v12 = vmul.f32 %v5641_v52, %v7164_v34 }
 0xab0   : > { %v7282_v56 = vpop.eup %5642  ;;  %v3887_v36 = vmul.f32 1.442695, %v3861_v4 }
 0xab1   : > { %v3926_v10 = vsel %vm2013_vm1, %v7282_v56, 0.0  ;;  %v5645_v18 = vpop.eup %5644 }
 0xab2   : > { %5646 = vpow2.f32 %v3887_v36  ;;  %3927 = vadd.xlane.f32.xlu1 %v3926_v10  ;;  %v3963_v3 = vmul.f32 %v5645_v18, %v7155_v35 }
 0xab4   : > { %v3449_v51 = vpop.f32.mrf.mxu3  ;;  %v3979_v14 = vpack.c.bf16 %v3964_v12, %v3963_v3  ;;  %v7304_v61 = vpop.f32.mrf.mxu0 }
 0xab5   : > { %v3475_v59 = vpack.c.bf16 %v3449_v51, %v3447_v22 }
 0xab6   : > { %v3838_v37 = vpop.xlane.xlu0 %3837 }
 0xab7   : > { %v3862_v26 = vsub.f32 %v7180_v39, %v3838_v37  ;;  %5005 = vmatmul.msk.bf16.gmra.mxu0 %vm1939_vm0, %v3475_v59 }
 0xab8   : > { %v7290_v13 = vpop.eup %5646 }
 0xab9   : > { %v3889_v25 = vmul.f32 1.442695, %v3862_v26  ;;  %v3929_v0 = vsel %vm2013_vm1, %v7290_v13, 0.0 }
 0xaba   : > { %5079 = vmatmul.msk.bf16.vlgmr.msrb.gmra.mxu3 %vm2013_vm1, %v3979_v14  ;;  %3930 = vadd.xlane.f32.xlu2 %v3929_v0 }
 0xabb   : > { %5648 = vpow2.f32 %v3889_v25 }
 0xabe   : > { %v3841_v34 = vpop.xlane.xlu0 %3840 }
 0xabf   : > { %v3863_v35 = vsub.f32 %v7186_v41, %v3841_v34 }
 0xac1   : > { %v7296_v7 = vpop.eup %5648  ;;  %v3891_v20 = vmul.f32 1.442695, %v3863_v35 }
 0xac2   : > { %v3932_v39 = vsel %vm2013_vm1, %v7296_v7, 0.0 }
 0xac3   : > { %5650 = vpow2.f32 %v3891_v20  ;;  %3933 = vadd.xlane.f32.xlu0 %v3932_v39 }
 0xac4   : > { %5652 = vrcp.f32 %v3907_v49 }
 0xac9   : > { %v7300_v27 = vpop.eup %5650 }
 0xaca   : > { %v3935_v8 = vsel %vm2013_vm1, %v7300_v27, 0.0  ;;  %v5653_v41 = vpop.eup %5652 }
 0xacb   : > { %3936 = vadd.xlane.f32.xlu1 %v3935_v8  ;;  %v3965_v52 = vmul.f32 %v5653_v41, %v7174_v9 }
 0xafc   : > { %v3452_v42 = vpop.f32.mrf.mxu3 }
 0xafd   : > { %v3910_v55 = vpop.xlane.xlu1 %3909 }
 0xafe   : > { %5654 = vrcp.f32 %v3910_v55 }
 0xb04   : > { %v5655_v22 = vpop.eup %5654  ;;  %v3454_v58 = vpop.f32.mrf.mxu3 }
 0xb05   : > { %v3530_v4 = vpop.f32.mrf.mxu0  ;;  %v3966_v36 = vmul.f32 %v5655_v22, %v7223_v33  ;;  %v3476_v10 = vpack.c.bf16 %v3454_v58, %v3452_v42  ;;  %v3913_v12 = vpop.xlane.xlu1 %3912 }
 0xb06   : > { %v7309_v18 = vadd.f32 %v3530_v4, %v7085_v17  ;;  %5656 = vrcp.f32 %v3913_v12  ;;  %v3922_v22 = vpop.xlane.xlu0 %3921 }
 0xb07   : > { %5006 = vmatmul.msk.bf16.gmra.mxu0 %vm1939_vm0, %v3476_v10  ;;  %v3980_v49 = vpack.c.bf16 %v3966_v36, %v3965_v52  ;;  %v5240_v52 = vld [vmem:[%s7552_s0 + $0x38] sm:$0xff] }
 0xb08   : > { %4124 = vmatpush.bf16.msrb.mxu0 %v5240_v52  ;;  %5280 = vmatpush.bf16.msra.mxu2 %v5240_v52 }
 0xb09   : > { %5080 = vmatmul.msk.bf16.gmra.mxu3 %vm2013_vm1, %v3980_v49 }
 0xb0c   : > { %v5657_v26 = vpop.eup %5656 }
 0xb0d   : > { %v3457_v51 = vpop.f32.mrf.mxu3  ;;  %v7313_v3 = vpop.f32.mrf.mxu0  ;;  %v3967_v0 = vmul.f32 %v5657_v26, %v7234_v16 }
 0xb0e   : > { %v3916_v59 = vpop.xlane.xlu2 %3915  ;;  %v3844_v37 = vpop.xlane.xlu1 %3843 }
 0xb0f   : > { %5658 = vrcp.f32 %v3916_v59  ;;  %v3864_v9 = vsub.f32 %v7236_v57, %v3844_v37 }
 0xb11   : > { %v3893_v33 = vmul.f32 1.442695, %v3864_v9 }
 0xb13   : > { %5660 = vpow2.f32 %v3893_v33 }
 0xb15   : > { %v5659_v17 = vpop.eup %5658  ;;  %v3459_v14 = vpop.f32.mrf.mxu3 }
 0xb16   : > { %v3535_v25 = vpop.f32.mrf.mxu0  ;;  %v3968_v34 = vmul.f32 %v5659_v17, %v7246_v21  ;;  %v3477_v35 = vpack.c.bf16 %v3459_v14, %v3457_v51  ;;  %v3919_v39 = vpop.xlane.xlu2 %3918 }
 0xb17   : > { %v7319_v20 = vadd.f32 %v3535_v25, %v7106_v63  ;;  %v3847_v8 = vpop.xlane.xlu1 %3846  ;;  %5662 = vrcp.f32 %v3919_v39 }
 0xb18   : > { %v3865_v42 = vsub.f32 %v7255_v53, %v3847_v8  ;;  %5007 = vmatmul.msk.bf16.gmra.mxu0 %vm1939_vm0, %v3477_v35  ;;  %v3981_v57 = vpack.c.bf16 %v3968_v34, %v3967_v0 }
 0xb19   : > { %v7323_v55 = vpop.eup %5660 }
 0xb1a   : > { %v3895_v41 = vmul.f32 1.442695, %v3865_v42  ;;  %5081 = vmatmul.msk.bf16.gmra.mxu3 %vm2013_vm1, %v3981_v57  ;;  %v3938_v16 = vsel %vm2013_vm1, %v7323_v55, 0.0 }
 0xb1b   : > { %3939 = vadd.xlane.f32.xlu2 %v3938_v16 }
 0xb1c   : > { %5664 = vpow2.f32 %v3895_v41 }
 0xb1d   : > { %5666 = vrcp.f32 %v3922_v22  ;;  %v3462_v63 = vpop.f32.mrf.mxu3  ;;  %v5663_v4 = vpop.eup %5662 }
 0xb1e   : > { %v7328_v21 = vpop.f32.mrf.mxu0  ;;  %v3850_v53 = vpop.xlane.xlu2 %3849  ;;  %v3969_v51 = vmul.f32 %v5663_v4, %v7260_v15 }
 0xb1f   : > { %v3866_v58 = vsub.f32 %v7270_v6, %v3850_v53  ;;  %v5239_v6 = vld [vmem:[%s7552_s0 + $0x30] sm:$0xff]  ;;  %v3925_v15 = vpop.xlane.xlu0 %3924 }
 0xb20   : > { %4125 = vmatpush.bf16.msrb.mxu0 %v5239_v6  ;;  %5281 = vmatpush.bf16.msra.mxu2 %v5239_v6 }
 0xb21   : > { %v3897_v10 = vmul.f32 1.442695, %v3866_v58 }
 0xb22   : > { %v7334_v36 = vpop.eup %5664 }
 0xb23   : > { %v3941_v12 = vsel %vm2013_vm1, %v7334_v36, 0.0  ;;  %v5667_v49 = vpop.eup %5666  ;;  %5668 = vpow2.f32 %v3897_v10 }
 0xb24   : > { %3942 = vadd.xlane.f32.xlu0 %v3941_v12  ;;  %v3970_v9 = vmul.f32 %v5667_v49, %v7192_v28 }
 0xb25   : > { %v3464_v59 = vpop.f32.mrf.mxu3  ;;  %v3928_v17 = vpop.xlane.xlu1 %3927 }
 0xb26   : > { %v3540_v37 = vpop.f32.mrf.mxu0  ;;  %v3478_v33 = vpack.c.bf16 %v3464_v59, %v3462_v63  ;;  %v3982_v14 = vpack.c.bf16 %v3970_v9, %v3969_v51  ;;  %5670 = vrcp.f32 %v3928_v17 }
 0xb27   : > { %v7344_v26 = vadd.f32 %v3540_v37, %v7130_v62  ;;  %5672 = vrcp.f32 %v3925_v15 }
 0xb28   : > { %5008 = vmatmul.msk.bf16.gmra.mxu0 %vm1939_vm0, %v3478_v33 }
 0xb29   : > { %v7347_v25 = vpop.eup %5668 }
 0xb2a   : > { %5082 = vmatmul.msk.bf16.gmra.mxu3 %vm2013_vm1, %v3982_v14  ;;  %v3944_v0 = vsel %vm2013_vm1, %v7347_v25, 0.0 }
 0xb2b   : > { %3945 = vadd.xlane.f32.xlu1 %v3944_v0 }
 0xb2c   : > { %v5671_v34 = vpop.eup %5670 }
 0xb2d   : > { %v3467_v28 = vpop.f32.mrf.mxu3  ;;  %v5673_v35 = vpop.eup %5672  ;;  %v3972_v39 = vmul.f32 %v5671_v34, %v7282_v56 }
 0xb2e   : > { %v7352_v62 = vpop.f32.mrf.mxu0  ;;  %v3971_v57 = vmul.f32 %v5673_v35, %v7196_v2  ;;  %v3931_v53 = vpop.xlane.xlu2 %3930 }
 0xb30   : > { %v3983_v63 = vpack.c.bf16 %v3972_v39, %v3971_v57 }
 0xb35   : > { %v3469_v8 = vpop.f32.mrf.mxu3 }
 0xb36   : > { %v3545_v42 = vpop.f32.mrf.mxu0  ;;  %v3479_v41 = vpack.c.bf16 %v3469_v8, %v3467_v28  ;;  %v3934_v16 = vpop.xlane.xlu0 %3933 }
 0xb37   : > { %v7357_v22 = vadd.f32 %v3545_v42, %v7152_v40  ;;  %5674 = vrcp.f32 %v3934_v16 }
 0xb38   : > { %5009 = vmatmul.msk.bf16.gmra.mxu0 %vm1939_vm0, %v3479_v41  ;;  %5676 = vrcp.f32 %v3931_v53 }
 0xb3a   : > { %5083 = vmatmul.msk.bf16.gmra.mxu3 %vm2013_vm1, %v3983_v63 }
 0xb3d   : > { %v4029_v58 = vpop.f32.mrf.mxu3  ;;  %v5675_v4 = vpop.eup %5674 }
 0xb3e   : > { %v5677_v56 = vpop.eup %5676  ;;  %v3974_v52 = vmul.f32 %v5675_v4, %v7296_v7  ;;  %v7365_v49 = vpop.f32.mrf.mxu0 }
 0xb3f   : > { %v3973_v2 = vmul.f32 %v5677_v56, %v7290_v13  ;;  %v3937_v59 = vpop.xlane.xlu1 %3936 }
 0xb40   : > { %5678 = vrcp.f32 %v3937_v59 }
 0xb41   : > { %v3984_v40 = vpack.c.bf16 %v3974_v52, %v3973_v2 }
 0xb45   : > { %v4031_v10 = vpop.f32.mrf.mxu3 }
 0xb46   : > { %v4069_v12 = vpack.c.bf16 %v4031_v10, %v4029_v58  ;;  %v5679_v13 = vpop.eup %5678 }
 0xb47   : > { %v3975_v15 = vmul.f32 %v5679_v13, %v7300_v27 }
 0xb48   : > { %5099 = vmatmul.msk.bf16.vlgmr.msrb.gmra.mxu0 %vm1939_vm0, %v4069_v12 }
 0xb4a   : > { %5084 = vmatmul.msk.bf16.gmra.mxu3 %vm2013_vm1, %v3984_v40 }
 0xb84   : > { %v3550_v51 = vpop.f32.mrf.mxu0 }
 0xb85   : > { %v7368_v6 = vadd.f32 %v3550_v51, %v7214_v11 }
 0xb8c   : > { %v7370_v37 = vpop.f32.mrf.mxu0  ;;  %v4034_v7 = vpop.f32.mrf.mxu3 }
 0xb8e   : > { %v3940_v9 = vpop.xlane.xlu2 %3939 }
 0xb8f   : > { %5680 = vrcp.f32 %v3940_v9 }
 0xb94   : > { %v4036_v14 = vpop.f32.mrf.mxu3 }
 0xb95   : > { %v5681_v33 = vpop.eup %5680  ;;  %v3555_v17 = vpop.f32.mrf.mxu0  ;;  %v4070_v11 = vpack.c.bf16 %v4036_v14, %v4034_v7  ;;  %v2377_v7 = vadd.f32 %v7079_v24, %v6840_v44 }
 0xb96   : > { %v3976_v0 = vmul.f32 %v5681_v33, %v7323_v55  ;;  %v7375_v28 = vadd.f32 %v3555_v17, %v7231_v19 }
 0xb97   : > { %5100 = vmatmul.msk.bf16.gmra.mxu0 %vm1939_vm0, %v4070_v11  ;;  %v3943_v35 = vpop.xlane.xlu0 %3942 }
 0xb98   : > { %v3985_v34 = vpack.c.bf16 %v3976_v0, %v3975_v15  ;;  %5682 = vrcp.f32 %v3943_v35  ;;  %v2379_v0 = vadd.f32 %v7079_v24, %v6853_v45 }
 0xb9a   : > { %5085 = vmatmul.msk.bf16.gmra.mxu3 %vm2013_vm1, %v3985_v34 }
 0xb9d   : > { %v7379_v39 = vpop.f32.mrf.mxu0  ;;  %v4039_v8 = vpop.f32.mrf.mxu3 }
 0xb9e   : > { %v3946_v42 = vpop.xlane.xlu1 %3945  ;;  %v5683_v57 = vpop.eup %5682 }
 0xb9f   : > { %5684 = vrcp.f32 %v3946_v42  ;;  %v3977_v19 = vmul.f32 %v5683_v57, %v7334_v36 }
 0xba5   : > { %v5685_v27 = vpop.eup %5684  ;;  %v3560_v41 = vpop.f32.mrf.mxu0 }
 0xba6   : > { %v4041_v55 = vpop.f32.mrf.mxu3  ;;  %v3978_v16 = vmul.f32 %v5685_v27, %v7347_v25  ;;  %v7384_v63 = vadd.f32 %v3560_v41, %v7258_v1 }
 0xba7   : > { %v4071_v53 = vpack.c.bf16 %v4041_v55, %v4039_v8 }
 0xba8   : > { %v3986_v58 = vpack.c.bf16 %v3978_v16, %v3977_v19 }
 0xba9   : > { %5101 = vmatmul.msk.bf16.gmra.mxu0 %vm1939_vm0, %v4071_v53 }
 0xbaa   : > { %5086 = vmatmul.msk.bf16.gmra.mxu3 %vm2013_vm1, %v3986_v58 }
 0xbad   : > { %v7388_v4 = vpop.f32.mrf.mxu0 }
 0xbae   : > { %v4044_v56 = vpop.f32.mrf.mxu3 }
 0xbb5   : > { %v3565_v52 = vpop.f32.mrf.mxu0 }
 0xbb6   : > { %v4046_v10 = vpop.f32.mrf.mxu3  ;;  %v7391_v2 = vadd.f32 %v3565_v52, %v7279_v5  ;;  %v2974_v5 = vadd.f32 %v7094_v60, %v2377_v7  ;;  %v2976_v60 = vadd.f32 %v7117_v47, %v2379_v0 }
 0xbb7   : > { %v4072_v36 = vpack.c.bf16 %v4046_v10, %v4044_v56 }
 0xbb8   : > { %v3571_v9 = vadd.f32 %v7313_v3, %v2974_v5  ;;  %v3573_v3 = vadd.f32 %v7328_v21, %v2976_v60 }
 0xbb9   : > { %5102 = vmatmul.msk.bf16.gmra.mxu0 %vm1939_vm0, %v4072_v36 }
 0xbbd   : > { %v7394_v1 = vpop.f32.mrf.mxu0 }
 0xbbe   : > { %v4049_v25 = vpop.f32.mrf.mxu3 }
 0xbc5   : > { %v4127_v40 = vpop.f32.mrf.mxu0 }
 0xbc6   : > { %v4051_v12 = vpop.f32.mrf.mxu3  ;;  %v4167_v59 = vadd.f32 %v4127_v40, %v7309_v18 }
 0xbc7   : > { %v4073_v51 = vpack.c.bf16 %v4051_v12, %v4049_v25 }
 0xbc8   : > { %4183 = vst [vmem:[%s5984_s24] sm:$0xff] %v4167_v59 }
 0xbc9   : > { %5103 = vmatmul.msk.bf16.gmra.mxu0 %vm1939_vm0, %v4073_v51 }
 0xbcd   : > { %v4129_v33 = vpop.f32.mrf.mxu0 }
 0xbce   : > { %v4054_v13 = vpop.f32.mrf.mxu3  ;;  %v4168_v17 = vadd.f32 %v4129_v33, %v3571_v9 }
 0xbd0   : > { %4184 = vst [vmem:[%s5984_s24 + $0x8] sm:$0xff] %v4168_v17 }
 0xbd6   : > { %v4056_v14 = vpop.f32.mrf.mxu3 }
 0xbd7   : > { %v4074_v15 = vpack.c.bf16 %v4056_v14, %v4054_v13 }
 0xbd9   : > { %5104 = vmatmul.msk.bf16.gmra.mxu0 %vm1939_vm0, %v4074_v15 }
 0xc14   : > { %v4132_v18 = vpop.f32.mrf.mxu0 }
 0xc15   : > { %v4169_v44 = vadd.f32 %v4132_v18, %v7319_v20  ;;  %v2381_v20 = vadd.f32 %v7079_v24, %v6881_v43  ;;  %v2383_v43 = vadd.f32 %v7079_v24, %v6906_v54 }
 0xc17   : > { %4185 = vst [vmem:[%s5984_s24 + $0x10] sm:$0xff] %v4169_v44  ;;  %v2978_v45 = vadd.f32 %v7136_v30, %v2381_v20  ;;  %v2980_v30 = vadd.f32 %v7207_v38, %v2383_v43 }
 0xc19   : > { %v3575_v47 = vadd.f32 %v7352_v62, %v2978_v45  ;;  %v3577_v62 = vadd.f32 %v7365_v49, %v2980_v30 }
 0xc1c   : > { %v4134_v34 = vpop.f32.mrf.mxu0 }
 0xc1d   : > { %v4059_v11 = vpop.f32.mrf.mxu3  ;;  %v4170_v35 = vadd.f32 %v4134_v34, %v3573_v3 }
 0xc1f   : > { %4186 = vst [vmem:[%s5984_s24 + $0x18] sm:$0xff] %v4170_v35 }
 0xc25   : > { %v4061_v8 = vpop.f32.mrf.mxu3 }
 0xc26   : > { %v4137_v42 = vpop.f32.mrf.mxu0  ;;  %v4075_v57 = vpack.c.bf16 %v4061_v8, %v4059_v11 }
 0xc27   : > { %v4171_v27 = vadd.f32 %v4137_v42, %v7344_v26 }
 0xc28   : > { %5105 = vmatmul.msk.bf16.gmra.mxu0 %vm1939_vm0, %v4075_v57 }
 0xc29   : > { %4187 = vst [vmem:[%s5984_s24 + $0x20] sm:$0xff] %v4171_v27 }
 0xc2d   : > { %v4064_v21 = vpop.f32.mrf.mxu3 }
 0xc2e   : > { %v4139_v41 = vpop.f32.mrf.mxu0 }
 0xc2f   : > { %v4172_v55 = vadd.f32 %v4139_v41, %v3575_v47 }
 0xc31   : > { %4188 = vst [vmem:[%s5984_s24 + $0x28] sm:$0xff] %v4172_v55 }
 0xc35   : > { %v4066_v19 = vpop.f32.mrf.mxu3 }
 0xc36   : > { %v4142_v16 = vpop.f32.mrf.mxu0  ;;  %v4076_v53 = vpack.c.bf16 %v4066_v19, %v4064_v21 }
 0xc37   : > { %v4173_v26 = vadd.f32 %v4142_v16, %v7357_v22  ;;  %v5686_v22 = vld [vmem:[%s7553_s29] ss:$0 sm:$0xff] }
 0xc38   : > { %5106 = vmatmul.msk.bf16.vlgmr.msra.gmra.mxu2 %vm1939_vm0, %v4076_v53  ;;  %v2385_v54 = vadd.f32 %v5686_v22, %v6927_v23  ;;  %v2389_v7 = vadd.f32 %v5686_v22, %v6961_v32  ;;  %v2391_v32 = vadd.f32 %v5686_v22, %v6968_v50 }
 0xc39   : > { %4189 = vst [vmem:[%s5984_s24 + $0x30] sm:$0xff] %v4173_v26 }
 0xc3a   : > { %v2982_v24 = vadd.f32 %v7217_v46, %v2385_v54 }
 0xc3c   : > { %v3579_v38 = vadd.f32 %v7370_v37, %v2982_v24 }
 0xc3e   : > { %v4144_v58 = vpop.f32.mrf.mxu0 }
 0xc3f   : > { %v4174_v56 = vadd.f32 %v4144_v58, %v3577_v62 }
 0xc41   : > { %4190 = vst [vmem:[%s5984_s24 + $0x38] sm:$0xff] %v4174_v56 }
 0xc46   : > { %v4147_v52 = vpop.f32.mrf.mxu0 }
 0xc47   : > { %v4175_v10 = vadd.f32 %v4147_v52, %v7368_v6  ;;  %v2387_v6 = vadd.f32 %v5686_v22, %v6946_v48  ;;  %v2986_v48 = vadd.f32 %v7267_v31, %v2389_v7  ;;  %v2988_v31 = vadd.f32 %v7304_v61, %v2391_v32 }
 0xc49   : > { %4191 = vst [vmem:[%s5984_s24 + $0x40] sm:$0xff] %v4175_v10  ;;  %v2984_v23 = vadd.f32 %v7241_v29, %v2387_v6 }
 0xc4b   : > { %v3581_v40 = vadd.f32 %v7379_v39, %v2984_v23 }
 0xc4e   : > { %v4149_v49 = vpop.f32.mrf.mxu0 }
 0xc4f   : > { %v4176_v36 = vadd.f32 %v4149_v49, %v3579_v38 }
 0xc51   : > { %4192 = vst [vmem:[%s5984_s24 + $0x48] sm:$0xff] %v4176_v36 }
 0xc56   : > { %v4152_v25 = vpop.f32.mrf.mxu0 }
 0xc57   : > { %v4177_v12 = vadd.f32 %v4152_v25, %v7375_v28  ;;  %v3583_v28 = vadd.f32 %v7388_v4, %v2986_v48 }
 0xc59   : > { %4193 = vst [vmem:[%s5984_s24 + $0x50] sm:$0xff] %v4177_v12 }
 0xc5e   : > { %v4154_v46 = vpop.f32.mrf.mxu0 }
 0xc5f   : > { %v4178_v51 = vadd.f32 %v4154_v46, %v3581_v40 }
 0xc61   : > { %4194 = vst [vmem:[%s5984_s24 + $0x58] sm:$0xff] %v4178_v51 }
 0xca5   : > { %v4157_v37 = vpop.f32.mrf.mxu0 }
 0xca6   : > { %v4179_v59 = vadd.f32 %v4157_v37, %v7384_v63  ;;  %v3585_v63 = vadd.f32 %v7394_v1, %v2988_v31 }
 0xca8   : > { %4195 = vst [vmem:[%s5984_s24 + $0x60] sm:$0xff] %v4179_v59 }
 0xcad   : > { %v4159_v5 = vpop.f32.mrf.mxu0 }
 0xcae   : > { %v4180_v9 = vadd.f32 %v4159_v5, %v3583_v28 }
 0xcb0   : > { %4196 = vst [vmem:[%s5984_s24 + $0x68] sm:$0xff] %v4180_v9 }
 0xcbb   : > { %v4162_v29 = vpop.f32.mrf.mxu2 }
 0xcbc   : > { %v4181_v39 = vadd.f32 %v4162_v29, %v7391_v2 }
 0xcbe   : > { %4197 = vst [vmem:[%s5984_s24 + $0x70] sm:$0xff] %v4181_v39 }
 0xcc3   : > { %v4164_v4 = vpop.f32.mrf.mxu2 }
 0xcc4   : > { %v4182_v13 = vadd.f32 %v4164_v4, %v3585_v63 }
 0xcc6   : > { %4198 = vst [vmem:[%s5984_s24 + $0x78] sm:$0xff] %v4182_v13 }
 0xcc7   : > { %5714 = shalt.err (!%p5711_p11)
}
 0xcc8   : > { %s5784_s24 = smov 128   ;;  %s5785_s15 = smov 8  }
 0xcc9   : > { %5282 = dma.vmem_to_hbm [thread:$0]  (%p5926_p8), %s4215_s26, 2048, %s4217_s21, %s4200_s22, %s5784_s24, %s5784_s24, %s5785_s15  }
 0xcca PF: > { %s7557_s20 = sld [smem:[#allocation8_spill]]  ;;  %p5288_p12 = scmp.ge.s32.totalorder %s5781_s25, 2 }
 0xccc   : > { %p5285_p13 = pnand %p5288_p12, %p5930_p9 }
 0xcce   : > { %p5286_p0 = pneg %p5285_p13 }
 0xcd0   : > { %s4231_s27 = sand.u32 1, %s7557_s20  }
 0xcd1   : > { %s4232_s13 = scalar_lea.sflag [#allocation6], %s4231_s27 }
 0xcd2   : > { %5748 = dma.done.wait (%p5286_p0), %s4232_s13, 2048  }
 0xcd3   : > { %5750 = vsyncadd (%p5286_p0), %s4232_s13, 4294965248  ;;  %s28_s25 = sadd.s32 1, %s5781_s25   ;;  %s7559_s16 = sld [smem:[#allocation9_spill]] }
 0xcd4   : > { %p25_p1 = scmp.ge.s32.totalorder %s28_s25, 6   ;;  %s7560_s20 = sld [smem:[#allocation16_spill]] }
 0xcd5   : > { %s7561_s21 = sld [smem:[#allocation10_spill]]  ;;  %s7565_s18 = smov %s5757_s19 }
 0xcd6   : > { %s7562_s22 = sld [smem:[#allocation11_spill]]  ;;  %27 = sbr.rel (!%p25_p1) target bundleno = 11 (0xb), region = 204 }
 0xcd7   : > { %s7563_s23 = sld [smem:[#allocation12_spill]] }
 0xcd8   : > { %s7564_s24 = sld [smem:[#allocation13_spill]] }
 0xcd9   : > { %s7566_s19 = smov %s7559_s16 }
 0xcdb   :  { %4238 = vsyncpa [#allocation6], 1 }
 0xcdc   :  { %4240 = vsyncpa [#allocation6 + $0x1], 1 }

</bundles_post_ra>
